<compile_context>
chip_gen: v6e
topology: v6e:2x2x1
jax: 0.10.0
libtpu: 0.0.40
codegen_flags: <defaults>
</compile_context>

<pallas_src>
import jax
import jax.numpy as jnp
from jax.experimental import pallas as pl
from jax.experimental.pallas import tpu as pltpu


def _sine_layer_kernel(x_ref, w_ref, b_ref, o_ref):
    # x_ref: (bm, K) row tile
    # w_ref: (K, N)  = omega_0 * W^T   (pre-scaled, pre-transposed in wrapper)
    # b_ref: (1, N)  = omega_0 * b
    # o_ref: (bm, N) output tile (N = out_features on the lane axis)
    x = x_ref[...].astype(jnp.float32)
    w = w_ref[...].astype(jnp.float32)
    y = jnp.dot(x, w, preferred_element_type=jnp.float32)   # single MXU push per tile
    y = y + b_ref[...].astype(jnp.float32)                   # broadcast bias over rows
    o_ref[...] = jnp.sin(y).astype(o_ref.dtype)              # omega_0 already folded in


def _round_up(v, mult):
    return ((v + mult - 1) // mult) * mult


def _pick_block_m(m, in_f, out_f, block_m, vmem_budget_bytes=24 * 1024 * 1024):
    """Largest row tile (multiple of 8) that keeps pipelined buffers in budget."""
    bm = min(block_m, _round_up(m, 8))
    # Keep >= 2 grid steps when there is enough work (feeds both v7x TensorCores).
    if m >= 16:
        bm = min(bm, _round_up((m + 1) // 2, 8))
    bm = max(8, (bm // 8) * 8)

    def pipelined_bytes(b):
        x_bytes = 2 * b * in_f * 4                     # double-buffered x tiles
        o_bytes = 2 * b * out_f * 4                    # double-buffered out tiles
        w_bytes = 2 * (in_f * out_f + out_f) * 4       # weight + bias (worst case)
        return x_bytes + o_bytes + w_bytes

    while bm > 8 and pipelined_bytes(bm) > vmem_budget_bytes:
        bm = max(8, (bm // 2 // 8) * 8)
    return bm


def _build_call(m, in_f, out_f, bm, out_dtype, single_buffer_params):
    if single_buffer_params:
        # Weight/bias never change across grid steps -> one VMEM buffer each.
        w_spec = pl.BlockSpec((in_f, out_f), lambda i: (0, 0),
                              pipeline_mode=pl.Buffered(1))
        b_spec = pl.BlockSpec((1, out_f), lambda i: (0, 0),
                              pipeline_mode=pl.Buffered(1))
    else:
        w_spec = pl.BlockSpec((in_f, out_f), lambda i: (0, 0))
        b_spec = pl.BlockSpec((1, out_f), lambda i: (0, 0))

    cost = pl.CostEstimate(
        flops=2 * m * in_f * out_f,
        transcendentals=m * out_f,
        bytes_accessed=4 * (m * in_f + in_f * out_f + out_f + m * out_f),
    )
    return pl.pallas_call(
        _sine_layer_kernel,
        out_shape=jax.ShapeDtypeStruct((m, out_f), out_dtype),
        grid=(pl.cdiv(m, bm),),
        in_specs=[
            pl.BlockSpec((bm, in_f), lambda i: (i, 0)),   # x row tile
            w_spec,                                       # shared, pre-scaled weight
            b_spec,                                       # shared, pre-scaled bias
        ],
        out_specs=pl.BlockSpec((bm, out_f), lambda i: (i, 0)),
        compiler_params=pltpu.CompilerParams(
            dimension_semantics=("parallel",),            # row tiles -> both TCs on v7x
            vmem_limit_bytes=32 * 1024 * 1024,
        ),
        cost_estimate=cost,
    )


def sine_layer(x, weight, bias, *, omega_0=30.0, block_m=1024):
    """SIREN SineLayer forward: sin(omega_0 * (x @ W.T + b)).

    x:      (..., in_features)          float32
    weight: (out_features, in_features) float32 (PyTorch nn.Linear layout)
    bias:   (out_features,)             float32
    returns (..., out_features)
    """
    orig_shape = x.shape
    in_f = orig_shape[-1]
    out_f = weight.shape[0]

    # Flatten leading dims into one "rows" axis; rows -> sublanes,
    # out_features -> lanes (lane-dense, unmasked output stores).
    xm = x.reshape(-1, in_f)
    m = xm.shape[0]
    bm = _pick_block_m(m, in_f, out_f, block_m)

    # Fold omega_0 into the (tiny, reused) parameters: O(K*N) wrapper work
    # amortized over all M rows. omega_0 may be a traced value (no recompiles).
    # NOTE: out_features should be a multiple of 128 for lane-dense stores; a
    # tiny final layer (out=1..3) is better handled outside this kernel.
    wt = jnp.transpose(weight).astype(jnp.float32) * omega_0     # (in_f, out_f)
    b2 = (bias.astype(jnp.float32) * omega_0).reshape(1, out_f)

    try:
        out = _build_call(m, in_f, out_f, bm, x.dtype,
                          single_buffer_params=True)(xm, wt, b2)
    except Exception:
        # pipeline_mode / Buffered(1) not supported by this Pallas build:
        # fall back to default double-buffering of the parameter streams.
        out = _build_call(m, in_f, out_f, bm, x.dtype,
                          single_buffer_params=False)(xm, wt, b2)

    return out.reshape(orig_shape[:-1] + (out_f,))


if __name__ == "__main__":
    # Small SIREN-style shapes: batch of 2 coordinate sets, 128 samples each,
    # 32 input features -> 128 output features (lane-dense output).
    B, S, IN_F, OUT_F = 2, 128, 32, 128
    OMEGA_0 = 30.0

    key = jax.random.PRNGKey(0)
    kx, kw, kb = jax.random.split(key, 3)

    x = jax.random.normal(kx, (B, S, IN_F), jnp.float32)
    # SIREN hidden-layer init: U(-sqrt(6/in)/omega_0, +sqrt(6/in)/omega_0)
    w_bound = (6.0 / IN_F) ** 0.5 / OMEGA_0
    weight = jax.random.uniform(kw, (OUT_F, IN_F), jnp.float32,
                                minval=-w_bound, maxval=w_bound)
    # PyTorch nn.Linear default bias init: U(-1/sqrt(in), 1/sqrt(in))
    b_bound = 1.0 / (IN_F ** 0.5)
    bias = jax.random.uniform(kb, (OUT_F,), jnp.float32,
                              minval=-b_bound, maxval=b_bound)

    out = sine_layer(x, weight, bias, omega_0=OMEGA_0)
    out = jax.block_until_ready(out)

    ref = jnp.sin(OMEGA_0 * (x @ weight.T + bias))
    assert out.shape == (B, S, OUT_F)
    max_err = float(jnp.max(jnp.abs(out - ref)))
    assert max_err < 1e-3, f"max abs err {max_err}"

    print("KERNEL_OK")
</pallas_src>

<mosaic_0001>
module attributes {stable_mosaic.version = 11 : i64} {
  func.func @_sine_layer_kernel(%arg0: i32, %arg1: memref<128x32xf32, #tpu.memory_space<vmem>>, %arg2: memref<32x128xf32, #tpu.memory_space<vmem>>, %arg3: memref<1x128xf32, #tpu.memory_space<vmem>>, %arg4: memref<128x128xf32, #tpu.memory_space<vmem>>) attributes {dimension_semantics = [#tpu.dimension_semantics<parallel>], iteration_bounds = array<i64: 2>, scalar_prefetch = 0 : i64, scratch_operands = 0 : i64, tpu.core_type = #tpu.core_type<tc>, window_params = [{transform_indices = @transform_0, window_bounds = array<i64: 128, 32>}, {pipeline_mode = #tpu.pipeline_mode<synchronous>, transform_indices = @transform_1, window_bounds = array<i64: 32, 128>}, {pipeline_mode = #tpu.pipeline_mode<synchronous>, transform_indices = @transform_2, window_bounds = array<i64: 1, 128>}, {transform_indices = @transform_3, window_bounds = array<i64: 128, 128>}]} {
    %c0 = arith.constant 0 : index
    %c0_0 = arith.constant 0 : index
    %0 = vector.load %arg1[%c0, %c0_0] : memref<128x32xf32, #tpu.memory_space<vmem>>, vector<128x32xf32>
    %c0_1 = arith.constant 0 : index
    %c0_2 = arith.constant 0 : index
    %1 = vector.load %arg2[%c0_1, %c0_2] : memref<32x128xf32, #tpu.memory_space<vmem>>, vector<32x128xf32>
    %cst = arith.constant dense<0.000000e+00> : vector<128x128xf32>
    %2 = tpu.matmul %0, %1, %cst {dimension_numbers = #tpu.dot_dimension_numbers<[1], [0], [0], [1], [0, 0, 1, 1], [], []>} : vector<128x32xf32>, vector<32x128xf32>, vector<128x128xf32> -> vector<128x128xf32>
    %c0_3 = arith.constant 0 : index
    %c0_4 = arith.constant 0 : index
    %3 = vector.load %arg3[%c0_3, %c0_4] : memref<1x128xf32, #tpu.memory_space<vmem>>, vector<1x128xf32>
    %4 = vector.broadcast %3 : vector<1x128xf32> to vector<128x128xf32>
    %5 = arith.addf %2, %4 : vector<128x128xf32>
    %6 = math.sin %5 : vector<128x128xf32>
    %c0_5 = arith.constant 0 : index
    %c0_6 = arith.constant 0 : index
    %7 = vector.load %arg4[%c0_5, %c0_6] : memref<128x128xf32, #tpu.memory_space<vmem>>, vector<128x128xf32>
    tpu.vector_store %arg4[%c0_5, %c0_6], %6 {strides = array<i32>} : memref<128x128xf32, #tpu.memory_space<vmem>>, vector<128x128xf32>,
    return
  }
  func.func @transform_0(%arg0: i32) -> (i32, i32) {
    %c0_i32 = arith.constant 0 : i32
    %c0_i32_0 = arith.constant 0 : i32
    return %arg0, %c0_i32 : i32, i32
  }
  func.func @transform_1(%arg0: i32) -> (i32, i32) {
    %c0_i32 = arith.constant 0 : i32
    %c0_i32_0 = arith.constant 0 : i32
    %c0_i32_1 = arith.constant 0 : i32
    return %c0_i32, %c0_i32_0 : i32, i32
  }
  func.func @transform_2(%arg0: i32) -> (i32, i32) {
    %c0_i32 = arith.constant 0 : i32
    %c0_i32_0 = arith.constant 0 : i32
    %c0_i32_1 = arith.constant 0 : i32
    return %c0_i32, %c0_i32_0 : i32, i32
  }
  func.func @transform_3(%arg0: i32) -> (i32, i32) {
    %c0_i32 = arith.constant 0 : i32
    %c0_i32_0 = arith.constant 0 : i32
    return %arg0, %c0_i32 : i32, i32
  }
}

module attributes {stable_mosaic.version = 11 : i64} {
  func.func @_sine_layer_kernel(%arg0: i32, %arg1: memref<128x32xf32, #tpu.memory_space<vmem>>, %arg2: memref<32x128xf32, #tpu.memory_space<vmem>>, %arg3: memref<1x128xf32, #tpu.memory_space<vmem>>, %arg4: memref<128x128xf32, #tpu.memory_space<vmem>>) attributes {dimension_semantics = [#tpu.dimension_semantics<parallel>], iteration_bounds = array<i64: 2>, scalar_prefetch = 0 : i64, scratch_operands = 0 : i64, tpu.core_type = #tpu.core_type<tc>, window_params = [{transform_indices = @transform_0, window_bounds = array<i64: 128, 32>}, {pipeline_mode = #tpu.pipeline_mode<synchronous>, transform_indices = @transform_1, window_bounds = array<i64: 32, 128>}, {pipeline_mode = #tpu.pipeline_mode<synchronous>, transform_indices = @transform_2, window_bounds = array<i64: 1, 128>}, {transform_indices = @transform_3, window_bounds = array<i64: 128, 128>}]} {
    %c0 = arith.constant 0 : index
    %c0_0 = arith.constant 0 : index
    %0 = vector.load %arg1[%c0, %c0_0] : memref<128x32xf32, #tpu.memory_space<vmem>>, vector<128x32xf32>
    %c0_1 = arith.constant 0 : index
    %c0_2 = arith.constant 0 : index
    %1 = vector.load %arg2[%c0_1, %c0_2] : memref<32x128xf32, #tpu.memory_space<vmem>>, vector<32x128xf32>
    %cst = arith.constant dense<0.000000e+00> : vector<128x128xf32>
    %2 = tpu.matmul %0, %1, %cst {dimension_numbers = #tpu.dot_dimension_numbers<[1], [0], [0], [1], [0, 0, 1, 1], [], []>} : vector<128x32xf32>, vector<32x128xf32>, vector<128x128xf32> -> vector<128x128xf32>
    %c0_3 = arith.constant 0 : index
    %c0_4 = arith.constant 0 : index
    %3 = vector.load %arg3[%c0_3, %c0_4] : memref<1x128xf32, #tpu.memory_space<vmem>>, vector<1x128xf32>
    %4 = vector.broadcast %3 : vector<1x128xf32> to vector<128x128xf32>
    %5 = arith.addf %2, %4 : vector<128x128xf32>
    %6 = math.sin %5 : vector<128x128xf32>
    %c0_5 = arith.constant 0 : index
    %c0_6 = arith.constant 0 : index
    %7 = vector.load %arg4[%c0_5, %c0_6] : memref<128x128xf32, #tpu.memory_space<vmem>>, vector<128x128xf32>
    tpu.vector_store %arg4[%c0_5, %c0_6], %6 {strides = array<i32>} : memref<128x128xf32, #tpu.memory_space<vmem>>, vector<128x128xf32>,
    return
  }
  func.func @transform_0(%arg0: i32) -> (i32, i32) {
    %c0_i32 = arith.constant 0 : i32
    %c0_i32_0 = arith.constant 0 : i32
    return %arg0, %c0_i32 : i32, i32
  }
  func.func @transform_1(%arg0: i32) -> (i32, i32) {
    %c0_i32 = arith.constant 0 : i32
    %c0_i32_0 = arith.constant 0 : i32
    %c0_i32_1 = arith.constant 0 : i32
    return %c0_i32, %c0_i32_0 : i32, i32
  }
  func.func @transform_2(%arg0: i32) -> (i32, i32) {
    %c0_i32 = arith.constant 0 : i32
    %c0_i32_0 = arith.constant 0 : i32
    %c0_i32_1 = arith.constant 0 : i32
    return %c0_i32, %c0_i32_0 : i32, i32
  }
  func.func @transform_3(%arg0: i32) -> (i32, i32) {
    %c0_i32 = arith.constant 0 : i32
    %c0_i32_0 = arith.constant 0 : i32
    return %arg0, %c0_i32 : i32, i32
  }
}

</mosaic_0001>

<bundles_post_ra>
// kernel: tpu_custom_call.1
= control target key start
LH: loop header
LB: loop body
LE: loop exit
PB: predicated region body
PF: predicated region fallthrough
CT: control target
= control target key end

     0   :  { %8 = vsyncpa [#allocation3], 0  ;;  %s3864_s0 = inlined_call_operand.vmem [shape: f32[256,32], index: 0, kind: input, shape index: {}]   ;;  %s3865_s1 = inlined_call_operand.vmem [shape: f32[32,128], index: 1, kind: input, shape index: {}]   ;;  %s3866_s2 = inlined_call_operand.vmem [shape: f32[1,128], index: 2, kind: input, shape index: {}]   ;;  %s3867_s3 = inlined_call_operand.hbm [shape: f32[256,128], index: 3, kind: output, shape index: {}]  }
   0x1   :  { %10 = vsyncpa [#allocation3 + $0x1], 0  ;;  %s2571_s12 = smov 0   ;;  %s2573_s13 = smov 0  }
   0x2   :  { %s2575_s14 = smov 0   ;;  %s2577_s15 = smov 0  }
   0x3 LB: > { %s2592_s16 = sadd.s32 4294967295, %s2540_s15   ;;  %s2149_s17 = sadd.s32 4294967294, %s2540_s15   ;;  %s2540_s15 = sphi %s2577_s15, %s3901_s15   ;;  %s2536_s14 = sphi %s2575_s14, %s3900_s14   ;;  %s2532_s13 = sphi %s2573_s13, %s3899_s13   ;;  %s2528_s12 = sphi %s2571_s12, %s3898_s12  }
   0x4   : > { %s2596_s18 = sadd.s32 1, %s2540_s15   ;;  %s91_s19 = sadd.s32 1, %s2536_s14 }
   0x5   : > { %s88_s20 = ssub.s32 %s2540_s15, %s2596_s18  ;;  %p101_p0 = scmp.ne.s32.totalorder %s2536_s14, %s2532_s13 }
   0x6   : > { %p89_p1 = scmp.eq.s32.totalorder %s88_s20, 0  ;;  %p102_p2 = scmp.eq.s32.totalorder %s2592_s16, 1 }
   0x7   : > { %p107_p3 = scmp.ne.s32.totalorder %s2532_s13, %s2528_s12  ;;  %p108_p4 = scmp.eq.s32.totalorder %s2149_s17, 1 }
   0x8   : > { %s2607_s21 = scalar_select %p89_p1, %s2536_s14, %s91_s19  }
   0x9   : > { %p2609_p5 = por %p102_p2, %p101_p0  ;;  %p2613_p6 = por %p108_p4, %p107_p3 }
   0xa   : > { %p2152_p7 = scmp.ge.s32.totalorder %s2540_s15, 1  ;;  %p141_p8 = scmp.lt.s32.totalorder %s2540_s15, 3 }
   0xc   : > { %p142_p9 = pnand %p2152_p7, %p141_p8 }
   0xd   : > { %s2154_s28 = sshll.u32 (!%p142_p9), %s2592_s16, 4  ;;  %s162_s17 = sand.u32 (!%p142_p9), 1, %s2532_s13  }
   0xe   : > { %145 = sbr.rel (%p142_p9) target bundleno = 672 (0x2a0), region = 32  ;;  %p166_p10 = scmp.lt.s32.totalorder (!%p142_p9), %s2154_s28, 31 }
   0xf   : > { %s2153_s19 = sshll.u32 (!%p142_p9), %s162_s17, 7  ;;  %s2548_s7 = smov (!%p142_p9), [#allocation2]  }
  0x10   : > { %s2978_s20 = scalar_lea.vmem (!%p142_p9), [#allocation2], %s2153_s19  ;;  %s2484_s8 = sshll.u32 (!%p142_p9), %s2548_s7, 4  ;;  %s2485_s8 = int_to_ptr.vmem [resolvable:$false] %s2484_s8 }
  0x11   : > { %s2087_s29 = sshll.u32 (!%p142_p9), %s2978_s20, 4  ;;  %s3818_s29 = int_to_ptr.vmem [resolvable:$true] %s2087_s29 }
  0x12   : > { %p2487_p0 = scmp.lt.s32.totalorder (!%p142_p9), %s3818_s29, %s2485_s8 }
  0x13   : > { %v191_v0 = vld [vmem:[%s3865_s1 + $0x18] sm:$0xff]  ;;  %v190_v1 = vld [vmem:[%s3865_s1 + $0x10] sm:$0xff]  ;;  %v189_v2 = vld [vmem:[%s3865_s1 + $0x8] sm:$0xff]  ;;  %s3903_s28 = smov (!%p166_p10, %s2154_s28), 31  ;;  %vm199_vm0 = vcmask 261120  }
  0x14   : > { %2263 = vmatprep.subr.mxu0 %v191_v0  ;;  %2295 = vmatprep.subr.mxu1 %v191_v0  ;;  %v188_v3 = vld [vmem:[%s3865_s1] sm:$0xff]  ;;  %s2155_s6 = sshll.u32 %s3903_s28, 3  ;;  %v2542_v56 = vmov 683565275   ;;  %v2543_v60 = vmov 2475754826  }
  0x15   : > { %2264 = vmatpush3.msra.mxu0 %v191_v0  ;;  %2299 = vmatpush3.msra.mxu1 %v191_v0  ;;  %s2635_s9 = scalar_lea.vmem %s3864_s0, %s2155_s6  ;;  %v2672_v20 = vld [vmem:[%s3866_s2] ss:$0 sm:$0xff]  ;;  %v2544_v62 = vmov 2131351028   ;;  %v2545_v0 = vmov 2102212464  }
  0x16   : > { %2265 = vmatprep.subr.mxu0 %v190_v1  ;;  %2296 = vmatprep.subr.mxu1 %v190_v1  ;;  %v172_v4 = vld [vmem:[%s2635_s9] sm:$0xff]  ;;  %v173_v6 = vld [vmem:[%s2635_s9 + $0x8] sm:$0xff]  ;;  %v174_v8 = vld [vmem:[%s2635_s9 + $0x10] sm:$0xff]  ;;  %s2242_s28 = sshll.u32 %s2592_s16, 11  ;;  %s3824_s16 = scalar_lea.sflag [#allocation3], %s162_s17 }
  0x17   : > { %2266 = vmatpush3.msra.mxu0 %v190_v1  ;;  %2300 = vmatpush3.msra.mxu1 %v190_v1  ;;  %v180_v5 = vld [vmem:[%s2635_s9 + $0x40] sm:$0xff]  ;;  %v181_v7 = vld [vmem:[%s2635_s9 + $0x48] sm:$0xff]  ;;  %v182_v9 = vld [vmem:[%s2635_s9 + $0x50] sm:$0xff]  ;;  %s3816_s5 = scalar_lea.hbm %s3867_s3, %s2242_s28  ;;  %s2480_s6 = scalar_lea.vmem %s3818_s29, 2048 }
  0x18   : > { %2267 = vmatprep.subr.mxu0 %v189_v2  ;;  %2297 = vmatprep.subr.mxu1 %v189_v2  ;;  %v175_v10 = vld [vmem:[%s2635_s9 + $0x18] sm:$0xff]  ;;  %v176_v12 = vld [vmem:[%s2635_s9 + $0x20] sm:$0xff]  ;;  %v177_v14 = vld [vmem:[%s2635_s9 + $0x28] sm:$0xff]  ;;  %p2481_p11 = scmp.ne.s32.totalorder %s3818_s29, %s2480_s6 }
  0x19   : > { %2268 = vmatpush3.msra.mxu0 %v189_v2  ;;  %2301 = vmatpush3.msra.mxu1 %v189_v2  ;;  %v183_v11 = vld [vmem:[%s2635_s9 + $0x58] sm:$0xff]  ;;  %v184_v13 = vld [vmem:[%s2635_s9 + $0x60] sm:$0xff]  ;;  %v185_v15 = vld [vmem:[%s2635_s9 + $0x68] sm:$0xff]  ;;  %v2546_v2 = vmov 920167782  }
  0x1a   : > { %2269 = vmatprep.subr.mxu0 %v188_v3  ;;  %2298 = vmatprep.subr.mxu1 %v188_v3  ;;  %v178_v16 = vld [vmem:[%s2635_s9 + $0x30] sm:$0xff]  ;;  %v179_v18 = vld [vmem:[%s2635_s9 + $0x38] sm:$0xff]  ;;  %p2482_p12 = pnand %p2481_p11, %p2609_p5 }
  0x1b   : > { %2270 = vmatpush3.msra.mxu0 %v188_v3  ;;  %2302 = vmatpush3.msra.mxu1 %v188_v3  ;;  %v186_v17 = vld [vmem:[%s2635_s9 + $0x70] sm:$0xff]  ;;  %v187_v19 = vld [vmem:[%s2635_s9 + $0x78] sm:$0xff]  ;;  %s2486_s9 = scalar_lea.vmem %s2485_s8, 4096 }
  0x1c   : > { %2271 = vmatprep.mubr.msk.f32.mxu0 %vm199_vm0, %v172_v4  ;;  %2283 = vmatprep.mubr.msk.f32.mxu1 %vm199_vm0, %v180_v5  ;;  %p2483_p13 = pneg %p2482_p12  ;;  %p2488_p1 = scmp.lt.s32.totalorder %s2486_s9, %s2480_s6 }
  0x1d   : > { %2272 = vmatmul.mubr.msk.f32.vlgmr.msra.gmra.mxu0 %vm199_vm0, %v173_v6  ;;  %2284 = vmatmul.mubr.msk.f32.vlgmr.msra.gmra.mxu1 %vm199_vm0, %v181_v7 }
  0x1e   : > { %2274 = vmatprep.mubr.msk.f32.mxu0 %vm199_vm0, %v174_v8  ;;  %2286 = vmatprep.mubr.msk.f32.mxu1 %vm199_vm0, %v182_v9  ;;  %v2547_v9 = vmov 1326507024   ;;  %p2489_p2 = por %p2488_p1, %p2487_p0 }
  0x20   : > { %p2490_p3 = pnand %p2489_p2, %p2483_p13 }
  0x21   : > { %2275 = vmatmul.mubr.msk.f32.gmra.mxu0 %vm199_vm0, %v175_v10  ;;  %2287 = vmatmul.mubr.msk.f32.gmra.mxu1 %vm199_vm0, %v183_v11 }
  0x22   : > { %2277 = vmatprep.mubr.msk.f32.mxu0 %vm199_vm0, %v176_v12  ;;  %2289 = vmatprep.mubr.msk.f32.mxu1 %vm199_vm0, %v184_v13 }
  0x25   : > { %2278 = vmatmul.mubr.msk.f32.gmra.mxu0 %vm199_vm0, %v177_v14  ;;  %2290 = vmatmul.mubr.msk.f32.gmra.mxu1 %vm199_vm0, %v185_v15 }
  0x26   : > { %2280 = vmatprep.mubr.msk.f32.mxu0 %vm199_vm0, %v178_v16  ;;  %2292 = vmatprep.mubr.msk.f32.mxu1 %vm199_vm0, %v186_v17 }
  0x29   : > { %2281 = vmatmul.mubr.msk.f32.gmra.mxu0 %vm199_vm0, %v179_v18  ;;  %2293 = vmatmul.mubr.msk.f32.gmra.mxu1 %vm199_vm0, %v187_v19 }
  0xdd   : > { %v2273_v21 = vpop.f32.mrf.mxu0  ;;  %v2285_v22 = vpop.f32.mrf.mxu1 }
  0xde   : > { %v2675_v23 = vadd.f32 %v2273_v21, %v2672_v20  ;;  %v2678_v24 = vadd.f32 %v2285_v22, %v2672_v20 }
  0xdf   : > { %v314_v25 = vpop.f32.mrf.mxu0  ;;  %v354_v44 = vpop.f32.mrf.mxu1 }
  0xe0   : > { %v497_v26 = vand.u32 2147483647, %v2675_v23  ;;  %v500_v27 = vand.u32 2139095040, %v2675_v23  ;;  %v1329_v28 = vand.u32 2147483647, %v2678_v24  ;;  %v1332_v29 = vand.u32 2139095040, %v2678_v24 }
  0xe1   : > { %v2687_v32 = vadd.f32 %v2672_v20, %v314_v25  ;;  %v2694_v50 = vadd.f32 %v2672_v20, %v354_v44  ;;  %vm499_vm14 = vcmp.lt.s32.totalorder %v2675_v23, 0 }
  0xe2   : > { %v501_v30 = vshrl.u32 %v500_v27, 23  ;;  %v504_v31 = vand.u32 8388607, %v497_v26  ;;  %v1333_v33 = vshrl.u32 %v1332_v29, 23  ;;  %v1336_v34 = vand.u32 8388607, %v1329_v28 }
  0xe3   : > { %v396_v37 = vand.u32 2139095040, %v2687_v32  ;;  %v393_v42 = vand.u32 2147483647, %v2687_v32  ;;  %vm2799_vm15 = vcmp.le.f32.partialorder %v497_v26, 0.7853982 }
  0xe4   : > { %v2177_v35 = vadd.s32 4294967169, %v501_v30  ;;  %v2209_v36 = vadd.s32 4294967169, %v1333_v33  ;;  %v505_v38 = vor.u32 8388608, %v504_v31  ;;  %v1337_v40 = vor.u32 8388608, %v1336_v34 }
  0xe5   : > { %v397_v43 = vshrl.u32 %v396_v37, 23  ;;  %v2704_v54 = vand.u32 8388607, %v393_v42 }
  0xe6   : > { %v507_v39 = vadd.s32 1, %v2177_v35  ;;  %v1339_v41 = vadd.s32 1, %v2209_v36  ;;  %v2696_v51 = vshll.u32 %v505_v38, 8  ;;  %v2700_v53 = vshll.u32 %v1337_v40, 8 }
  0xe7   : > { %v2173_v46 = vadd.s32 4294967169, %v397_v43 }
  0xe8   : > { %vm508_vm1 = vcmp.gt.s32.totalorder %v507_v39, 0  ;;  %vm1340_vm2 = vcmp.gt.s32.totalorder %v1339_v41, 0 }
  0xe9   : > { %v509_v45 = vsel %vm508_vm1, %v507_v39, 0  ;;  %v1341_v49 = vsel %vm1340_vm2, %v1339_v41, 0  ;;  %v2707_v59 = vadd.s32 1, %v2173_v46 }
  0xea   : > { %v510_v47 = vshrl.u32 %v509_v45, 5  ;;  %v511_v48 = vand.u32 31, %v509_v45  ;;  %v2698_v52 = vshrl.u32 %v1341_v49, 5  ;;  %v1343_v58 = vand.u32 31, %v1341_v49 }
  0xeb   : > { %vm404_vm12 = vcmp.gt.s32.totalorder %v2707_v59, 0 }
  0xec   : > { %v512_v55 = vsub.s32 32, %v511_v48  ;;  %v514_v57 = vshll.u32 %v2542_v56, %v511_v48  ;;  %v517_v61 = vshll.u32 %v2543_v60, %v511_v48  ;;  %v520_v63 = vshll.u32 %v2544_v62, %v511_v48 }
  0xed   : > { %v523_v1 = vshll.u32 %v2545_v0, %v511_v48  ;;  %v526_v3 = vshll.u32 %v2546_v2, %v511_v48  ;;  %vm529_vm3 = vcmp.lt.s32.totalorder %v510_v47, 1  ;;  %vm530_vm4 = vcmp.lt.s32.totalorder %v510_v47, 2 }
  0xee   : > { %v515_v4 = vshrl.u32 %v2543_v60, %v512_v55  ;;  %v518_v5 = vshrl.u32 %v2544_v62, %v512_v55  ;;  %v521_v6 = vshrl.u32 %v2545_v0, %v512_v55  ;;  %v513_v7 = vshrl.u32 %v2542_v56, %v512_v55 }
  0xef   : > { %v524_v8 = vshrl.u32 %v2546_v2, %v512_v55  ;;  %v527_v10 = vshrl.u32 %v2547_v9, %v512_v55  ;;  %v1344_v14 = vsub.s32 32, %v1343_v58  ;;  %vm531_vm5 = vcmp.lt.s32.totalorder %v510_v47, 3 }
  0xf0   : > { %v516_v11 = vor.u32 %v515_v4, %v514_v57  ;;  %v519_v12 = vor.u32 %v518_v5, %v517_v61  ;;  %v522_v13 = vor.u32 %v521_v6, %v520_v63  ;;  %vm532_vm6 = vcmp.lt.s32.totalorder %v510_v47, 4 }
  0xf1   : > { %v525_v15 = vor.u32 %v524_v8, %v523_v1  ;;  %v528_v16 = vor.u32 %v527_v10, %v526_v3  ;;  %v1346_v29 = vshll.u32 %v2542_v56, %v1343_v58  ;;  %v1347_v33 = vshrl.u32 %v2543_v60, %v1344_v14 }
  0xf2   : > { %v533_v17 = vsel %vm529_vm3, %v513_v7, %v516_v11  ;;  %v534_v18 = vsel %vm532_vm6, %v522_v13, 2102212464  ;;  %v537_v19 = vsel %vm529_vm3, %v516_v11, %v519_v12  ;;  %v541_v21 = vsel %vm529_vm3, %v519_v12, %v522_v13 }
  0xf3   : > { %v535_v22 = vsel %vm531_vm5, %v519_v12, %v534_v18  ;;  %v538_v25 = vsel %vm532_vm6, %v525_v15, 920167782  ;;  %v542_v27 = vsel %vm532_vm6, %v528_v16, 1326507024  ;;  %v1349_v34 = vshll.u32 %v2543_v60, %v1343_v58 }
  0xf4   : > { %v539_v30 = vsel %vm531_vm5, %v522_v13, %v538_v25  ;;  %v543_v31 = vsel %vm531_vm5, %v525_v15, %v542_v27  ;;  %v536_v35 = vsel %vm530_vm4, %v533_v17, %v535_v22  ;;  %v1350_v38 = vshrl.u32 %v2544_v62, %v1344_v14 }
  0xf5   : > { %v540_v36 = vsel %vm530_vm4, %v537_v19, %v539_v30  ;;  %v544_v37 = vsel %vm530_vm4, %v541_v21, %v543_v31  ;;  %v1348_v44 = vor.u32 %v1347_v33, %v1346_v29  ;;  %v1352_v46 = vshll.u32 %v2544_v62, %v1343_v58 }
  0xf6   : > { %v2730_v39 = vmul.u32.u64.low %v2696_v51, %v544_v37  ;;  %v2731_v40 = vmul.u32.u64.high %v2696_v51, %v544_v37, %v2730_v39  ;;  %v2734_v41 = vmul.u32.u64.low %v2696_v51, %v540_v36  ;;  %v2735_v43 = vmul.u32.u64.high %v2696_v51, %v540_v36, %v2734_v41 }
  0xf7   : > { %v1351_v45 = vor.u32 %v1350_v38, %v1349_v34  ;;  %v1353_v48 = vshrl.u32 %v2545_v0, %v1344_v14  ;;  %v1345_v49 = vshrl.u32 %v2542_v56, %v1344_v14  ;;  %v1355_v47 = vshll.u32 %v2545_v0, %v1343_v58 }
  0xf8   : > { %v1356_v55 = vshrl.u32 %v2546_v2, %v1344_v14  ;;  %v1359_v57 = vshrl.u32 %v2547_v9, %v1344_v14  ;;  %v552_v61 = vmul.u32 %v2696_v51, %v536_v35  ;;  %v1358_v1 = vshll.u32 %v2546_v2, %v1343_v58 }
  0xf9   : > { %v1354_v63 = vor.u32 %v1353_v48, %v1352_v46  ;;  %vm1361_vm7 = vcmp.lt.s32.totalorder %v2698_v52, 1  ;;  %vm554_vm8 = vc.u32 %v2731_v40, %v2734_v41  ;;  %v555_v3 = vadd.s32 1, %v2735_v43 }
  0xfa   : > { %v1357_v4 = vor.u32 %v1356_v55, %v1355_v47  ;;  %vm1362_vm9 = vcmp.lt.s32.totalorder %v2698_v52, 2  ;;  %v1360_v5 = vor.u32 %v1359_v57, %v1358_v1  ;;  %vm1363_vm10 = vcmp.lt.s32.totalorder %v2698_v52, 3 }
  0xfb   : > { %vm1364_vm11 = vcmp.lt.s32.totalorder %v2698_v52, 4  ;;  %v1369_v6 = vsel %vm1361_vm7, %v1348_v44, %v1351_v45  ;;  %v556_v51 = vsel %vm554_vm8, %v555_v3, %v2735_v43  ;;  %v1373_v58 = vsel %vm1361_vm7, %v1351_v45, %v1354_v63 }
  0xfc   : > { %v1366_v7 = vsel %vm1364_vm11, %v1354_v63, 2102212464  ;;  %v1370_v8 = vsel %vm1364_vm11, %v1357_v4, 920167782  ;;  %v557_v10 = vadd.s32 %v556_v51, %v552_v61  ;;  %v1365_v11 = vsel %vm1361_vm7, %v1345_v49, %v1348_v44 }
  0xfd   : > { %v1371_v12 = vsel %vm1363_vm10, %v1354_v63, %v1370_v8  ;;  %v1374_v13 = vsel %vm1364_vm11, %v1360_v5, 1326507024  ;;  %v1367_v14 = vsel %vm1363_vm10, %v1351_v45, %v1366_v7  ;;  %v405_v27 = vsel %vm404_vm12, %v2707_v59, 0 }
  0xfe   : > { %v1372_v15 = vsel %vm1362_vm9, %v1369_v6, %v1371_v12  ;;  %v1375_v16 = vsel %vm1363_vm10, %v1357_v4, %v1374_v13  ;;  %v558_v17 = vadd.s32 536870912, %v557_v10  ;;  %v1368_v30 = vsel %vm1362_vm9, %v1365_v11, %v1367_v14 }
  0xff   : > { %v1376_v18 = vsel %vm1362_vm9, %v1373_v58, %v1375_v16  ;;  %v2758_v19 = vmul.u32.u64.low %v2700_v53, %v1372_v15  ;;  %v2759_v21 = vmul.u32.u64.high %v2700_v53, %v1372_v15, %v2758_v19  ;;  %v407_v31 = vand.u32 31, %v405_v27 }
 0x100   : > { %v2763_v22 = vmul.u32.u64.low %v2700_v53, %v1376_v18  ;;  %v2764_v25 = vmul.u32.u64.high %v2700_v53, %v1376_v18, %v2763_v22  ;;  %v559_v29 = vshrl.u32 %v558_v17, 30  ;;  %v1228_v33 = vand.u32 2139095040, %v2694_v50 }
 0x101   : > { %v1387_v35 = vadd.s32 1, %v2759_v21  ;;  %v401_v36 = vor.u32 8388608, %v2704_v54  ;;  %v1384_v37 = vmul.u32 %v2700_v53, %v1368_v30  ;;  %v408_v38 = vsub.s32 32, %v407_v31 }
 0x102   : > { %v560_v34 = vshll.u32 %v559_v29, 30  ;;  %vm1386_vm13 = vc.u32 %v2764_v25, %v2758_v19  ;;  %v1229_v52 = vshrl.u32 %v1228_v33, 23  ;;  %v553_v44 = vadd.s32 %v2734_v41, %v2731_v40 }
 0x103   : > { %v1388_v59 = vsel %vm1386_vm13, %v1387_v35, %v2759_v21  ;;  %v2781_v46 = vshll.u32 %v401_v36, 8  ;;  %v1225_v53 = vand.u32 2147483647, %v2694_v50  ;;  %v2784_v48 = vshrl.u32 %v405_v27, 5 }
 0x104   : > { %v2775_v39 = vsub.s32 %v557_v10, %v560_v34  ;;  %v1389_v43 = vadd.s32 %v1388_v59, %v1384_v37  ;;  %v411_v49 = vshrl.u32 %v2543_v60, %v408_v38  ;;  %v414_v47 = vshrl.u32 %v2544_v62, %v408_v38 }
 0x105   : > { %v417_v57 = vshrl.u32 %v2545_v0, %v408_v38  ;;  %v420_v61 = vshrl.u32 %v2546_v2, %v408_v38  ;;  %v2791_v40 = vadd.s32 4294967169, %v1229_v52  ;;  %v583_v41 = vsub.s32 4, %v559_v29 }
 0x106   : > { %v563_v45 = vsub.s32 0, %v2775_v39  ;;  %v1390_v54 = vadd.s32 536870912, %v1389_v43  ;;  %v410_v1 = vshll.u32 %v2542_v56, %v407_v31  ;;  %v413_v3 = vshll.u32 %v2543_v60, %v407_v31 }
 0x107   : > { %v416_v6 = vshll.u32 %v2544_v62, %v407_v31  ;;  %v419_v51 = vshll.u32 %v2545_v0, %v407_v31  ;;  %v423_v7 = vshrl.u32 %v2547_v9, %v408_v38  ;;  %v2809_v11 = vand.u32 8388607, %v1225_v53 }
 0x108   : > { %v2178_v55 = vmin.u32 %v563_v45, %v2775_v39  ;;  %v2793_v63 = vshrl.u32 %v1390_v54, 30  ;;  %v412_v58 = vor.u32 %v411_v49, %v410_v1  ;;  %v415_v10 = vor.u32 %v414_v47, %v413_v3 }
 0x109   : > { %v418_v26 = vor.u32 %v417_v57, %v416_v6  ;;  %v421_v13 = vor.u32 %v420_v61, %v419_v51  ;;  %v422_v14 = vshll.u32 %v2546_v2, %v407_v31  ;;  %v584_v15 = vsel %vm499_vm14, %v583_v41, %v559_v29 }
 0x10a   : > { %v565_v5 = vclz %v2178_v55  ;;  %v1392_v8 = vshll.u32 %v2793_v63, 30  ;;  %v409_v17 = vshrl.u32 %v2542_v56, %v408_v38  ;;  %vm425_vm0 = vcmp.lt.s32.totalorder %v2784_v48, 1 }
 0x10b   : > { %v424_v18 = vor.u32 %v423_v7, %v422_v14  ;;  %vm426_vm2 = vcmp.lt.s32.totalorder %v2784_v48, 2  ;;  %vm427_vm3 = vcmp.lt.s32.totalorder %v2784_v48, 3  ;;  %vm1331_vm4 = vcmp.lt.s32.totalorder %v2678_v24, 0 }
 0x10c   : > { %v2179_v12 = vadd.s32 4294967294, %v565_v5  ;;  %v2814_v16 = vsub.s32 %v1389_v43, %v1392_v8  ;;  %vm428_vm5 = vcmp.lt.s32.totalorder %v2784_v48, 4  ;;  %v433_v27 = vsel %vm425_vm0, %v412_v58, %v415_v10 }
 0x10d   : > { %v430_v31 = vsel %vm428_vm5, %v418_v26, 2102212464  ;;  %v434_v33 = vsel %vm428_vm5, %v421_v13, 920167782  ;;  %v437_v37 = vsel %vm425_vm0, %v415_v10, %v418_v26  ;;  %v438_v43 = vsel %vm428_vm5, %v424_v18, 1326507024 }
 0x10e   : > { %vm2180_vm1 = vcmp.lt.s32.totalorder %v2179_v12, 0  ;;  %v1395_v22 = vsub.s32 0, %v2814_v16  ;;  %v435_v36 = vsel %vm427_vm3, %v418_v26, %v434_v33  ;;  %v586_v45 = vsel %vm2799_vm15, 0, %v584_v15 }
 0x10f   : > { %v568_v21 = vsel %vm2180_vm1, 0, %v2179_v12  ;;  %v436_v52 = vsel %vm426_vm2, %v433_v27, %v435_v36  ;;  %vm2837_vm6 = vcmp.le.f32.partialorder %v1329_v28, 0.7853982  ;;  %v429_v49 = vsel %vm425_vm0, %v409_v17, %v412_v58 }
 0x110   : > { %v569_v29 = vsub.s32 32, %v568_v21  ;;  %v573_v30 = vsub.s32 4294967266, %v568_v21  ;;  %v570_v34 = vshll.u32 %v2775_v39, %v568_v21  ;;  %v2210_v35 = vmin.u32 %v1395_v22, %v2814_v16 }
 0x111   : > { %v1415_v57 = vsub.s32 4, %v2793_v63  ;;  %v439_v61 = vsel %vm427_vm3, %v421_v13, %v438_v43  ;;  %v2851_v1 = vmul.u32.u64.low %v2781_v46, %v436_v52  ;;  %v2852_v3 = vmul.u32.u64.high %v2781_v46, %v436_v52, %v2851_v1 }
 0x112   : > { %v571_v38 = vshrl.u32 %v553_v44, %v569_v29  ;;  %v574_v59 = vadd.s32 127, %v573_v30  ;;  %v1397_v54 = vclz %v2210_v35  ;;  %v431_v44 = vsel %vm427_vm3, %v415_v10, %v430_v31  ;;  %v2276_v29 = vpop.f32.mrf.mxu0 }
 0x113   : > { %v440_v28 = vsel %vm426_vm2, %v437_v37, %v439_v61  ;;  %v432_v6 = vsel %vm426_vm2, %v429_v49, %v431_v44  ;;  %v590_v8 = vadd.s32 3, %v586_v45  ;;  %v1385_v58 = vadd.s32 %v2758_v19, %v2764_v25 }
 0x114   : > { %v572_v47 = vor.u32 %v571_v38, %v570_v34  ;;  %v575_v55 = vshll.u32 %v574_v59, 23  ;;  %v2211_v41 = vadd.s32 4294967294, %v1397_v54  ;;  %v1235_v10 = vadd.s32 1, %v2791_v40 }
 0x115   : > { %v2858_v51 = vmul.u32.u64.low %v2781_v46, %v440_v28  ;;  %v2859_v7 = vmul.u32.u64.high %v2781_v46, %v440_v28, %v2858_v51  ;;  %v1416_v14 = vsel %vm1331_vm4, %v1415_v57, %v2793_v63  ;;  %v448_v17 = vmul.u32 %v2781_v46, %v432_v6 }
 0x116   : > { %v576_v5 = vor.u32 4788187, %v575_v55  ;;  %vm2212_vm7 = vcmp.lt.s32.totalorder %v2211_v41, 0  ;;  %v579_v26 = vcvt.s32.f32 %v572_v47  ;;  %v451_v18 = vadd.s32 1, %v2852_v3 }
 0x117   : > { %v1400_v13 = vsel %vm2212_vm7, 0, %v2211_v41  ;;  %vm450_vm8 = vc.u32 %v2859_v7, %v2851_v1  ;;  %vm1236_vm9 = vcmp.gt.s32.totalorder %v1235_v10, 0  ;;  %v1418_v30 = vsel %vm2837_vm6, 0, %v1416_v14 }
 0x118   : > { %v577_v12 = vand.u32 2147483647, %v576_v5  ;;  %v1401_v48 = vsub.s32 32, %v1400_v13  ;;  %v1405_v15 = vsub.s32 4294967266, %v1400_v13  ;;  %v1402_v22 = vshll.u32 %v2814_v16, %v1400_v13 }
 0x119   : > { %v452_v40 = vsel %vm450_vm8, %v451_v18, %v2852_v3  ;;  %v1237_v27 = vsel %vm1236_vm9, %v1235_v10, 0  ;;  %v2878_v37 = vadd.f32 %v2276_v29, %v2672_v20  ;;  %v2883_v59 = vand.u32 3, %v590_v8 }
 0x11a   : > { %v580_v21 = vmul.f32 %v579_v26, %v577_v12  ;;  %v1403_v19 = vshrl.u32 %v1385_v58, %v1401_v48  ;;  %v1406_v25 = vadd.s32 127, %v1405_v15  ;;  %v453_v46 = vadd.s32 %v452_v40, %v448_v17 }
 0x11b   : > { %v1239_v31 = vand.u32 31, %v1237_v27  ;;  %v2885_v43 = vadd.s32 3, %v1418_v30  ;;  %v1233_v54 = vor.u32 8388608, %v2809_v11  ;;  %vm395_vm10 = vcmp.lt.s32.totalorder %v2687_v32, 0 }
 0x11c   : > { %v581_v63 = vxor.u32 2147483648, %v580_v21  ;;  %v1404_v33 = vor.u32 %v1403_v19, %v1402_v22  ;;  %v1407_v34 = vshll.u32 %v1406_v25, 23  ;;  %v454_v35 = vadd.s32 536870912, %v453_v46 }
 0x11d   : > { %v1240_v36 = vsub.s32 32, %v1239_v31  ;;  %v2891_v57 = vshrl.u32 %v1237_v27, 5  ;;  %v1242_v61 = vshll.u32 %v2542_v56, %v1239_v31  ;;  %v1245_v3 = vshll.u32 %v2543_v60, %v1239_v31 }
 0x11e   : > { %v582_v16 = vsel %vm499_vm14, %v581_v63, %v580_v21  ;;  %v1408_v52 = vor.u32 4788187, %v1407_v34  ;;  %v455_v45 = vshrl.u32 %v454_v35, 30  ;;  %v1411_v47 = vcvt.s32.f32 %v1404_v33 }
 0x11f   : > { %v585_v38 = vsel %vm2799_vm15, %v2675_v23, %v582_v16  ;;  %v1243_v49 = vshrl.u32 %v2543_v60, %v1240_v36  ;;  %v1246_v55 = vshrl.u32 %v2544_v62, %v1240_v36  ;;  %v1249_v41 = vshrl.u32 %v2545_v0, %v1240_v36 }
 0x120   : > { %2414 = vcosq.f32 %v585_v38  ;;  %v1409_v44 = vand.u32 2147483647, %v1408_v52  ;;  %v456_v4 = vshll.u32 %v455_v45, 30  ;;  %v1251_v11 = vshll.u32 %v2545_v0, %v1239_v31 }
 0x121   : > { %2416 = vsinq.f32 %v585_v38  ;;  %v1252_v5 = vshrl.u32 %v2546_v2, %v1240_v36  ;;  %v1244_v51 = vor.u32 %v1243_v49, %v1242_v61  ;;  %v1248_v8 = vshll.u32 %v2544_v62, %v1239_v31 }
 0x122   : > { %v1412_v28 = vmul.f32 %v1411_v47, %v1409_v44  ;;  %v2898_v6 = vsub.s32 %v453_v46, %v456_v4  ;;  %v708_v58 = vand.u32 2139095040, %v2878_v37  ;;  %v1247_v12 = vor.u32 %v1246_v55, %v1245_v3 }
 0x123   : > { %v1253_v26 = vor.u32 %v1252_v5, %v1251_v11  ;;  %v1255_v13 = vshrl.u32 %v2547_v9, %v1240_v36  ;;  %v449_v14 = vadd.s32 %v2851_v1, %v2859_v7  ;;  %v1250_v15 = vor.u32 %v1249_v41, %v1248_v8 }
 0x124   : > { %v1413_v10 = vxor.u32 2147483648, %v1412_v28  ;;  %v459_v48 = vsub.s32 0, %v2898_v6  ;;  %v1254_v17 = vshll.u32 %v2546_v2, %v1239_v31  ;;  %vm596_vm11 = vcmp.eq.s32.totalorder %v2883_v59, 2 }
 0x125   : > { %v479_v21 = vsub.s32 4, %v455_v45  ;;  %vm1257_vm12 = vcmp.lt.s32.totalorder %v2891_v57, 1  ;;  %v2911_v22 = vshll.u32 %v1233_v54, 8  ;;  %vm593_vm13 = vcmp.eq.s32.totalorder %v2883_v59, 0 }
 0x126   : > { %v1414_v18 = vsel %vm1331_vm4, %v1413_v10, %v1412_v28  ;;  %v2174_v7 = vmin.u32 %v459_v48, %v2898_v6  ;;  %v1256_v19 = vor.u32 %v1255_v13, %v1254_v17  ;;  %vm1260_vm14 = vcmp.lt.s32.totalorder %v2891_v57, 4 }
 0x127   : > { %v1417_v1 = vsel %vm2837_vm6, %v2678_v24, %v1414_v18  ;;  %vm592_vm15 = vcmp.lt.s32.totalorder %v2883_v59, 2  ;;  %v1241_v25 = vshrl.u32 %v2542_v56, %v1240_v36  ;;  %v1265_v40 = vsel %vm1257_vm12, %v1244_v51, %v1247_v12 }
 0x128   : > { %2418 = vcosq.f32 %v1417_v1  ;;  %v1266_v27 = vsel %vm1260_vm14, %v1253_v26, 920167782  ;;  %vm589_vm0 = vweird.f32 %v2675_v23  ;;  %vm2928_vm1 = vcmp.le.f32.partialorder %v393_v42, 0.7853982 }
 0x129   : > { %2420 = vsinq.f32 %v1417_v1  ;;  %v461_v29 = vclz %v2174_v7  ;;  %vm1259_vm2 = vcmp.lt.s32.totalorder %v2891_v57, 3  ;;  %v1262_v63 = vsel %vm1260_vm14, %v1250_v15, 2102212464 }
 0x12a   : > { %v480_v30 = vsel %vm395_vm10, %v479_v21, %v455_v45  ;;  %vm1258_vm3 = vcmp.lt.s32.totalorder %v2891_v57, 2  ;;  %v1267_v46 = vsel %vm1259_vm2, %v1250_v15, %v1266_v27  ;;  %v1269_v42 = vsel %vm1257_vm12, %v1247_v12, %v1250_v15 }
 0x12b   : > { %v2175_v31 = vadd.s32 4294967294, %v461_v29  ;;  %v1261_v33 = vsel %vm1257_vm12, %v1241_v25, %v1244_v51  ;;  %v1268_v34 = vsel %vm1258_vm3, %v1265_v40, %v1267_v46  ;;  %v1270_v16 = vsel %vm1260_vm14, %v1256_v19, 1326507024 }
 0x12c   : > { %v1263_v36 = vsel %vm1259_vm2, %v1247_v12, %v1262_v63  ;;  %v1271_v38 = vsel %vm1259_vm2, %v1253_v26, %v1270_v16  ;;  %v2948_v52 = vmul.u32.u64.low %v2911_v22, %v1268_v34  ;;  %v2949_v45 = vmul.u32.u64.high %v2911_v22, %v1268_v34, %v2948_v52 }
 0x12d   : > { %v2415_v35 = vpop.eup %2414  ;;  %vm2176_vm4 = vcmp.lt.s32.totalorder %v2175_v31, 0  ;;  %v1272_v44 = vsel %vm1258_vm3, %v1269_v42, %v1271_v38  ;;  %v709_v47 = vshrl.u32 %v708_v58, 23  ;;  %v1264_v5 = vsel %vm1258_vm3, %v1261_v33, %v1263_v36 }
 0x12e   : > { %v2417_v54 = vpop.eup %2416  ;;  %v597_v49 = vxor.u32 2147483648, %v2415_v35  ;;  %v464_v4 = vsel %vm2176_vm4, 0, %v2175_v31  ;;  %v2957_v61 = vmul.u32.u64.low %v2911_v22, %v1272_v44  ;;  %v2958_v41 = vmul.u32.u64.high %v2911_v22, %v1272_v44, %v2957_v61 }
 0x12f   : > { %v594_v55 = vxor.u32 2147483648, %v2417_v54  ;;  %v465_v3 = vsub.s32 32, %v464_v4  ;;  %v469_v11 = vsub.s32 4294967266, %v464_v4  ;;  %v1423_v8 = vand.u32 3, %v2885_v43  ;;  %v2288_v43 = vpop.f32.mrf.mxu1 }
 0x130   : > { %v598_v28 = vsel %vm596_vm11, %v597_v49, %v2417_v54  ;;  %v1283_v58 = vadd.s32 1, %v2949_v45  ;;  %v2185_v10 = vadd.s32 4294967169, %v709_v47  ;;  %v466_v26 = vshll.u32 %v2898_v6, %v464_v4 }
 0x131   : > { %v595_v51 = vsel %vm593_vm13, %v2415_v35, %v594_v55  ;;  %v467_v13 = vshrl.u32 %v449_v14, %v465_v3  ;;  %v470_v48 = vadd.s32 127, %v469_v11  ;;  %v482_v57 = vsel %vm2928_vm1, 0, %v480_v30 }
 0x132   : > { %v599_v12 = vsel %vm592_vm15, %v595_v51, %v598_v28  ;;  %v1280_v17 = vmul.u32 %v2911_v22, %v1264_v5  ;;  %vm1282_vm5 = vc.u32 %v2958_v41, %v2948_v52  ;;  %v715_v18 = vadd.s32 1, %v2185_v10 }
 0x133   : > { %v600_v15 = vsel %vm589_vm0, nan, %v599_v12  ;;  %v468_v59 = vor.u32 %v467_v13, %v466_v26  ;;  %v471_v6 = vshll.u32 %v470_v48, 23  ;;  %v1284_v14 = vsel %vm1282_vm5, %v1283_v58, %v2949_v45 }
 0x134   : > { %2058 = vst [vmem:[%s2978_s20 + $0x8] sm:$0xff] %v600_v15  ;;  %v1285_v23 = vadd.s32 %v1284_v14, %v1280_v17  ;;  %v705_v21 = vand.u32 2147483647, %v2878_v37  ;;  %vm1428_vm6 = vcmp.eq.s32.totalorder %v1423_v8, 2  ;;  %vm716_vm7 = vcmp.gt.s32.totalorder %v715_v18, 0 }
 0x135   : > { %v2419_v1 = vpop.eup %2418  ;;  %v472_v7 = vor.u32 4788187, %v471_v6  ;;  %v2984_v22 = vadd.f32 %v2288_v43, %v2672_v20  ;;  %v486_v40 = vadd.s32 3, %v482_v57  ;;  %v717_v29 = vsel %vm716_vm7, %v715_v18, 0 }
 0x136   : > { %v2421_v19 = vpop.eup %2420  ;;  %v1429_v25 = vxor.u32 2147483648, %v2419_v1  ;;  %v1286_v27 = vadd.s32 536870912, %v1285_v23  ;;  %v475_v46 = vcvt.s32.f32 %v468_v59  ;;  %v719_v42 = vand.u32 31, %v717_v29 }
 0x137   : > { %v1426_v63 = vxor.u32 2147483648, %v2421_v19  ;;  %v473_v30 = vand.u32 2147483647, %v472_v7  ;;  %vm1425_vm8 = vcmp.eq.s32.totalorder %v1423_v8, 0  ;;  %v712_v34 = vand.u32 8388607, %v705_v21 }
 0x138   : > { %v1430_v31 = vsel %vm1428_vm6, %v1429_v25, %v2421_v19  ;;  %v2986_v33 = vshrl.u32 %v1286_v27, 30  ;;  %vm1424_vm9 = vcmp.lt.s32.totalorder %v1423_v8, 2  ;;  %v720_v36 = vsub.s32 32, %v719_v42 }
 0x139   : > { %v1427_v16 = vsel %vm1425_vm8, %v2419_v1, %v1426_v63  ;;  %v476_v35 = vmul.f32 %v475_v46, %v473_v30  ;;  %vm1421_vm11 = vweird.f32 %v2678_v24  ;;  %v2992_v44 = vand.u32 3, %v486_v40 }
 0x13a   : > { %v1431_v38 = vsel %vm1424_vm9, %v1427_v16, %v1430_v31  ;;  %v1288_v45 = vshll.u32 %v2986_v33, 30  ;;  %v723_v47 = vshrl.u32 %v2543_v60, %v720_v36  ;;  %v713_v4 = vor.u32 8388608, %v712_v34 }
 0x13b   : > { %v1432_v54 = vsel %vm1421_vm11, nan, %v1431_v38  ;;  %v477_v49 = vxor.u32 2147483648, %v476_v35  ;;  %v726_v61 = vshrl.u32 %v2544_v62, %v720_v36  ;;  %v1540_v28 = vand.u32 2139095040, %v2984_v22 }
 0x13c   : > { %2066 = vst [vmem:[%s2978_s20 + $0x48] sm:$0xff] %v1432_v54  ;;  %v2996_v55 = vsub.s32 %v1285_v23, %v1288_v45  ;;  %v718_v3 = vshrl.u32 %v717_v29, 5  ;;  %v722_v11 = vshll.u32 %v2542_v56, %v719_v42  ;;  %v729_v5 = vshrl.u32 %v2545_v0, %v720_v36 }
 0x13d   : > { %v478_v24 = vsel %vm395_vm10, %v477_v49, %v476_v35  ;;  %v725_v58 = vshll.u32 %v2543_v60, %v719_v42  ;;  %v728_v10 = vshll.u32 %v2544_v62, %v719_v42  ;;  %v731_v26 = vshll.u32 %v2545_v0, %v719_v42 }
 0x13e   : > { %v481_v51 = vsel %vm2928_vm1, %v2687_v32, %v478_v24  ;;  %v1291_v8 = vsub.s32 0, %v2996_v55  ;;  %v724_v12 = vor.u32 %v723_v47, %v722_v11  ;;  %v732_v13 = vshrl.u32 %v2546_v2, %v720_v36 }
 0x13f   : > { %2422 = vcosq.f32 %v481_v51  ;;  %v727_v15 = vor.u32 %v726_v61, %v725_v58  ;;  %v730_v57 = vor.u32 %v729_v5, %v728_v10  ;;  %v734_v39 = vshll.u32 %v2546_v2, %v719_v42 }
 0x140   : > { %2424 = vsinq.f32 %v481_v51  ;;  %v2206_v48 = vmin.u32 %v1291_v8, %v2996_v55  ;;  %v733_v17 = vor.u32 %v732_v13, %v731_v26  ;;  %v735_v43 = vshrl.u32 %v2547_v9, %v720_v36 }
 0x141   : > { %v753_v59 = vshll.u32 %v713_v4, 8  ;;  %v721_v14 = vshrl.u32 %v2542_v56, %v720_v36  ;;  %vm737_vm10 = vcmp.lt.s32.totalorder %v718_v3, 1  ;;  %v1541_v18 = vshrl.u32 %v1540_v28, 23 }
 0x142   : > { %v1293_v6 = vclz %v2206_v48  ;;  %vm1227_vm12 = vcmp.lt.s32.totalorder %v2694_v50, 0  ;;  %v736_v23 = vor.u32 %v735_v43, %v734_v39  ;;  %vm738_vm13 = vcmp.lt.s32.totalorder %v718_v3, 2 }
 0x143   : > { %vm739_vm14 = vcmp.lt.s32.totalorder %v718_v3, 3  ;;  %vm740_vm15 = vcmp.lt.s32.totalorder %v718_v3, 4  ;;  %v745_v19 = vsel %vm737_vm10, %v724_v12, %v727_v15  ;;  %v741_v40 = vsel %vm737_vm10, %v721_v14, %v724_v12 }
 0x144   : > { %v2207_v1 = vadd.s32 4294967294, %v1293_v6  ;;  %v742_v7 = vsel %vm740_vm15, %v730_v57, 2102212464  ;;  %v746_v25 = vsel %vm740_vm15, %v733_v17, 920167782  ;;  %v749_v29 = vsel %vm737_vm10, %v727_v15, %v730_v57 }
 0x145   : > { %v747_v27 = vsel %vm739_vm14, %v730_v57, %v746_v25  ;;  %v750_v63 = vsel %vm740_vm15, %v736_v23, 1326507024  ;;  %vm3019_vm0 = vcmp.le.f32.partialorder %v1225_v53, 0.7853982  ;;  %v743_v46 = vsel %vm739_vm14, %v727_v15, %v742_v7 }
 0x146   : > { %vm2208_vm1 = vcmp.lt.s32.totalorder %v2207_v1, 0  ;;  %v748_v42 = vsel %vm738_vm13, %v745_v19, %v747_v27  ;;  %v751_v31 = vsel %vm739_vm14, %v733_v17, %v750_v63  ;;  %v1281_v38 = vadd.s32 %v2948_v52, %v2958_v41 }
 0x147   : > { %v1296_v34 = vsel %vm2208_vm1, 0, %v2207_v1  ;;  %v752_v16 = vsel %vm738_vm13, %v749_v29, %v751_v31  ;;  %v3025_v35 = vmul.u32.u64.low %v753_v59, %v748_v42  ;;  %v3026_v36 = vmul.u32.u64.high %v753_v59, %v748_v42, %v3025_v35 }
 0x148   : > { %v1297_v45 = vsub.s32 32, %v1296_v34  ;;  %v1301_v53 = vsub.s32 4294967266, %v1296_v34  ;;  %v1311_v54 = vsub.s32 4, %v2986_v33  ;;  %v1537_v4 = vand.u32 2147483647, %v2984_v22 }
 0x149   : > { %v3032_v49 = vmul.u32.u64.low %v753_v59, %v752_v16  ;;  %v3033_v47 = vmul.u32.u64.high %v753_v59, %v752_v16, %v3032_v49  ;;  %v2217_v61 = vadd.s32 4294967169, %v1541_v18  ;;  %v1298_v28 = vshll.u32 %v2996_v55, %v1296_v34  ;;  %v324_v18 = vpop.f32.mrf.mxu0 }
 0x14a   : > { %v1299_v24 = vshrl.u32 %v1281_v38, %v1297_v45  ;;  %v1302_v11 = vadd.s32 127, %v1301_v53  ;;  %v744_v5 = vsel %vm738_vm13, %v741_v40, %v743_v46  ;;  %vm488_vm2 = vcmp.lt.s32.totalorder %v2992_v44, 2 }
 0x14b   : > { %vm489_vm3 = vcmp.eq.s32.totalorder %v2992_v44, 0  ;;  %v763_v52 = vadd.s32 1, %v3026_v36  ;;  %v1547_v41 = vadd.s32 1, %v2217_v61  ;;  %vm492_vm4 = vcmp.eq.s32.totalorder %v2992_v44, 2 }
 0x14c   : > { %v2423_v51 = vpop.eup %2422  ;;  %v1300_v8 = vor.u32 %v1299_v24, %v1298_v28  ;;  %v1303_v58 = vshll.u32 %v1302_v11, 23  ;;  %v1312_v55 = vsel %vm1227_vm12, %v1311_v54, %v2986_v33  ;;  %v760_v3 = vmul.u32 %v753_v59, %v744_v5 }
 0x14d   : > { %v2425_v10 = vpop.eup %2424  ;;  %v493_v12 = vxor.u32 2147483648, %v2423_v51  ;;  %vm762_vm5 = vc.u32 %v3033_v47, %v3025_v35  ;;  %vm1548_vm6 = vcmp.gt.s32.totalorder %v1547_v41, 0  ;;  %v1544_v15 = vand.u32 8388607, %v1537_v4 }
 0x14e   : > { %v490_v26 = vxor.u32 2147483648, %v2425_v10  ;;  %v1304_v13 = vor.u32 4788187, %v1303_v58  ;;  %v764_v48 = vsel %vm762_vm5, %v763_v52, %v3026_v36  ;;  %v1314_v17 = vsel %vm3019_vm0, 0, %v1312_v55 }
 0x14f   : > { %v494_v57 = vsel %vm492_vm4, %v493_v12, %v2425_v10  ;;  %v765_v33 = vadd.s32 %v764_v48, %v760_v3  ;;  %v1549_v39 = vsel %vm1548_vm6, %v1547_v41, 0  ;;  %v1307_v6 = vcvt.s32.f32 %v1300_v8 }
 0x150   : > { %v491_v43 = vsel %vm489_vm3, %v2423_v51, %v490_v26  ;;  %v1305_v59 = vand.u32 2147483647, %v1304_v13  ;;  %v1551_v14 = vand.u32 31, %v1549_v39  ;;  %vm485_vm7 = vweird.f32 %v2687_v32 }
 0x151   : > { %v495_v23 = vsel %vm488_vm2, %v491_v43, %v494_v57  ;;  %v766_v1 = vadd.s32 536870912, %v765_v33  ;;  %v1318_v25 = vadd.s32 3, %v1314_v17  ;;  %v1545_v29 = vor.u32 8388608, %v1544_v15 }
 0x152   : > { %v496_v7 = vsel %vm485_vm7, nan, %v495_v23  ;;  %v1308_v19 = vmul.f32 %v1307_v6, %v1305_v59  ;;  %v1552_v40 = vsub.s32 32, %v1551_v14  ;;  %v1554_v63 = vshll.u32 %v2542_v56, %v1551_v14 }
 0x153   : > { %2057 = vst [vmem:[%s2978_s20] sm:$0xff] %v496_v7  ;;  %v3058_v27 = vshrl.u32 %v766_v1, 30  ;;  %v3062_v46 = vadd.f32 %v2672_v20, %v324_v18  ;;  %v1557_v44 = vshll.u32 %v2543_v60, %v1551_v14  ;;  %v1560_v16 = vshll.u32 %v2544_v62, %v1551_v14 }
 0x154   : > { %v1309_v42 = vxor.u32 2147483648, %v1308_v19  ;;  %v1555_v32 = vshrl.u32 %v2543_v60, %v1552_v40  ;;  %v1558_v31 = vshrl.u32 %v2544_v62, %v1552_v40  ;;  %v1561_v36 = vshrl.u32 %v2545_v0, %v1552_v40 }
 0x155   : > { %v768_v34 = vshll.u32 %v3058_v27, 30  ;;  %v1564_v38 = vshrl.u32 %v2546_v2, %v1552_v40  ;;  %v1550_v20 = vshrl.u32 %v1549_v39, 5  ;;  %v1563_v54 = vshll.u32 %v2545_v0, %v1551_v14 }
 0x156   : > { %v1310_v45 = vsel %vm1227_vm12, %v1309_v42, %v1308_v19  ;;  %v1556_v53 = vor.u32 %v1555_v32, %v1554_v63  ;;  %v1559_v28 = vor.u32 %v1558_v31, %v1557_v44  ;;  %v1562_v24 = vor.u32 %v1561_v36, %v1560_v16 }
 0x157   : > { %v1313_v49 = vsel %vm3019_vm0, %v2694_v50, %v1310_v45  ;;  %v3077_v61 = vsub.s32 %v765_v33, %v768_v34  ;;  %v1565_v11 = vor.u32 %v1564_v38, %v1563_v54  ;;  %v1566_v5 = vshll.u32 %v2546_v2, %v1551_v14 }
 0x158   : > { %2426 = vcosq.f32 %v1313_v49  ;;  %v1567_v52 = vshrl.u32 %v2547_v9, %v1552_v40  ;;  %v3081_v41 = vand.u32 3, %v1318_v25  ;;  %vm707_vm8 = vcmp.lt.s32.totalorder %v2878_v37, 0 }
 0x159   : > { %2428 = vsinq.f32 %v1313_v49  ;;  %v771_v51 = vsub.s32 0, %v3077_v61  ;;  %vm1572_vm9 = vcmp.lt.s32.totalorder %v1550_v20, 4  ;;  %v1585_v30 = vshll.u32 %v1545_v29, 8 }
 0x15a   : > { %v1568_v8 = vor.u32 %v1567_v52, %v1566_v5  ;;  %v604_v58 = vand.u32 2139095040, %v3062_v46  ;;  %v1553_v10 = vshrl.u32 %v2542_v56, %v1552_v40  ;;  %vm1569_vm11 = vcmp.lt.s32.totalorder %v1550_v20, 1 }
 0x15b   : > { %v2186_v55 = vmin.u32 %v771_v51, %v3077_v61  ;;  %v1574_v12 = vsel %vm1572_vm9, %v1562_v24, 2102212464  ;;  %vm1570_vm10 = vcmp.lt.s32.totalorder %v1550_v20, 2  ;;  %v1577_v3 = vsel %vm1569_vm11, %v1556_v53, %v1559_v28 }
 0x15c   : > { %v1578_v26 = vsel %vm1572_vm9, %v1565_v11, 920167782  ;;  %v601_v13 = vand.u32 2147483647, %v3062_v46  ;;  %vm1571_vm12 = vcmp.lt.s32.totalorder %v1550_v20, 3  ;;  %v1573_v15 = vsel %vm1569_vm11, %v1553_v10, %v1556_v53 }
 0x15d   : > { %v773_v48 = vclz %v2186_v55  ;;  %v1581_v57 = vsel %vm1569_vm11, %v1559_v28, %v1562_v24  ;;  %v1575_v17 = vsel %vm1571_vm12, %v1559_v28, %v1574_v12  ;;  %v1579_v33 = vsel %vm1571_vm12, %v1562_v24, %v1578_v26 }
 0x15e   : > { %v1582_v39 = vsel %vm1572_vm9, %v1568_v8, 1326507024  ;;  %v605_v43 = vshrl.u32 %v604_v58, 23  ;;  %v791_v6 = vsub.s32 4, %v3058_v27  ;;  %v1580_v14 = vsel %vm1570_vm10, %v1577_v3, %v1579_v33 }
 0x15f   : > { %v2187_v59 = vadd.s32 4294967294, %v773_v48  ;;  %v1583_v18 = vsel %vm1571_vm12, %v1565_v11, %v1582_v39  ;;  %v3095_v1 = vmul.u32.u64.low %v1585_v30, %v1580_v14  ;;  %v3096_v7 = vmul.u32.u64.high %v1585_v30, %v1580_v14, %v3095_v1 }
 0x160   : > { %v1584_v23 = vsel %vm1570_vm10, %v1581_v57, %v1583_v18  ;;  %v2181_v19 = vadd.s32 4294967169, %v605_v43  ;;  %v1576_v25 = vsel %vm1570_vm10, %v1573_v15, %v1575_v17  ;;  %vm1317_vm14 = vweird.f32 %v2694_v50 }
 0x161   : > { %vm2188_vm13 = vcmp.lt.s32.totalorder %v2187_v59, 0  ;;  %v3100_v40 = vmul.u32.u64.low %v1585_v30, %v1584_v23  ;;  %v3101_v29 = vmul.u32.u64.high %v1585_v30, %v1584_v23, %v3100_v40  ;;  %vm1324_vm15 = vcmp.eq.s32.totalorder %v3081_v41, 2 }
 0x162   : > { %vm3107_vm0 = vcmp.le.f32.partialorder %v705_v21, 0.7853982  ;;  %v776_v42 = vsel %vm2188_vm13, 0, %v2187_v59  ;;  %v611_v32 = vadd.s32 1, %v2181_v19  ;;  %v761_v44 = vadd.s32 %v3025_v35, %v3033_v47  ;;  %v364_v35 = vpop.f32.mrf.mxu1 }
 0x163   : > { %v777_v31 = vsub.s32 32, %v776_v42  ;;  %v781_v34 = vsub.s32 4294967266, %v776_v42  ;;  %v792_v16 = vsel %vm707_vm8, %v791_v6, %v3058_v27  ;;  %v1592_v36 = vmul.u32 %v1585_v30, %v1576_v25  ;;  %v3131_v30 = vld [vmem:[%s3866_s2] ss:$0 sm:$0xff] }
 0x164   : > { %v1595_v38 = vadd.s32 1, %v3096_v7  ;;  %v608_v21 = vand.u32 8388607, %v601_v13  ;;  %vm612_vm1 = vcmp.gt.s32.totalorder %v611_v32, 0  ;;  %v778_v20 = vshll.u32 %v3077_v61, %v776_v42 }
 0x165   : > { %v2427_v45 = vpop.eup %2426  ;;  %v779_v53 = vshrl.u32 %v761_v44, %v777_v31  ;;  %v782_v54 = vadd.s32 127, %v781_v34  ;;  %vm1594_vm2 = vc.u32 %v3101_v29, %v3095_v1  ;;  %v794_v27 = vsel %vm3107_vm0, 0, %v792_v16 }
 0x166   : > { %v2429_v47 = vpop.eup %2428  ;;  %v1325_v49 = vxor.u32 2147483648, %v2427_v45  ;;  %v1596_v28 = vsel %vm1594_vm2, %v1595_v38, %v3096_v7  ;;  %v613_v24 = vsel %vm612_vm1, %v611_v32, 0  ;;  %vm1321_vm3 = vcmp.eq.s32.totalorder %v3081_v41, 0 }
 0x167   : > { %v1322_v11 = vxor.u32 2147483648, %v2429_v47  ;;  %v780_v5 = vor.u32 %v779_v53, %v778_v20  ;;  %v783_v52 = vshll.u32 %v782_v54, 23  ;;  %v1597_v51 = vadd.s32 %v1596_v28, %v1592_v36 }
 0x168   : > { %v1326_v61 = vsel %vm1324_vm15, %v1325_v49, %v2429_v47  ;;  %v615_v8 = vand.u32 31, %v613_v24  ;;  %v3134_v58 = vadd.f32 %v3131_v30, %v364_v35  ;;  %vm1320_vm4 = vcmp.lt.s32.totalorder %v3081_v41, 2 }
 0x169   : > { %v1323_v55 = vsel %vm1321_vm3, %v2427_v45, %v1322_v11  ;;  %v784_v10 = vor.u32 4788187, %v783_v52  ;;  %v1598_v12 = vadd.s32 536870912, %v1597_v51  ;;  %v3137_v26 = vadd.s32 3, %v794_v27 }
 0x16a   : > { %v1327_v3 = vsel %vm1320_vm4, %v1323_v55, %v1326_v61  ;;  %v609_v48 = vor.u32 8388608, %v608_v21  ;;  %v616_v15 = vsub.s32 32, %v615_v8  ;;  %v787_v33 = vcvt.s32.f32 %v780_v5 }
 0x16b   : > { %v1328_v57 = vsel %vm1317_vm14, nan, %v1327_v3  ;;  %v785_v17 = vand.u32 2147483647, %v784_v10  ;;  %v3141_v39 = vshrl.u32 %v1598_v12, 30  ;;  %v1436_v6 = vand.u32 2139095040, %v3134_v58 }
 0x16c   : > { %2065 = vst [vmem:[%s2978_s20 + $0x40] sm:$0xff] %v1328_v57  ;;  %v619_v43 = vshrl.u32 %v2543_v60, %v616_v15  ;;  %v622_v41 = vshrl.u32 %v2544_v62, %v616_v15  ;;  %v625_v59 = vshrl.u32 %v2545_v0, %v616_v15  ;;  %v618_v23 = vshll.u32 %v2542_v56, %v615_v8 }
 0x16d   : > { %v788_v14 = vmul.f32 %v787_v33, %v785_v17  ;;  %v1600_v18 = vshll.u32 %v3141_v39, 30  ;;  %v621_v50 = vshll.u32 %v2543_v60, %v615_v8  ;;  %v614_v7 = vshrl.u32 %v613_v24, 5 }
 0x16e   : > { %v624_v19 = vshll.u32 %v2544_v62, %v615_v8  ;;  %v627_v25 = vshll.u32 %v2545_v0, %v615_v8  ;;  %v628_v40 = vshrl.u32 %v2546_v2, %v616_v15  ;;  %v620_v44 = vor.u32 %v619_v43, %v618_v23 }
 0x16f   : > { %v789_v42 = vxor.u32 2147483648, %v788_v14  ;;  %v3154_v32 = vsub.s32 %v1597_v51, %v1600_v18  ;;  %v623_v31 = vor.u32 %v622_v41, %v621_v50  ;;  %v630_v36 = vshll.u32 %v2546_v2, %v615_v8 }
 0x170   : > { %v626_v34 = vor.u32 %v625_v59, %v624_v19  ;;  %v629_v16 = vor.u32 %v628_v40, %v627_v25  ;;  %v631_v38 = vshrl.u32 %v2547_v9, %v616_v15  ;;  %v649_v20 = vshll.u32 %v609_v48, 8 }
 0x171   : > { %v790_v21 = vsel %vm707_vm8, %v789_v42, %v788_v14  ;;  %v1603_v45 = vsub.s32 0, %v3154_v32  ;;  %v1433_v53 = vand.u32 2147483647, %v3134_v58  ;;  %v617_v35 = vshrl.u32 %v2542_v56, %v616_v15 }
 0x172   : > { %v793_v54 = vsel %vm3107_vm0, %v2878_v37, %v790_v21  ;;  %v632_v47 = vor.u32 %v631_v38, %v630_v36  ;;  %v1437_v49 = vshrl.u32 %v1436_v6, 23  ;;  %vm633_vm5 = vcmp.lt.s32.totalorder %v614_v7, 1 }
 0x173   : > { %2430 = vcosq.f32 %v793_v54  ;;  %v2218_v27 = vmin.u32 %v1603_v45, %v3154_v32  ;;  %vm636_vm6 = vcmp.lt.s32.totalorder %v614_v7, 4  ;;  %v641_v24 = vsel %vm633_vm5, %v620_v44, %v623_v31 }
 0x174   : > { %2432 = vsinq.f32 %v793_v54  ;;  %v638_v28 = vsel %vm636_vm6, %v626_v34, 2102212464  ;;  %v642_v11 = vsel %vm636_vm6, %v629_v16, 920167782  ;;  %vm634_vm7 = vcmp.lt.s32.totalorder %v614_v7, 2 }
 0x175   : > { %v1605_v5 = vclz %v2218_v27  ;;  %vm635_vm8 = vcmp.lt.s32.totalorder %v614_v7, 3  ;;  %v637_v52 = vsel %vm633_vm5, %v617_v35, %v620_v44  ;;  %v645_v61 = vsel %vm633_vm5, %v623_v31, %v626_v34  ;;  %v2279_v35 = vpop.f32.mrf.mxu0 }
 0x176   : > { %v639_v51 = vsel %vm635_vm8, %v623_v31, %v638_v28  ;;  %v643_v63 = vsel %vm635_vm8, %v626_v34, %v642_v11  ;;  %v646_v8 = vsel %vm636_vm6, %v632_v47, 1326507024  ;;  %v1623_v10 = vsub.s32 4, %v3141_v39 }
 0x177   : > { %v2219_v55 = vadd.s32 4294967294, %v1605_v5  ;;  %v644_v12 = vsel %vm634_vm7, %v641_v24, %v643_v63  ;;  %v647_v3 = vsel %vm635_vm8, %v629_v16, %v646_v8  ;;  %v640_v48 = vsel %vm634_vm7, %v637_v52, %v639_v51 }
 0x178   : > { %v648_v15 = vsel %vm634_vm7, %v645_v61, %v647_v3  ;;  %v3168_v57 = vmul.u32.u64.low %v649_v20, %v644_v12  ;;  %v3169_v17 = vmul.u32.u64.high %v649_v20, %v644_v12, %v3168_v57  ;;  %v2213_v41 = vadd.s32 4294967169, %v1437_v49 }
 0x179   : > { %vm2220_vm9 = vcmp.lt.s32.totalorder %v2219_v55, 0  ;;  %v3171_v33 = vmul.u32.u64.low %v649_v20, %v648_v15  ;;  %v3172_v43 = vmul.u32.u64.high %v649_v20, %v648_v15, %v3171_v33  ;;  %vm3176_vm11 = vcmp.le.f32.partialorder %v1537_v4, 0.7853982 }
 0x17a   : > { %vm1539_vm10 = vcmp.lt.s32.totalorder %v2984_v22, 0  ;;  %v1593_v6 = vadd.s32 %v3095_v1, %v3101_v29  ;;  %v1608_v14 = vsel %vm2220_vm9, 0, %v2219_v55  ;;  %v1443_v7 = vadd.s32 1, %v2213_v41 }
 0x17b   : > { %v1609_v18 = vsub.s32 32, %v1608_v14  ;;  %v1613_v23 = vsub.s32 4294967266, %v1608_v14  ;;  %v1624_v50 = vsel %vm1539_vm10, %v1623_v10, %v3141_v39  ;;  %v799_v19 = vand.u32 3, %v3137_v26 }
 0x17c   : > { %v656_v25 = vmul.u32 %v649_v20, %v640_v48  ;;  %v659_v4 = vadd.s32 1, %v3169_v17  ;;  %v1440_v40 = vand.u32 8388607, %v1433_v53  ;;  %v1610_v42 = vshll.u32 %v3154_v32, %v1608_v14 }
 0x17d   : > { %v1611_v44 = vshrl.u32 %v1593_v6, %v1609_v18  ;;  %v1614_v1 = vadd.s32 127, %v1613_v23  ;;  %vm658_vm12 = vc.u32 %v3172_v43, %v3168_v57  ;;  %v1626_v29 = vsel %vm3176_vm11, 0, %v1624_v50 }
 0x17e   : > { %v660_v39 = vsel %vm658_vm12, %v659_v4, %v3169_v17  ;;  %vm1444_vm13 = vcmp.gt.s32.totalorder %v1443_v7, 0  ;;  %vm797_vm14 = vweird.f32 %v2878_v37  ;;  %vm800_vm15 = vcmp.lt.s32.totalorder %v799_v19, 2 }
 0x17f   : > { %v1612_v31 = vor.u32 %v1611_v44, %v1610_v42  ;;  %v1615_v26 = vshll.u32 %v1614_v1, 23  ;;  %v661_v34 = vadd.s32 %v660_v39, %v656_v25  ;;  %v1445_v16 = vsel %vm1444_vm13, %v1443_v7, 0 }
 0x180   : > { %v2431_v36 = vpop.eup %2430  ;;  %vm801_vm0 = vcmp.eq.s32.totalorder %v799_v19, 0  ;;  %v1447_v32 = vand.u32 31, %v1445_v16  ;;  %v1441_v54 = vor.u32 8388608, %v1440_v40  ;;  %vm804_vm1 = vcmp.eq.s32.totalorder %v799_v19, 2 }
 0x181   : > { %v2433_v38 = vpop.eup %2432  ;;  %v805_v21 = vxor.u32 2147483648, %v2431_v36  ;;  %v1616_v45 = vor.u32 4788187, %v1615_v26  ;;  %v662_v20 = vadd.s32 536870912, %v661_v34  ;;  %v3196_v49 = vadd.s32 3, %v1626_v29 }
 0x182   : > { %v802_v47 = vxor.u32 2147483648, %v2433_v38  ;;  %v1448_v27 = vsub.s32 32, %v1447_v32  ;;  %v1619_v11 = vcvt.s32.f32 %v1612_v31  ;;  %v3200_v51 = vadd.s32 %v3168_v57, %v3172_v43 }
 0x183   : > { %v806_v28 = vsel %vm804_vm1, %v805_v21, %v2433_v38  ;;  %v1617_v24 = vand.u32 2147483647, %v1616_v45  ;;  %v663_v5 = vshrl.u32 %v662_v20, 30  ;;  %v3204_v61 = vadd.f32 %v3131_v30, %v2279_v35 }
 0x184   : > { %v803_v52 = vsel %vm801_vm0, %v2431_v36, %v802_v47  ;;  %v1451_v63 = vshrl.u32 %v2543_v60, %v1448_v27  ;;  %v3207_v12 = vshll.u32 %v1441_v54, 8  ;;  %v1450_v48 = vshll.u32 %v2542_v56, %v1447_v32 }
 0x185   : > { %v807_v8 = vsel %vm800_vm15, %v803_v52, %v806_v28  ;;  %v1620_v55 = vmul.f32 %v1619_v11, %v1617_v24  ;;  %v664_v10 = vshll.u32 %v663_v5, 30  ;;  %v1454_v15 = vshrl.u32 %v2544_v62, %v1448_v27 }
 0x186   : > { %v808_v3 = vsel %vm797_vm14, nan, %v807_v8  ;;  %v1457_v57 = vshrl.u32 %v2545_v0, %v1448_v27  ;;  %v1446_v43 = vshrl.u32 %v1445_v16, 5  ;;  %v1453_v41 = vshll.u32 %v2543_v60, %v1447_v32 }
 0x187   : > { %2060 = vst [vmem:[%s2978_s20 + $0x18] sm:$0xff] %v808_v3  ;;  %v1621_v17 = vxor.u32 2147483648, %v1620_v55  ;;  %v3215_v33 = vsub.s32 %v661_v34, %v664_v10  ;;  %v1452_v6 = vor.u32 %v1451_v63, %v1450_v48  ;;  %v1456_v14 = vshll.u32 %v2544_v62, %v1447_v32 }
 0x188   : > { %v1459_v18 = vshll.u32 %v2545_v0, %v1447_v32  ;;  %v1460_v37 = vshrl.u32 %v2546_v2, %v1448_v27  ;;  %vm603_vm2 = vcmp.lt.s32.totalorder %v3062_v46, 0  ;;  %v1462_v7 = vshll.u32 %v2546_v2, %v1447_v32 }
 0x189   : > { %v1622_v23 = vsel %vm1539_vm10, %v1621_v17, %v1620_v55  ;;  %v667_v50 = vsub.s32 0, %v3215_v33  ;;  %v1463_v19 = vshrl.u32 %v2547_v9, %v1448_v27  ;;  %v1455_v4 = vor.u32 %v1454_v15, %v1453_v41 }
 0x18a   : > { %v1625_v25 = vsel %vm3176_vm11, %v2984_v22, %v1622_v23  ;;  %v1458_v40 = vor.u32 %v1457_v57, %v1456_v14  ;;  %v1461_v42 = vor.u32 %v1460_v37, %v1459_v18  ;;  %v916_v29 = vand.u32 2139095040, %v3204_v61 }
 0x18b   : > { %2434 = vcosq.f32 %v1625_v25  ;;  %v2182_v44 = vmin.u32 %v667_v50, %v3215_v33  ;;  %v1464_v1 = vor.u32 %v1463_v19, %v1462_v7  ;;  %v687_v39 = vsub.s32 4, %v663_v5 }
 0x18c   : > { %2436 = vsinq.f32 %v1625_v25  ;;  %v1449_v31 = vshrl.u32 %v2542_v56, %v1448_v27  ;;  %vm1465_vm3 = vcmp.lt.s32.totalorder %v1446_v43, 1  ;;  %vm1466_vm4 = vcmp.lt.s32.totalorder %v1446_v43, 2 }
 0x18d   : > { %v669_v26 = vclz %v2182_v44  ;;  %vm1467_vm5 = vcmp.lt.s32.totalorder %v1446_v43, 3  ;;  %vm1468_vm6 = vcmp.lt.s32.totalorder %v1446_v43, 4  ;;  %v1473_v34 = vsel %vm1465_vm3, %v1452_v6, %v1455_v4 }
 0x18e   : > { %v1470_v59 = vsel %vm1468_vm6, %v1458_v40, 2102212464  ;;  %v1474_v16 = vsel %vm1468_vm6, %v1461_v42, 920167782  ;;  %v1477_v36 = vsel %vm1465_vm3, %v1455_v4, %v1458_v40  ;;  %v1469_v38 = vsel %vm1465_vm3, %v1449_v31, %v1452_v6  ;;  %v2291_v31 = vpop.f32.mrf.mxu1 }
 0x18f   : > { %v2183_v32 = vadd.s32 4294967294, %v669_v26  ;;  %v1475_v21 = vsel %vm1467_vm5, %v1458_v40, %v1474_v16  ;;  %v1478_v45 = vsel %vm1468_vm6, %v1464_v1, 1326507024  ;;  %v1471_v20 = vsel %vm1467_vm5, %v1455_v4, %v1470_v59 }
 0x190   : > { %v1476_v54 = vsel %vm1466_vm4, %v1473_v34, %v1475_v21  ;;  %v1479_v35 = vsel %vm1467_vm5, %v1461_v42, %v1478_v45  ;;  %v917_v47 = vshrl.u32 %v916_v29, 23  ;;  %v688_v52 = vsel %vm603_vm2, %v687_v39, %v663_v5 }
 0x191   : > { %vm2184_vm7 = vcmp.lt.s32.totalorder %v2183_v32, 0  ;;  %v1480_v27 = vsel %vm1466_vm4, %v1477_v36, %v1479_v35  ;;  %v3236_v28 = vmul.u32.u64.low %v3207_v12, %v1476_v54  ;;  %v3237_v24 = vmul.u32.u64.high %v3207_v12, %v1476_v54, %v3236_v28 }
 0x192   : > { %v672_v11 = vsel %vm2184_vm7, 0, %v2183_v32  ;;  %v3243_v63 = vmul.u32.u64.low %v3207_v12, %v1480_v27  ;;  %v3244_v8 = vmul.u32.u64.high %v3207_v12, %v1480_v27, %v3243_v63  ;;  %v1472_v3 = vsel %vm1466_vm4, %v1469_v38, %v1471_v20 }
 0x193   : > { %v673_v55 = vsub.s32 32, %v672_v11  ;;  %v677_v10 = vsub.s32 4294967266, %v672_v11  ;;  %v2193_v48 = vadd.s32 4294967169, %v917_v47  ;;  %vm3249_vm8 = vcmp.le.f32.partialorder %v601_v13, 0.7853982 }
 0x194   : > { %v674_v57 = vshll.u32 %v3215_v33, %v672_v11  ;;  %v913_v17 = vand.u32 2147483647, %v3204_v61  ;;  %v1491_v6 = vadd.s32 1, %v3237_v24  ;;  %v1631_v43 = vand.u32 3, %v3196_v49 }
 0x195   : > { %v675_v5 = vshrl.u32 %v3200_v51, %v673_v55  ;;  %v678_v41 = vadd.s32 127, %v677_v10  ;;  %v923_v14 = vadd.s32 1, %v2193_v48  ;;  %v690_v18 = vsel %vm3249_vm8, 0, %v688_v52 }
 0x196   : > { %v1488_v13 = vmul.u32 %v3207_v12, %v1472_v3  ;;  %vm1490_vm9 = vc.u32 %v3244_v8, %v3236_v28  ;;  %vm1629_vm10 = vweird.f32 %v2984_v22  ;;  %v694_v4 = vadd.s32 3, %v690_v18 }
 0x197   : > { %v676_v37 = vor.u32 %v675_v5, %v674_v57  ;;  %v679_v33 = vshll.u32 %v678_v41, 23  ;;  %v1492_v23 = vsel %vm1490_vm9, %v1491_v6, %v3237_v24  ;;  %vm924_vm11 = vcmp.gt.s32.totalorder %v923_v14, 0 }
 0x198   : > { %v2435_v51 = vpop.eup %2434  ;;  %v1493_v50 = vadd.s32 %v1492_v23, %v1488_v13  ;;  %v925_v7 = vsel %vm924_vm11, %v923_v14, 0  ;;  %v920_v12 = vand.u32 8388607, %v913_v17  ;;  %vm1636_vm12 = vcmp.eq.s32.totalorder %v1631_v43, 2 }
 0x199   : > { %v2437_v19 = vpop.eup %2436  ;;  %v1637_v49 = vxor.u32 2147483648, %v2435_v51  ;;  %v680_v25 = vor.u32 4788187, %v679_v33  ;;  %v927_v44 = vand.u32 31, %v925_v7  ;;  %vm1633_vm13 = vcmp.eq.s32.totalorder %v1631_v43, 0 }
 0x19a   : > { %v1634_v40 = vxor.u32 2147483648, %v2437_v19  ;;  %v1494_v42 = vadd.s32 536870912, %v1493_v50  ;;  %v683_v39 = vcvt.s32.f32 %v676_v37  ;;  %vm1632_vm14 = vcmp.lt.s32.totalorder %v1631_v43, 2 }
 0x19b   : > { %v1638_v1 = vsel %vm1636_vm12, %v1637_v49, %v2437_v19  ;;  %v681_v29 = vand.u32 2147483647, %v680_v25  ;;  %v928_v34 = vsub.s32 32, %v927_v44  ;;  %v3269_v32 = vand.u32 3, %v694_v4 }
 0x19c   : > { %v1635_v26 = vsel %vm1633_vm13, %v2435_v51, %v1634_v40  ;;  %v3267_v59 = vshrl.u32 %v1494_v42, 30  ;;  %v921_v38 = vor.u32 8388608, %v920_v12  ;;  %v930_v20 = vshll.u32 %v2542_v56, %v927_v44 }
 0x19d   : > { %v1639_v16 = vsel %vm1632_vm14, %v1635_v26, %v1638_v1  ;;  %v684_v36 = vmul.f32 %v683_v39, %v681_v29  ;;  %v3276_v54 = vadd.f32 %v3131_v30, %v2291_v31  ;;  %v931_v47 = vshrl.u32 %v2543_v60, %v928_v34 }
 0x19e   : > { %v1640_v21 = vsel %vm1629_vm10, nan, %v1639_v16  ;;  %v1496_v45 = vshll.u32 %v3267_v59, 30  ;;  %v934_v27 = vshrl.u32 %v2544_v62, %v928_v34  ;;  %v937_v24 = vshrl.u32 %v2545_v0, %v928_v34 }
 0x19f   : > { %2068 = vst [vmem:[%s2978_s20 + $0x58] sm:$0xff] %v1640_v21  ;;  %v685_v35 = vxor.u32 2147483648, %v684_v36  ;;  %v933_v22 = vshll.u32 %v2543_v60, %v927_v44  ;;  %v936_v52 = vshll.u32 %v2544_v62, %v927_v44  ;;  %v940_v63 = vshrl.u32 %v2546_v2, %v928_v34 }
 0x1a0   : > { %v3282_v11 = vsub.s32 %v1493_v50, %v1496_v45  ;;  %v926_v10 = vshrl.u32 %v925_v7, 5  ;;  %v932_v3 = vor.u32 %v931_v47, %v930_v20  ;;  %v939_v48 = vshll.u32 %v2545_v0, %v927_v44 }
 0x1a1   : > { %v686_v55 = vsel %vm603_vm2, %v685_v35, %v684_v36  ;;  %v935_v41 = vor.u32 %v934_v27, %v933_v22  ;;  %v938_v6 = vor.u32 %v937_v24, %v936_v52  ;;  %v942_v43 = vshll.u32 %v2546_v2, %v927_v44 }
 0x1a2   : > { %v689_v57 = vsel %vm3249_vm8, %v3062_v46, %v686_v55  ;;  %v1499_v5 = vsub.s32 0, %v3282_v11  ;;  %v941_v14 = vor.u32 %v940_v63, %v939_v48  ;;  %v943_v18 = vshrl.u32 %v2547_v9, %v928_v34 }
 0x1a3   : > { %2438 = vcosq.f32 %v689_v57  ;;  %v961_v37 = vshll.u32 %v921_v38, 8  ;;  %v1748_v33 = vand.u32 2139095040, %v3276_v54  ;;  %v929_v23 = vshrl.u32 %v2542_v56, %v928_v34 }
 0x1a4   : > { %2440 = vsinq.f32 %v689_v57  ;;  %v2214_v13 = vmin.u32 %v1499_v5, %v3282_v11  ;;  %v944_v15 = vor.u32 %v943_v18, %v942_v43  ;;  %vm945_vm15 = vcmp.lt.s32.totalorder %v926_v10, 1 }
 0x1a5   : > { %vm946_vm0 = vcmp.lt.s32.totalorder %v926_v10, 2  ;;  %vm947_vm1 = vcmp.lt.s32.totalorder %v926_v10, 3  ;;  %vm948_vm2 = vcmp.lt.s32.totalorder %v926_v10, 4  ;;  %v953_v50 = vsel %vm945_vm15, %v932_v3, %v935_v41 }
 0x1a6   : > { %v1501_v51 = vclz %v2214_v13  ;;  %v950_v7 = vsel %vm948_vm2, %v938_v6, 2102212464  ;;  %v954_v19 = vsel %vm948_vm2, %v941_v14, 920167782  ;;  %v957_v49 = vsel %vm945_vm15, %v935_v41, %v938_v6 }
 0x1a7   : > { %v958_v25 = vsel %vm948_vm2, %v944_v15, 1326507024  ;;  %v1519_v12 = vsub.s32 4, %v3267_v59  ;;  %v955_v40 = vsel %vm947_vm1, %v938_v6, %v954_v19  ;;  %v949_v44 = vsel %vm945_vm15, %v929_v23, %v932_v3 }
 0x1a8   : > { %v2215_v4 = vadd.s32 4294967294, %v1501_v51  ;;  %v959_v42 = vsel %vm947_vm1, %v941_v14, %v958_v25  ;;  %v956_v1 = vsel %vm946_vm0, %v953_v50, %v955_v40  ;;  %v1749_v39 = vshrl.u32 %v1748_v33, 23 }
 0x1a9   : > { %v960_v29 = vsel %vm946_vm0, %v957_v49, %v959_v42  ;;  %v951_v31 = vsel %vm947_vm1, %v935_v41, %v950_v7  ;;  %v3308_v36 = vmul.u32.u64.low %v961_v37, %v956_v1  ;;  %v3309_v38 = vmul.u32.u64.high %v961_v37, %v956_v1, %v3308_v36 }
 0x1aa   : > { %vm2216_vm3 = vcmp.lt.s32.totalorder %v2215_v4, 0  ;;  %v3305_v26 = vmul.u32.u64.low %v961_v37, %v960_v29  ;;  %v3306_v34 = vmul.u32.u64.high %v961_v37, %v960_v29, %v3305_v26  ;;  %v2225_v21 = vadd.s32 4294967169, %v1749_v39 }
 0x1ab   : > { %v1504_v16 = vsel %vm2216_vm3, 0, %v2215_v4  ;;  %vm3314_vm4 = vcmp.le.f32.partialorder %v1433_v53, 0.7853982  ;;  %v1489_v20 = vadd.s32 %v3236_v28, %v3244_v8  ;;  %vm693_vm5 = vweird.f32 %v3062_v46 }
 0x1ac   : > { %v1505_v35 = vsub.s32 32, %v1504_v16  ;;  %v1509_v47 = vsub.s32 4294967266, %v1504_v16  ;;  %vm696_vm6 = vcmp.lt.s32.totalorder %v3269_v32, 2  ;;  %vm1435_vm7 = vcmp.lt.s32.totalorder %v3134_v58, 0 }
 0x1ad   : > { %v952_v27 = vsel %vm946_vm0, %v949_v44, %v951_v31  ;;  %v1755_v24 = vadd.s32 1, %v2225_v21  ;;  %v1506_v22 = vshll.u32 %v3282_v11, %v1504_v16  ;;  %vm970_vm8 = vc.u32 %v3306_v34, %v3308_v36  ;;  %v334_v11 = vpop.f32.mrf.mxu0 }
 0x1ae   : > { %v1507_v53 = vshrl.u32 %v1489_v20, %v1505_v35  ;;  %v1510_v52 = vadd.s32 127, %v1509_v47  ;;  %vm697_vm9 = vcmp.eq.s32.totalorder %v3269_v32, 0  ;;  %v1520_v28 = vsel %vm1435_vm7, %v1519_v12, %v3267_v59 }
 0x1af   : > { %v971_v8 = vadd.s32 1, %v3309_v38  ;;  %vm1756_vm11 = vcmp.gt.s32.totalorder %v1755_v24, 0  ;;  %v968_v3 = vmul.u32 %v961_v37, %v952_v27  ;;  %v1745_v6 = vand.u32 2147483647, %v3276_v54 }
 0x1b0   : > { %v2439_v63 = vpop.eup %2438  ;;  %v1508_v55 = vor.u32 %v1507_v53, %v1506_v22  ;;  %v1511_v10 = vshll.u32 %v1510_v52, 23  ;;  %v1757_v48 = vsel %vm1756_vm11, %v1755_v24, 0  ;;  %vm700_vm10 = vcmp.eq.s32.totalorder %v3269_v32, 2 }
 0x1b1   : > { %v2441_v57 = vpop.eup %2440  ;;  %v701_v5 = vxor.u32 2147483648, %v2439_v63  ;;  %v972_v41 = vsel %vm970_vm8, %v971_v8, %v3309_v38  ;;  %v1759_v14 = vand.u32 31, %v1757_v48  ;;  %v1522_v33 = vsel %vm3314_vm4, 0, %v1520_v28 }
 0x1b2   : > { %v698_v43 = vxor.u32 2147483648, %v2441_v57  ;;  %v1512_v59 = vor.u32 4788187, %v1511_v10  ;;  %v973_v18 = vadd.s32 %v972_v41, %v968_v3  ;;  %v3338_v23 = vadd.f32 %v3131_v30, %v334_v11 }
 0x1b3   : > { %v702_v13 = vsel %vm700_vm10, %v701_v5, %v2441_v57  ;;  %v1760_v37 = vsub.s32 32, %v1759_v14  ;;  %v1515_v50 = vcvt.s32.f32 %v1508_v55  ;;  %v1752_v49 = vand.u32 8388607, %v1745_v6 }
 0x1b4   : > { %v699_v15 = vsel %vm697_vm9, %v2439_v63, %v698_v43  ;;  %v1513_v51 = vand.u32 2147483647, %v1512_v59  ;;  %v974_v7 = vadd.s32 536870912, %v973_v18  ;;  %v1758_v1 = vshrl.u32 %v1757_v48, 5 }
 0x1b5   : > { %v703_v19 = vsel %vm696_vm6, %v699_v15, %v702_v13  ;;  %v1763_v25 = vshrl.u32 %v2543_v60, %v1760_v37  ;;  %v1766_v4 = vshrl.u32 %v2544_v62, %v1760_v37  ;;  %v1769_v44 = vshrl.u32 %v2545_v0, %v1760_v37 }
 0x1b6   : > { %v704_v12 = vsel %vm693_vm5, nan, %v703_v19  ;;  %v1516_v40 = vmul.f32 %v1515_v50, %v1513_v51  ;;  %v975_v42 = vshrl.u32 %v974_v7, 30  ;;  %v1762_v29 = vshll.u32 %v2542_v56, %v1759_v14 }
 0x1b7   : > { %2059 = vst [vmem:[%s2978_s20 + $0x10] sm:$0xff] %v704_v12  ;;  %v1768_v32 = vshll.u32 %v2544_v62, %v1759_v14  ;;  %v1772_v39 = vshrl.u32 %v2546_v2, %v1760_v37  ;;  %v1765_v16 = vshll.u32 %v2543_v60, %v1759_v14  ;;  %v1771_v38 = vshll.u32 %v2545_v0, %v1759_v14 }
 0x1b8   : > { %v1517_v31 = vxor.u32 2147483648, %v1516_v40  ;;  %v976_v26 = vshll.u32 %v975_v42, 30  ;;  %v1764_v46 = vor.u32 %v1763_v25, %v1762_v29  ;;  %v1774_v20 = vshll.u32 %v2546_v2, %v1759_v14 }
 0x1b9   : > { %v1770_v21 = vor.u32 %v1769_v44, %v1768_v32  ;;  %v1775_v35 = vshrl.u32 %v2547_v9, %v1760_v37  ;;  %v1767_v24 = vor.u32 %v1766_v4, %v1765_v16  ;;  %v1773_v22 = vor.u32 %v1772_v39, %v1771_v38 }
 0x1ba   : > { %v1518_v47 = vsel %vm1435_vm7, %v1517_v31, %v1516_v40  ;;  %v3361_v27 = vsub.s32 %v973_v18, %v976_v26  ;;  %v1526_v52 = vadd.s32 3, %v1522_v33  ;;  %v1753_v28 = vor.u32 8388608, %v1752_v49 }
 0x1bb   : > { %v1521_v53 = vsel %vm3314_vm4, %v3134_v58, %v1518_v47  ;;  %v1776_v8 = vor.u32 %v1775_v35, %v1774_v20  ;;  %vm1780_vm12 = vcmp.lt.s32.totalorder %v1758_v1, 4  ;;  %v812_v55 = vand.u32 2139095040, %v3338_v23 }
 0x1bc   : > { %2442 = vcosq.f32 %v1521_v53  ;;  %v979_v63 = vsub.s32 0, %v3361_v27  ;;  %v1761_v10 = vshrl.u32 %v2542_v56, %v1760_v37  ;;  %vm1777_vm13 = vcmp.lt.s32.totalorder %v1758_v1, 1 }
 0x1bd   : > { %2444 = vsinq.f32 %v1521_v53  ;;  %v1782_v3 = vsel %vm1780_vm12, %v1770_v21, 2102212464  ;;  %vm1779_vm14 = vcmp.lt.s32.totalorder %v1758_v1, 3  ;;  %v1785_v11 = vsel %vm1777_vm13, %v1764_v46, %v1767_v24 }
 0x1be   : > { %v2194_v48 = vmin.u32 %v979_v63, %v3361_v27  ;;  %v1786_v45 = vsel %vm1780_vm12, %v1773_v22, 920167782  ;;  %v999_v57 = vsub.s32 4, %v975_v42  ;;  %v1789_v41 = vsel %vm1777_vm13, %v1767_v24, %v1770_v21 }
 0x1bf   : > { %v1787_v5 = vsel %vm1779_vm14, %v1770_v21, %v1786_v45  ;;  %v1790_v14 = vsel %vm1780_vm12, %v1776_v8, 1326507024  ;;  %vm1778_vm15 = vcmp.lt.s32.totalorder %v1758_v1, 2  ;;  %v1781_v59 = vsel %vm1777_vm13, %v1761_v10, %v1764_v46 }
 0x1c0   : > { %v981_v43 = vclz %v2194_v48  ;;  %v1783_v18 = vsel %vm1779_vm14, %v1767_v24, %v1782_v3  ;;  %v1788_v13 = vsel %vm1778_vm15, %v1785_v11, %v1787_v5  ;;  %v1791_v33 = vsel %vm1779_vm14, %v1773_v22, %v1790_v14  ;;  %v374_v14 = vpop.f32.mrf.mxu1 }
 0x1c1   : > { %v1793_v15 = vshll.u32 %v1753_v28, 8  ;;  %v813_v51 = vshrl.u32 %v812_v55, 23  ;;  %vm915_vm0 = vcmp.lt.s32.totalorder %v3204_v61, 0  ;;  %v1792_v50 = vsel %vm1778_vm15, %v1789_v41, %v1791_v33 }
 0x1c2   : > { %v2195_v37 = vadd.s32 4294967294, %v981_v43  ;;  %v1000_v4 = vsel %vm915_vm0, %v999_v57, %v975_v42  ;;  %v1784_v12 = vsel %vm1778_vm15, %v1781_v59, %v1783_v18  ;;  %v1527_v44 = vand.u32 3, %v1526_v52 }
 0x1c3   : > { %v3371_v7 = vmul.u32.u64.low %v1793_v15, %v1792_v50  ;;  %v3372_v19 = vmul.u32.u64.high %v1793_v15, %v1792_v50, %v3371_v7  ;;  %v3374_v49 = vmul.u32.u64.low %v1793_v15, %v1788_v13  ;;  %v3375_v25 = vmul.u32.u64.high %v1793_v15, %v1788_v13, %v3374_v49 }
 0x1c4   : > { %vm2196_vm1 = vcmp.lt.s32.totalorder %v2195_v37, 0  ;;  %v2189_v40 = vadd.s32 4294967169, %v813_v51  ;;  %vm3382_vm2 = vcmp.le.f32.partialorder %v913_v17, 0.7853982  ;;  %v809_v32 = vand.u32 2147483647, %v3338_v23 }
 0x1c5   : > { %v984_v29 = vsel %vm2196_vm1, 0, %v2195_v37  ;;  %v969_v39 = vadd.s32 %v3308_v36, %v3306_v34  ;;  %v1002_v42 = vsel %vm3382_vm2, 0, %v1000_v4  ;;  %v1800_v38 = vmul.u32 %v1793_v15, %v1784_v12 }
 0x1c6   : > { %v985_v31 = vsub.s32 32, %v984_v29  ;;  %v989_v26 = vsub.s32 4294967266, %v984_v29  ;;  %v819_v16 = vadd.s32 1, %v2189_v40  ;;  %vm1802_vm3 = vc.u32 %v3372_v19, %v3374_v49 }
 0x1c7   : > { %v1803_v17 = vadd.s32 1, %v3375_v25  ;;  %v986_v46 = vshll.u32 %v3361_v27, %v984_v29  ;;  %vm1532_vm5 = vcmp.eq.s32.totalorder %v1527_v44, 2  ;;  %v1006_v8 = vadd.s32 3, %v1002_v42 }
 0x1c8   : > { %v987_v21 = vshrl.u32 %v969_v39, %v985_v31  ;;  %v990_v20 = vadd.s32 127, %v989_v26  ;;  %vm820_vm4 = vcmp.gt.s32.totalorder %v819_v16, 0  ;;  %v816_v63 = vand.u32 8388607, %v809_v32 }
 0x1c9   : > { %v2443_v35 = vpop.eup %2442  ;;  %v1804_v34 = vsel %vm1802_vm3, %v1803_v17, %v3375_v25  ;;  %v821_v36 = vsel %vm820_vm4, %v819_v16, 0  ;;  %vm1529_vm6 = vcmp.eq.s32.totalorder %v1527_v44, 0  ;;  %vm1525_vm7 = vweird.f32 %v3134_v58 }
 0x1ca   : > { %v2445_v47 = vpop.eup %2444  ;;  %v1533_v24 = vxor.u32 2147483648, %v2443_v35  ;;  %v988_v22 = vor.u32 %v987_v21, %v986_v46  ;;  %v991_v53 = vshll.u32 %v990_v20, 23  ;;  %v1805_v52 = vadd.s32 %v1804_v34, %v1800_v38 }
 0x1cb   : > { %v1530_v28 = vxor.u32 2147483648, %v2445_v47  ;;  %v823_v55 = vand.u32 31, %v821_v36  ;;  %vm1528_vm8 = vcmp.lt.s32.totalorder %v1527_v44, 2  ;;  %v3401_v59 = vand.u32 3, %v1006_v8 }
 0x1cc   : > { %v1534_v27 = vsel %vm1532_vm5, %v1533_v24, %v2445_v47  ;;  %v992_v10 = vor.u32 4788187, %v991_v53  ;;  %v1806_v3 = vadd.s32 536870912, %v1805_v52  ;;  %v995_v5 = vcvt.s32.f32 %v988_v22 }
 0x1cd   : > { %v1531_v48 = vsel %vm1529_vm6, %v2443_v35, %v1530_v28  ;;  %v824_v11 = vsub.s32 32, %v823_v55  ;;  %v817_v18 = vor.u32 8388608, %v816_v63  ;;  %v822_v51 = vshrl.u32 %v821_v36, 5 }
 0x1ce   : > { %v1535_v45 = vsel %vm1528_vm8, %v1531_v48, %v1534_v27  ;;  %v993_v57 = vand.u32 2147483647, %v992_v10  ;;  %v3399_v41 = vshrl.u32 %v1806_v3, 30  ;;  %v3410_v7 = vadd.f32 %v3131_v30, %v374_v14 }
 0x1cf   : > { %v1536_v43 = vsel %vm1525_vm7, nan, %v1535_v45  ;;  %v827_v15 = vshrl.u32 %v2543_v60, %v824_v11  ;;  %v830_v58 = vshrl.u32 %v2544_v62, %v824_v11  ;;  %v833_v37 = vshrl.u32 %v2545_v0, %v824_v11 }
 0x1d0   : > { %2067 = vst [vmem:[%s2978_s20 + $0x50] sm:$0xff] %v1536_v43  ;;  %v996_v13 = vmul.f32 %v995_v5, %v993_v57  ;;  %v1808_v33 = vshll.u32 %v3399_v41, 30  ;;  %v836_v50 = vshrl.u32 %v2546_v2, %v824_v11  ;;  %v826_v12 = vshll.u32 %v2542_v56, %v823_v55 }
 0x1d1   : > { %v829_v40 = vshll.u32 %v2543_v60, %v823_v55  ;;  %v832_v44 = vshll.u32 %v2544_v62, %v823_v55  ;;  %v835_v29 = vshll.u32 %v2545_v0, %v823_v55  ;;  %v838_v39 = vshll.u32 %v2546_v2, %v823_v55 }
 0x1d2   : > { %v997_v25 = vxor.u32 2147483648, %v996_v13  ;;  %v3412_v4 = vsub.s32 %v1805_v52, %v1808_v33  ;;  %v839_v31 = vshrl.u32 %v2547_v9, %v824_v11  ;;  %v828_v16 = vor.u32 %v827_v15, %v826_v12 }
 0x1d3   : > { %v831_v42 = vor.u32 %v830_v58, %v829_v40  ;;  %vm1747_vm9 = vcmp.lt.s32.totalorder %v3276_v54, 0  ;;  %v834_v17 = vor.u32 %v833_v37, %v832_v44  ;;  %v837_v46 = vor.u32 %v836_v50, %v835_v29 }
 0x1d4   : > { %v998_v26 = vsel %vm915_vm0, %v997_v25, %v996_v13  ;;  %v1811_v30 = vsub.s32 0, %v3412_v4  ;;  %v840_v21 = vor.u32 %v839_v31, %v838_v39  ;;  %v857_v35 = vshll.u32 %v817_v18, 8 }
 0x1d5   : > { %v1001_v38 = vsel %vm3382_vm2, %v3204_v61, %v998_v26  ;;  %v1644_v34 = vand.u32 2139095040, %v3410_v7  ;;  %v1831_v36 = vsub.s32 4, %v3399_v41  ;;  %v825_v47 = vshrl.u32 %v2542_v56, %v824_v11 }
 0x1d6   : > { %2446 = vcosq.f32 %v1001_v38  ;;  %v2226_v20 = vmin.u32 %v1811_v30, %v3412_v4  ;;  %vm841_vm11 = vcmp.lt.s32.totalorder %v822_v51, 1  ;;  %vm843_vm10 = vcmp.lt.s32.totalorder %v822_v51, 3 }
 0x1d7   : > { %2448 = vsinq.f32 %v1001_v38  ;;  %vm844_vm12 = vcmp.lt.s32.totalorder %v822_v51, 4  ;;  %v849_v1 = vsel %vm841_vm11, %v828_v16, %v831_v42  ;;  %v853_v52 = vsel %vm841_vm11, %v831_v42, %v834_v17 }
 0x1d8   : > { %v1813_v24 = vclz %v2226_v20  ;;  %v846_v22 = vsel %vm844_vm12, %v834_v17, 2102212464  ;;  %v850_v53 = vsel %vm844_vm12, %v837_v46, 920167782  ;;  %v854_v28 = vsel %vm844_vm12, %v840_v21, 1326507024 }
 0x1d9   : > { %vm842_vm13 = vcmp.lt.s32.totalorder %v822_v51, 2  ;;  %v851_v63 = vsel %vm843_vm10, %v834_v17, %v850_v53  ;;  %v855_v55 = vsel %vm843_vm10, %v837_v46, %v854_v28  ;;  %v845_v27 = vsel %vm841_vm11, %v825_v47, %v828_v16  ;;  %v2282_v51 = vpop.f32.mrf.mxu0  ;;  %v3470_v46 = vld [vmem:[%s3866_s2] ss:$0 sm:$0xff] }
 0x1da   : > { %v2227_v8 = vadd.s32 4294967294, %v1813_v24  ;;  %v852_v10 = vsel %vm842_vm13, %v849_v1, %v851_v63  ;;  %v856_v3 = vsel %vm842_vm13, %v853_v52, %v855_v55  ;;  %v1645_v48 = vshrl.u32 %v1644_v34, 23 }
 0x1db   : > { %v847_v11 = vsel %vm843_vm10, %v831_v42, %v846_v22  ;;  %v3436_v45 = vmul.u32.u64.low %v857_v35, %v856_v3  ;;  %v3437_v57 = vmul.u32.u64.high %v857_v35, %v856_v3, %v3436_v45  ;;  %v1801_v13 = vadd.s32 %v3374_v49, %v3372_v19 }
 0x1dc   : > { %vm2228_vm14 = vcmp.lt.s32.totalorder %v2227_v8, 0  ;;  %v3439_v14 = vmul.u32.u64.low %v857_v35, %v852_v10  ;;  %v3440_v43 = vmul.u32.u64.high %v857_v35, %v852_v10, %v3439_v14  ;;  %v2221_v18 = vadd.s32 4294967169, %v1645_v48 }
 0x1dd   : > { %v1816_v5 = vsel %vm2228_vm14, 0, %v2227_v8  ;;  %v1832_v58 = vsel %vm1747_vm9, %v1831_v36, %v3399_v41  ;;  %vm1008_vm15 = vcmp.lt.s32.totalorder %v3401_v59, 2  ;;  %vm3451_vm0 = vcmp.le.f32.partialorder %v1745_v6, 0.7853982 }
 0x1de   : > { %v1817_v33 = vsub.s32 32, %v1816_v5  ;;  %v1821_v15 = vsub.s32 4294967266, %v1816_v5  ;;  %v848_v50 = vsel %vm842_vm13, %v845_v27, %v847_v11  ;;  %v1651_v25 = vadd.s32 1, %v2221_v18 }
 0x1df   : > { %vm1005_vm1 = vweird.f32 %v3204_v61  ;;  %v1818_v19 = vshll.u32 %v3412_v4, %v1816_v5  ;;  %vm866_vm2 = vc.u32 %v3437_v57, %v3439_v14  ;;  %v1834_v41 = vsel %vm3451_vm0, 0, %v1832_v58 }
 0x1e0   : > { %v1819_v49 = vshrl.u32 %v1801_v13, %v1817_v33  ;;  %v1822_v12 = vadd.s32 127, %v1821_v15  ;;  %v867_v6 = vadd.s32 1, %v3440_v43  ;;  %v1641_v40 = vand.u32 2147483647, %v3410_v7 }
 0x1e1   : > { %vm1652_vm3 = vcmp.gt.s32.totalorder %v1651_v25, 0  ;;  %v864_v39 = vmul.u32 %v857_v35, %v848_v50  ;;  %vm1009_vm4 = vcmp.eq.s32.totalorder %v3401_v59, 0  ;;  %vm1012_vm5 = vcmp.eq.s32.totalorder %v3401_v59, 2 }
 0x1e2   : > { %v1820_v44 = vor.u32 %v1819_v49, %v1818_v19  ;;  %v1823_v29 = vshll.u32 %v1822_v12, 23  ;;  %v1653_v31 = vsel %vm1652_vm3, %v1651_v25, 0  ;;  %v868_v4 = vsel %vm866_vm2, %v867_v6, %v3440_v43 }
 0x1e3   : > { %v2447_v26 = vpop.eup %2446  ;;  %v1655_v30 = vand.u32 31, %v1653_v31  ;;  %v869_v17 = vadd.s32 %v868_v4, %v864_v39  ;;  %v3473_v21 = vadd.f32 %v3470_v46, %v2282_v51  ;;  %v3475_v35 = vadd.s32 3, %v1834_v41 }
 0x1e4   : > { %v2449_v16 = vpop.eup %2448  ;;  %v1013_v42 = vxor.u32 2147483648, %v2447_v26  ;;  %v1824_v38 = vor.u32 4788187, %v1823_v29  ;;  %v1648_v34 = vand.u32 8388607, %v1641_v40  ;;  %v1827_v1 = vcvt.s32.f32 %v1820_v44 }
 0x1e5   : > { %v1010_v20 = vxor.u32 2147483648, %v2449_v16  ;;  %v1656_v36 = vsub.s32 32, %v1655_v30  ;;  %v870_v22 = vadd.s32 536870912, %v869_v17  ;;  %v1658_v52 = vshll.u32 %v2542_v56, %v1655_v30 }
 0x1e6   : > { %v1014_v47 = vsel %vm1012_vm5, %v1013_v42, %v2449_v16  ;;  %v1825_v24 = vand.u32 2147483647, %v1824_v38  ;;  %v1649_v48 = vor.u32 8388608, %v1648_v34  ;;  %v1654_v11 = vshrl.u32 %v1653_v31, 5 }
 0x1e7   : > { %v1011_v53 = vsel %vm1009_vm4, %v2447_v26, %v1010_v20  ;;  %v1659_v28 = vshrl.u32 %v2543_v60, %v1656_v36  ;;  %v1662_v8 = vshrl.u32 %v2544_v62, %v1656_v36  ;;  %v3486_v27 = vshrl.u32 %v870_v22, 30 }
 0x1e8   : > { %v1015_v63 = vsel %vm1008_vm15, %v1011_v53, %v1014_v47  ;;  %v1828_v55 = vmul.f32 %v1827_v1, %v1825_v24  ;;  %v1665_v10 = vshrl.u32 %v2545_v0, %v1656_v36  ;;  %v1661_v45 = vshll.u32 %v2543_v60, %v1655_v30  ;;  %v2294_v1 = vpop.f32.mrf.mxu1 }
 0x1e9   : > { %v1016_v3 = vsel %vm1005_vm1, nan, %v1015_v63  ;;  %v872_v43 = vshll.u32 %v3486_v27, 30  ;;  %v1660_v18 = vor.u32 %v1659_v28, %v1658_v52  ;;  %v1664_v59 = vshll.u32 %v2544_v62, %v1655_v30 }
 0x1ea   : > { %2062 = vst [vmem:[%s2978_s20 + $0x28] sm:$0xff] %v1016_v3  ;;  %v1829_v5 = vxor.u32 2147483648, %v1828_v55  ;;  %v1667_v13 = vshll.u32 %v2545_v0, %v1655_v30  ;;  %v1668_v33 = vshrl.u32 %v2546_v2, %v1656_v36  ;;  %v1670_v15 = vshll.u32 %v2546_v2, %v1655_v30 }
 0x1eb   : > { %v1671_v61 = vshrl.u32 %v2547_v9, %v1656_v36  ;;  %v3501_v50 = vsub.s32 %v869_v17, %v872_v43  ;;  %v1663_v25 = vor.u32 %v1662_v8, %v1661_v45  ;;  %v1666_v19 = vor.u32 %v1665_v10, %v1664_v59 }
 0x1ec   : > { %v1830_v58 = vsel %vm1747_vm9, %v1829_v5, %v1828_v55  ;;  %v1669_v12 = vor.u32 %v1668_v33, %v1667_v13  ;;  %v1121_v6 = vand.u32 2147483647, %v3473_v21  ;;  %v1657_v44 = vshrl.u32 %v2542_v56, %v1656_v36 }
 0x1ed   : > { %v1833_v49 = vsel %vm3451_vm0, %v3276_v54, %v1830_v58  ;;  %v1672_v41 = vor.u32 %v1671_v61, %v1670_v15  ;;  %v875_v51 = vsub.s32 0, %v3501_v50  ;;  %v1124_v29 = vand.u32 2139095040, %v3473_v21 }
 0x1ee   : > { %2450 = vcosq.f32 %v1833_v49  ;;  %vm811_vm6 = vcmp.lt.s32.totalorder %v3338_v23, 0  ;;  %vm1673_vm7 = vcmp.lt.s32.totalorder %v1654_v11, 1  ;;  %vm1675_vm8 = vcmp.lt.s32.totalorder %v1654_v11, 3 }
 0x1ef   : > { %2452 = vsinq.f32 %v1833_v49  ;;  %vm1676_vm9 = vcmp.lt.s32.totalorder %v1654_v11, 4  ;;  %v2190_v37 = vmin.u32 %v875_v51, %v3501_v50  ;;  %v1681_v31 = vsel %vm1673_vm7, %v1660_v18, %v1663_v25 }
 0x1f0   : > { %v1678_v39 = vsel %vm1676_vm9, %v1666_v19, 2102212464  ;;  %v1682_v26 = vsel %vm1676_vm9, %v1669_v12, 920167782  ;;  %v1685_v30 = vsel %vm1673_vm7, %v1663_v25, %v1666_v19  ;;  %v1686_v16 = vsel %vm1676_vm9, %v1672_v41, 1326507024 }
 0x1f1   : > { %v1683_v4 = vsel %vm1675_vm8, %v1666_v19, %v1682_v26  ;;  %v1689_v42 = vshll.u32 %v1649_v48, 8  ;;  %v877_v38 = vclz %v2190_v37  ;;  %v895_v17 = vsub.s32 4, %v3486_v27 }
 0x1f2   : > { %vm1674_vm11 = vcmp.lt.s32.totalorder %v1654_v11, 2  ;;  %v1677_v20 = vsel %vm1673_vm7, %v1657_v44, %v1660_v18  ;;  %v1679_v34 = vsel %vm1675_vm8, %v1663_v25, %v1678_v39  ;;  %v1687_v47 = vsel %vm1675_vm8, %v1669_v12, %v1686_v16 }
 0x1f3   : > { %v1684_v36 = vsel %vm1674_vm11, %v1681_v31, %v1683_v4  ;;  %v1125_v24 = vshrl.u32 %v1124_v29, 23  ;;  %v2191_v22 = vadd.s32 4294967294, %v877_v38  ;;  %v1688_v53 = vsel %vm1674_vm11, %v1685_v30, %v1687_v47 }
 0x1f4   : > { %v3516_v52 = vmul.u32.u64.low %v1689_v42, %v1684_v36  ;;  %v3517_v28 = vmul.u32.u64.high %v1689_v42, %v1684_v36, %v3516_v52  ;;  %vm3521_vm10 = vcmp.le.f32.partialorder %v809_v32, 0.7853982  ;;  %v1839_v3 = vand.u32 3, %v3475_v35 }
 0x1f5   : > { %v3525_v63 = vmul.u32.u64.low %v1689_v42, %v1688_v53  ;;  %v3526_v55 = vmul.u32.u64.high %v1689_v42, %v1688_v53, %v3525_v63  ;;  %v2201_v10 = vadd.s32 4294967169, %v1125_v24  ;;  %vm2192_vm12 = vcmp.lt.s32.totalorder %v2191_v22, 0 }
 0x1f6   : > { %v1680_v48 = vsel %vm1674_vm11, %v1677_v20, %v1679_v34  ;;  %v3530_v11 = vadd.f32 %v3470_v46, %v2294_v1  ;;  %v865_v45 = vadd.s32 %v3439_v14, %v3437_v57  ;;  %v880_v5 = vsel %vm2192_vm12, 0, %v2191_v22 }
 0x1f7   : > { %v3536_v32 = vand.u32 8388607, %v1121_v6  ;;  %v1131_v43 = vadd.s32 1, %v2201_v10  ;;  %vm1837_vm13 = vweird.f32 %v3276_v54  ;;  %v881_v18 = vsub.s32 32, %v880_v5 }
 0x1f8   : > { %v885_v59 = vsub.s32 4294967266, %v880_v5  ;;  %v896_v35 = vsel %vm811_vm6, %v895_v17, %v3486_v27  ;;  %v1699_v13 = vadd.s32 1, %v3517_v28  ;;  %v882_v33 = vshll.u32 %v3501_v50, %v880_v5 }
 0x1f9   : > { %v1696_v15 = vmul.u32 %v1689_v42, %v1680_v48  ;;  %vm1698_vm14 = vc.u32 %v3526_v55, %v3516_v52  ;;  %vm1132_vm15 = vcmp.gt.s32.totalorder %v1131_v43, 0  ;;  %v883_v57 = vshrl.u32 %v865_v45, %v881_v18 }
 0x1fa   : > { %v886_v14 = vadd.s32 127, %v885_v59  ;;  %v1700_v61 = vsel %vm1698_vm14, %v1699_v13, %v3517_v28  ;;  %v1133_v58 = vsel %vm1132_vm15, %v1131_v43, 0  ;;  %vm1840_vm0 = vcmp.lt.s32.totalorder %v1839_v3, 2 }
 0x1fb   : > { %v2451_v25 = vpop.eup %2450  ;;  %v898_v19 = vsel %vm3521_vm10, 0, %v896_v35  ;;  %v1701_v49 = vadd.s32 %v1700_v61, %v1696_v15  ;;  %v1135_v27 = vand.u32 31, %v1133_v58  ;;  %vm1841_vm1 = vcmp.eq.s32.totalorder %v1839_v3, 0 }
 0x1fc   : > { %v2453_v12 = vpop.eup %2452  ;;  %v1845_v41 = vxor.u32 2147483648, %v2451_v25  ;;  %v884_v50 = vor.u32 %v883_v57, %v882_v33  ;;  %v887_v51 = vshll.u32 %v886_v14, 23  ;;  %vm1844_vm2 = vcmp.eq.s32.totalorder %v1839_v3, 2 }
 0x1fd   : > { %v1842_v44 = vxor.u32 2147483648, %v2453_v12  ;;  %v1702_v29 = vadd.s32 536870912, %v1701_v49  ;;  %v1136_v37 = vsub.s32 32, %v1135_v27  ;;  %v3548_v26 = vadd.s32 3, %v898_v19 }
 0x1fe   : > { %v1846_v39 = vsel %vm1844_vm2, %v1845_v41, %v2453_v12  ;;  %v888_v31 = vor.u32 4788187, %v887_v51  ;;  %v1129_v4 = vor.u32 8388608, %v3536_v32  ;;  %v1953_v42 = vand.u32 2147483647, %v3530_v11 }
 0x1ff   : > { %v1843_v30 = vsel %vm1841_vm1, %v2451_v25, %v1842_v44  ;;  %v1703_v16 = vshrl.u32 %v1702_v29, 30  ;;  %v1956_v38 = vand.u32 2139095040, %v3530_v11  ;;  %v891_v34 = vcvt.s32.f32 %v884_v50 }
 0x200   : > { %v1847_v17 = vsel %vm1840_vm0, %v1843_v30, %v1846_v39  ;;  %v889_v20 = vand.u32 2147483647, %v888_v31  ;;  %v1139_v36 = vshrl.u32 %v2543_v60, %v1136_v37  ;;  %v3558_v24 = vadd.s32 %v3516_v52, %v3526_v55 }
 0x201   : > { %v1848_v47 = vsel %vm1837_vm13, nan, %v1847_v17  ;;  %v1704_v1 = vshll.u32 %v1703_v16, 30  ;;  %v1142_v22 = vshrl.u32 %v2544_v62, %v1136_v37  ;;  %v1134_v28 = vshrl.u32 %v1133_v58, 5 }
 0x202   : > { %2070 = vst [vmem:[%s2978_s20 + $0x68] sm:$0xff] %v1848_v47  ;;  %v892_v53 = vmul.f32 %v891_v34, %v889_v20  ;;  %v1138_v63 = vshll.u32 %v2542_v56, %v1135_v27  ;;  %v1145_v10 = vshrl.u32 %v2545_v0, %v1136_v37  ;;  %v1141_v48 = vshll.u32 %v2543_v60, %v1135_v27 }
 0x203   : > { %v3564_v3 = vsub.s32 %v1701_v49, %v1704_v1  ;;  %v1144_v54 = vshll.u32 %v2544_v62, %v1135_v27  ;;  %v1148_v45 = vshrl.u32 %v2546_v2, %v1136_v37  ;;  %v1147_v5 = vshll.u32 %v2545_v0, %v1135_v27 }
 0x204   : > { %v893_v52 = vxor.u32 2147483648, %v892_v53  ;;  %v1140_v55 = vor.u32 %v1139_v36, %v1138_v63  ;;  %v1151_v32 = vshrl.u32 %v2547_v9, %v1136_v37  ;;  %vm1643_vm3 = vcmp.lt.s32.totalorder %v3410_v7, 0 }
 0x205   : > { %v1707_v43 = vsub.s32 0, %v3564_v3  ;;  %v1143_v18 = vor.u32 %v1142_v22, %v1141_v48  ;;  %v1146_v59 = vor.u32 %v1145_v10, %v1144_v54  ;;  %v1150_v35 = vshll.u32 %v2546_v2, %v1135_v27 }
 0x206   : > { %v894_v13 = vsel %vm811_vm6, %v893_v52, %v892_v53  ;;  %v1149_v33 = vor.u32 %v1148_v45, %v1147_v5  ;;  %v1169_v15 = vshll.u32 %v1129_v4, 8  ;;  %v1957_v57 = vshrl.u32 %v1956_v38, 23 }
 0x207   : > { %v897_v14 = vsel %vm3521_vm10, %v3338_v23, %v894_v13  ;;  %v2222_v61 = vmin.u32 %v1707_v43, %v3564_v3  ;;  %v1137_v58 = vshrl.u32 %v2542_v56, %v1136_v37  ;;  %v1152_v25 = vor.u32 %v1151_v32, %v1150_v35 }
 0x208   : > { %2454 = vcosq.f32 %v897_v14  ;;  %v1727_v19 = vsub.s32 4, %v1703_v16  ;;  %vm1153_vm4 = vcmp.lt.s32.totalorder %v1134_v28, 1  ;;  %vm1156_vm5 = vcmp.lt.s32.totalorder %v1134_v28, 4 }
 0x209   : > { %2456 = vsinq.f32 %v897_v14  ;;  %v1709_v49 = vclz %v2222_v61  ;;  %v1158_v27 = vsel %vm1156_vm5, %v1146_v59, 2102212464  ;;  %v1161_v12 = vsel %vm1153_vm4, %v1140_v55, %v1143_v18 }
 0x20a   : > { %vm1154_vm6 = vcmp.lt.s32.totalorder %v1134_v28, 2  ;;  %vm1155_vm7 = vcmp.lt.s32.totalorder %v1134_v28, 3  ;;  %v1162_v41 = vsel %vm1156_vm5, %v1149_v33, 920167782  ;;  %v1165_v50 = vsel %vm1153_vm4, %v1143_v18, %v1146_v59 }
 0x20b   : > { %v2223_v51 = vadd.s32 4294967294, %v1709_v49  ;;  %v1157_v8 = vsel %vm1153_vm4, %v1137_v58, %v1140_v55  ;;  %v1163_v44 = vsel %vm1155_vm7, %v1146_v59, %v1162_v41  ;;  %v1166_v29 = vsel %vm1156_vm5, %v1152_v25, 1326507024 }
 0x20c   : > { %v1159_v39 = vsel %vm1155_vm7, %v1143_v18, %v1158_v27  ;;  %v1164_v37 = vsel %vm1154_vm6, %v1161_v12, %v1163_v44  ;;  %v1167_v31 = vsel %vm1155_vm7, %v1149_v33, %v1166_v29  ;;  %v2233_v4 = vadd.s32 4294967169, %v1957_v57 }
 0x20d   : > { %vm2224_vm8 = vcmp.lt.s32.totalorder %v2223_v51, 0  ;;  %v1168_v30 = vsel %vm1154_vm6, %v1165_v50, %v1167_v31  ;;  %v3583_v38 = vmul.u32.u64.low %v1169_v15, %v1164_v37  ;;  %v3584_v17 = vmul.u32.u64.high %v1169_v15, %v1164_v37, %v3583_v38 }
 0x20e   : > { %v1712_v20 = vsel %vm2224_vm8, 0, %v2223_v51  ;;  %v1728_v34 = vsel %vm1643_vm3, %v1727_v19, %v1703_v16  ;;  %v3589_v36 = vmul.u32.u64.low %v1169_v15, %v1168_v30  ;;  %v3590_v47 = vmul.u32.u64.high %v1169_v15, %v1168_v30, %v3589_v36 }
 0x20f   : > { %v1713_v1 = vsub.s32 32, %v1712_v20  ;;  %v1717_v22 = vsub.s32 4294967266, %v1712_v20  ;;  %v1160_v53 = vsel %vm1154_vm6, %v1157_v8, %v1159_v39  ;;  %v1963_v63 = vadd.s32 1, %v2233_v4 }
 0x210   : > { %v903_v10 = vand.u32 3, %v3548_v26  ;;  %vm3596_vm9 = vcmp.le.f32.partialorder %v1641_v40, 0.7853982  ;;  %v1714_v54 = vshll.u32 %v3564_v3, %v1712_v20  ;;  %v1179_v52 = vadd.s32 1, %v3584_v17 }
 0x211   : > { %v1715_v16 = vshrl.u32 %v3558_v24, %v1713_v1  ;;  %v1718_v45 = vadd.s32 127, %v1717_v22  ;;  %vm1964_vm11 = vcmp.gt.s32.totalorder %v1963_v63, 0  ;;  %v1730_v28 = vsel %vm3596_vm9, 0, %v1728_v34  ;;  %v344_v22 = vpop.f32.mrf.mxu0 }
 0x212   : > { %v1176_v55 = vmul.u32 %v1169_v15, %v1160_v53  ;;  %vm1178_vm10 = vc.u32 %v3590_v47, %v3583_v38  ;;  %v1965_v26 = vsel %vm1964_vm11, %v1963_v63, 0  ;;  %v1960_v3 = vand.u32 8388607, %v1953_v42 }
 0x213   : > { %v1716_v40 = vor.u32 %v1715_v16, %v1714_v54  ;;  %v1719_v5 = vshll.u32 %v1718_v45, 23  ;;  %v1180_v32 = vsel %vm1178_vm10, %v1179_v52, %v3584_v17  ;;  %vm901_vm12 = vweird.f32 %v3338_v23 }
 0x214   : > { %v1181_v24 = vadd.s32 %v1180_v32, %v1176_v55  ;;  %v1967_v43 = vand.u32 31, %v1965_v26  ;;  %vm904_vm13 = vcmp.lt.s32.totalorder %v903_v10, 2  ;;  %vm905_vm14 = vcmp.eq.s32.totalorder %v903_v10, 0 }
 0x215   : > { %v2455_v18 = vpop.eup %2454  ;;  %vm908_vm15 = vcmp.eq.s32.totalorder %v903_v10, 2  ;;  %v1720_v59 = vor.u32 4788187, %v1719_v5  ;;  %v1734_v33 = vadd.s32 3, %v1730_v28  ;;  %v1723_v58 = vcvt.s32.f32 %v1716_v40 }
 0x216   : > { %v2457_v35 = vpop.eup %2456  ;;  %v909_v13 = vxor.u32 2147483648, %v2455_v18  ;;  %v1182_v15 = vadd.s32 536870912, %v1181_v24  ;;  %v1968_v57 = vsub.s32 32, %v1967_v43  ;;  %v1961_v25 = vor.u32 8388608, %v1960_v3 }
 0x217   : > { %v906_v14 = vxor.u32 2147483648, %v2457_v35  ;;  %v1721_v61 = vand.u32 2147483647, %v1720_v59  ;;  %v1970_v27 = vshll.u32 %v2542_v56, %v1967_v43  ;;  %v1966_v39 = vshrl.u32 %v1965_v26, 5 }
 0x218   : > { %v910_v19 = vsel %vm908_vm15, %v909_v13, %v2457_v35  ;;  %v3611_v49 = vshrl.u32 %v1182_v15, 30  ;;  %v1971_v12 = vshrl.u32 %v2543_v60, %v1968_v57  ;;  %v1974_v51 = vshrl.u32 %v2544_v62, %v1968_v57 }
 0x219   : > { %v907_v41 = vsel %vm905_vm14, %v2455_v18, %v906_v14  ;;  %v1724_v50 = vmul.f32 %v1723_v58, %v1721_v61  ;;  %v1977_v8 = vshrl.u32 %v2545_v0, %v1968_v57  ;;  %v1973_v37 = vshll.u32 %v2543_v60, %v1967_v43  ;;  %v384_v58 = vpop.f32.mrf.mxu1 }
 0x21a   : > { %v911_v44 = vsel %vm904_vm13, %v907_v41, %v910_v19  ;;  %v1184_v29 = vshll.u32 %v3611_v49, 30  ;;  %v1972_v30 = vor.u32 %v1971_v12, %v1970_v27  ;;  %v1976_v17 = vshll.u32 %v2544_v62, %v1967_v43 }
 0x21b   : > { %v912_v31 = vsel %vm901_vm12, nan, %v911_v44  ;;  %v1725_v4 = vxor.u32 2147483648, %v1724_v50  ;;  %v1975_v34 = vor.u32 %v1974_v51, %v1973_v37  ;;  %v1979_v36 = vshll.u32 %v2545_v0, %v1967_v43 }
 0x21c   : > { %2061 = vst [vmem:[%s2978_s20 + $0x20] sm:$0xff] %v912_v31  ;;  %v3625_v20 = vsub.s32 %v1181_v24, %v1184_v29  ;;  %v1980_v1 = vshrl.u32 %v2546_v2, %v1968_v57  ;;  %v1978_v63 = vor.u32 %v1977_v8, %v1976_v17  ;;  %v1982_v23 = vshll.u32 %v2546_v2, %v1967_v43 }
 0x21d   : > { %v1726_v53 = vsel %vm1643_vm3, %v1725_v4, %v1724_v50  ;;  %v1983_v10 = vshrl.u32 %v2547_v9, %v1968_v57  ;;  %v3636_v16 = vand.u32 3, %v1734_v33  ;;  %vm1985_vm0 = vcmp.lt.s32.totalorder %v1966_v39, 1 }
 0x21e   : > { %v1729_v54 = vsel %vm3596_vm9, %v3410_v7, %v1726_v53  ;;  %v1187_v45 = vsub.s32 0, %v3625_v20  ;;  %v1981_v52 = vor.u32 %v1980_v1, %v1979_v36  ;;  %v3640_v55 = vadd.f32 %v3470_v46, %v344_v22 }
 0x21f   : > { %2458 = vcosq.f32 %v1729_v54  ;;  %v1984_v28 = vor.u32 %v1983_v10, %v1982_v23  ;;  %v1969_v40 = vshrl.u32 %v2542_v56, %v1968_v57  ;;  %vm1988_vm1 = vcmp.lt.s32.totalorder %v1966_v39, 4 }
 0x220   : > { %2460 = vsinq.f32 %v1729_v54  ;;  %v2202_v26 = vmin.u32 %v1187_v45, %v3625_v20  ;;  %v1990_v5 = vsel %vm1988_vm1, %v1978_v63, 2102212464  ;;  %v1993_v48 = vsel %vm1985_vm0, %v1972_v30, %v1975_v34 }
 0x221   : > { %v1994_v32 = vsel %vm1988_vm1, %v1981_v52, 920167782  ;;  %v2001_v3 = vshll.u32 %v1961_v25, 8  ;;  %vm1987_vm2 = vcmp.lt.s32.totalorder %v1966_v39, 3  ;;  %v1989_v43 = vsel %vm1985_vm0, %v1969_v40, %v1972_v30 }
 0x222   : > { %v1189_v24 = vclz %v2202_v26  ;;  %v1997_v18 = vsel %vm1985_vm0, %v1975_v34, %v1978_v63  ;;  %vm1986_vm3 = vcmp.lt.s32.totalorder %v1966_v39, 2  ;;  %v1991_v59 = vsel %vm1987_vm2, %v1975_v34, %v1990_v5 }
 0x223   : > { %v1995_v35 = vsel %vm1987_vm2, %v1978_v63, %v1994_v32  ;;  %v1998_v13 = vsel %vm1988_vm1, %v1984_v28, 1326507024  ;;  %v1207_v15 = vsub.s32 4, %v3611_v49  ;;  %v1992_v57 = vsel %vm1986_vm3, %v1989_v43, %v1991_v59 }
 0x224   : > { %v2203_v33 = vadd.s32 4294967294, %v1189_v24  ;;  %v1996_v14 = vsel %vm1986_vm3, %v1993_v48, %v1995_v35  ;;  %v1999_v61 = vsel %vm1987_vm2, %v1981_v52, %v1998_v13  ;;  %v1020_v50 = vand.u32 2139095040, %v3640_v55 }
 0x225   : > { %v2000_v19 = vsel %vm1986_vm3, %v1997_v18, %v1999_v61  ;;  %v3645_v27 = vmul.u32.u64.low %v2001_v3, %v1996_v14  ;;  %v3646_v12 = vmul.u32.u64.high %v2001_v3, %v1996_v14, %v3645_v27  ;;  %vm1123_vm5 = vcmp.lt.s32.totalorder %v3473_v21, 0 }
 0x226   : > { %vm2204_vm4 = vcmp.lt.s32.totalorder %v2203_v33, 0  ;;  %v3649_v25 = vmul.u32.u64.low %v2001_v3, %v2000_v19  ;;  %v3650_v41 = vmul.u32.u64.high %v2001_v3, %v2000_v19, %v3649_v25  ;;  %v1177_v51 = vadd.s32 %v3583_v38, %v3590_v47 }
 0x227   : > { %v1192_v8 = vsel %vm2204_vm4, 0, %v2203_v33  ;;  %v3657_v44 = vadd.f32 %v3470_v46, %v384_v58  ;;  %v1208_v37 = vsel %vm1123_vm5, %v1207_v15, %v3611_v49  ;;  %v1021_v31 = vshrl.u32 %v1020_v50, 23 }
 0x228   : > { %v1193_v29 = vsub.s32 32, %v1192_v8  ;;  %v1197_v39 = vsub.s32 4294967266, %v1192_v8  ;;  %vm1736_vm6 = vcmp.lt.s32.totalorder %v3636_v16, 2  ;;  %vm3665_vm7 = vcmp.le.f32.partialorder %v1121_v6, 0.7853982 }
 0x229   : > { %v2008_v38 = vmul.u32 %v2001_v3, %v1992_v57  ;;  %v2011_v47 = vadd.s32 1, %v3646_v12  ;;  %v1194_v46 = vshll.u32 %v3625_v20, %v1192_v8  ;;  %vm2010_vm8 = vc.u32 %v3650_v41, %v3645_v27 }
 0x22a   : > { %v1195_v30 = vshrl.u32 %v1177_v51, %v1193_v29  ;;  %v1198_v17 = vadd.s32 127, %v1197_v39  ;;  %v1210_v49 = vsel %vm3665_vm7, 0, %v1208_v37  ;;  %v2197_v36 = vadd.s32 4294967169, %v1021_v31 }
 0x22b   : > { %v2012_v34 = vsel %vm2010_vm8, %v2011_v47, %v3646_v12  ;;  %v1852_v6 = vand.u32 2139095040, %v3657_v44  ;;  %vm1737_vm9 = vcmp.eq.s32.totalorder %v3636_v16, 0  ;;  %vm1740_vm11 = vcmp.eq.s32.totalorder %v3636_v16, 2 }
 0x22c   : > { %v2459_v1 = vpop.eup %2458  ;;  %v1196_v22 = vor.u32 %v1195_v30, %v1194_v46  ;;  %v1199_v53 = vshll.u32 %v1198_v17, 23  ;;  %v2013_v63 = vadd.s32 %v2012_v34, %v2008_v38  ;;  %v1017_v10 = vand.u32 2147483647, %v3640_v55 }
 0x22d   : > { %v2461_v20 = vpop.eup %2460  ;;  %v1741_v23 = vxor.u32 2147483648, %v2459_v1  ;;  %v1027_v54 = vadd.s32 1, %v2197_v36  ;;  %v1214_v28 = vadd.s32 3, %v1210_v49  ;;  %v1853_v48 = vshrl.u32 %v1852_v6, 23 }
 0x22e   : > { %v1738_v45 = vxor.u32 2147483648, %v2461_v20  ;;  %v1200_v52 = vor.u32 4788187, %v1199_v53  ;;  %v2014_v26 = vadd.s32 536870912, %v2013_v63  ;;  %v1203_v5 = vcvt.s32.f32 %v1196_v22 }
 0x22f   : > { %v1742_v40 = vsel %vm1740_vm11, %v1741_v23, %v2461_v20  ;;  %vm1028_vm10 = vcmp.gt.s32.totalorder %v1027_v54, 0  ;;  %vm1733_vm12 = vweird.f32 %v3410_v7  ;;  %v3689_v15 = vand.u32 3, %v1214_v28 }
 0x230   : > { %v1739_v32 = vsel %vm1737_vm9, %v2459_v1, %v1738_v45  ;;  %v1201_v3 = vand.u32 2147483647, %v1200_v52  ;;  %v3682_v24 = vshrl.u32 %v2014_v26, 30  ;;  %v1029_v43 = vsel %vm1028_vm10, %v1027_v54, 0 }
 0x231   : > { %v1743_v18 = vsel %vm1736_vm6, %v1739_v32, %v1742_v40  ;;  %v1031_v59 = vand.u32 31, %v1029_v43  ;;  %v1024_v14 = vand.u32 8388607, %v1017_v10  ;;  %v1030_v19 = vshrl.u32 %v1029_v43, 5 }
 0x232   : > { %v1744_v35 = vsel %vm1733_vm12, nan, %v1743_v18  ;;  %v1204_v13 = vmul.f32 %v1203_v5, %v1201_v3  ;;  %v2016_v33 = vshll.u32 %v3682_v24, 30  ;;  %v2229_v7 = vadd.s32 4294967169, %v1853_v48 }
 0x233   : > { %2069 = vst [vmem:[%s2978_s20 + $0x60] sm:$0xff] %v1744_v35  ;;  %v1032_v61 = vsub.s32 32, %v1031_v59  ;;  %v1034_v16 = vshll.u32 %v2542_v56, %v1031_v59  ;;  %v1037_v25 = vshll.u32 %v2543_v60, %v1031_v59  ;;  %v1040_v29 = vshll.u32 %v2544_v62, %v1031_v59 }
 0x234   : > { %v1205_v58 = vxor.u32 2147483648, %v1204_v13  ;;  %v3693_v57 = vsub.s32 %v2013_v63, %v2016_v33  ;;  %v1043_v38 = vshll.u32 %v2545_v0, %v1031_v59  ;;  %v1046_v34 = vshll.u32 %v2546_v2, %v1031_v59 }
 0x235   : > { %v1035_v12 = vshrl.u32 %v2543_v60, %v1032_v61  ;;  %v1038_v50 = vshrl.u32 %v2544_v62, %v1032_v61  ;;  %v1041_v39 = vshrl.u32 %v2545_v0, %v1032_v61  ;;  %v1044_v47 = vshrl.u32 %v2546_v2, %v1032_v61 }
 0x236   : > { %v1206_v51 = vsel %vm1123_vm5, %v1205_v58, %v1204_v13  ;;  %v2019_v8 = vsub.s32 0, %v3693_v57  ;;  %v1047_v36 = vshrl.u32 %v2547_v9, %v1032_v61  ;;  %v2009_v4 = vadd.s32 %v3645_v27, %v3650_v41 }
 0x237   : > { %v1209_v37 = vsel %vm3665_vm7, %v3473_v21, %v1206_v51  ;;  %v1036_v31 = vor.u32 %v1035_v12, %v1034_v16  ;;  %v1039_v30 = vor.u32 %v1038_v50, %v1037_v25  ;;  %v1042_v17 = vor.u32 %v1041_v39, %v1040_v29 }
 0x238   : > { %2462 = vcosq.f32 %v1209_v37  ;;  %v2234_v46 = vmin.u32 %v2019_v8, %v3693_v57  ;;  %v1045_v49 = vor.u32 %v1044_v47, %v1043_v38  ;;  %v1025_v1 = vor.u32 8388608, %v1024_v14 }
 0x239   : > { %2464 = vsinq.f32 %v1209_v37  ;;  %v1849_v22 = vand.u32 2147483647, %v3657_v44  ;;  %v1033_v53 = vshrl.u32 %v2542_v56, %v1032_v61  ;;  %v1048_v63 = vor.u32 %v1047_v36, %v1046_v34 }
 0x23a   : > { %v2021_v6 = vclz %v2234_v46  ;;  %vm1049_vm13 = vcmp.lt.s32.totalorder %v1030_v19, 1  ;;  %v1859_v20 = vadd.s32 1, %v2229_v7  ;;  %vm1051_vm14 = vcmp.lt.s32.totalorder %v1030_v19, 3 }
 0x23b   : > { %vm1052_vm15 = vcmp.lt.s32.totalorder %v1030_v19, 4  ;;  %v1057_v54 = vsel %vm1049_vm13, %v1036_v31, %v1039_v30  ;;  %v1061_v28 = vsel %vm1049_vm13, %v1039_v30, %v1042_v17  ;;  %vm1955_vm0 = vcmp.lt.s32.totalorder %v3530_v11, 0 }
 0x23c   : > { %v2235_v23 = vadd.s32 4294967294, %v2021_v6  ;;  %v1054_v45 = vsel %vm1052_vm15, %v1042_v17, 2102212464  ;;  %v1058_v52 = vsel %vm1052_vm15, %v1045_v49, 920167782  ;;  %vm1050_vm2 = vcmp.lt.s32.totalorder %v1030_v19, 2 }
 0x23d   : > { %v1062_v26 = vsel %vm1052_vm15, %v1048_v63, 1326507024  ;;  %v1059_v27 = vsel %vm1051_vm14, %v1042_v17, %v1058_v52  ;;  %v1065_v32 = vshll.u32 %v1025_v1, 8  ;;  %v1053_v18 = vsel %vm1049_vm13, %v1033_v53, %v1036_v31 }
 0x23e   : > { %vm2236_vm1 = vcmp.lt.s32.totalorder %v2235_v23, 0  ;;  %v1063_v41 = vsel %vm1051_vm14, %v1045_v49, %v1062_v26  ;;  %v1060_v5 = vsel %vm1050_vm2, %v1057_v54, %v1059_v27  ;;  %v1055_v59 = vsel %vm1051_vm14, %v1039_v30, %v1054_v45 }
 0x23f   : > { %v2024_v40 = vsel %vm2236_vm1, 0, %v2235_v23  ;;  %v1064_v48 = vsel %vm1050_vm2, %v1061_v28, %v1063_v41  ;;  %v3728_v33 = vmul.u32.u64.low %v1065_v32, %v1060_v5  ;;  %v3729_v14 = vmul.u32.u64.high %v1065_v32, %v1060_v5, %v3728_v33 }
 0x240   : > { %v2025_v3 = vsub.s32 32, %v2024_v40  ;;  %v2029_v43 = vsub.s32 4294967266, %v2024_v40  ;;  %v3725_v35 = vmul.u32.u64.low %v1065_v32, %v1064_v48  ;;  %v3726_v13 = vmul.u32.u64.high %v1065_v32, %v1064_v48, %v3725_v35 }
 0x241   : > { %vm1213_vm3 = vweird.f32 %v3473_v21  ;;  %v2026_v61 = vshll.u32 %v3693_v57, %v2024_v40  ;;  %vm1860_vm4 = vcmp.gt.s32.totalorder %v1859_v20, 0  ;;  %v2039_v16 = vsub.s32 4, %v3682_v24 }
 0x242   : > { %v2027_v58 = vshrl.u32 %v2009_v4, %v2025_v3  ;;  %v2030_v7 = vadd.s32 127, %v2029_v43  ;;  %v1056_v12 = vsel %vm1050_vm2, %v1053_v18, %v1055_v59  ;;  %v1856_v25 = vand.u32 8388607, %v1849_v22 }
 0x243   : > { %v1861_v50 = vsel %vm1860_vm4, %v1859_v20, 0  ;;  %vm1216_vm5 = vcmp.lt.s32.totalorder %v3689_v15, 2  ;;  %vm1217_vm6 = vcmp.eq.s32.totalorder %v3689_v15, 0  ;;  %vm1220_vm7 = vcmp.eq.s32.totalorder %v3689_v15, 2 }
 0x244   : > { %v2028_v51 = vor.u32 %v2027_v58, %v2026_v61  ;;  %v2031_v8 = vshll.u32 %v2030_v7, 23  ;;  %v1863_v29 = vand.u32 31, %v1861_v50  ;;  %vm1074_vm8 = vc.u32 %v3726_v13, %v3728_v33 }
 0x245   : > { %v2463_v39 = vpop.eup %2462  ;;  %v1075_v57 = vadd.s32 1, %v3729_v14  ;;  %vm3746_vm9 = vcmp.le.f32.partialorder %v1953_v42, 0.7853982  ;;  %v1072_v47 = vmul.u32 %v1065_v32, %v1056_v12  ;;  %v2040_v17 = vsel %vm1955_vm0, %v2039_v16, %v3682_v24 }
 0x246   : > { %v2465_v19 = vpop.eup %2464  ;;  %v1221_v37 = vxor.u32 2147483648, %v2463_v39  ;;  %v2032_v38 = vor.u32 4788187, %v2031_v8  ;;  %v1864_v46 = vsub.s32 32, %v1863_v29  ;;  %v1857_v34 = vor.u32 8388608, %v1856_v25 }
 0x247   : > { %v1218_v30 = vxor.u32 2147483648, %v2465_v19  ;;  %v1076_v49 = vsel %vm1074_vm8, %v1075_v57, %v3729_v14  ;;  %v2035_v6 = vcvt.s32.f32 %v2028_v51  ;;  %v1862_v53 = vshrl.u32 %v1861_v50, 5 }
 0x248   : > { %v1222_v36 = vsel %vm1220_vm7, %v1221_v37, %v2465_v19  ;;  %v2033_v4 = vand.u32 2147483647, %v2032_v38  ;;  %v1077_v1 = vadd.s32 %v1076_v49, %v1072_v47  ;;  %v1867_v63 = vshrl.u32 %v2543_v60, %v1864_v46 }
 0x249   : > { %v1219_v42 = vsel %vm1217_vm6, %v2463_v39, %v1218_v30  ;;  %v1870_v20 = vshrl.u32 %v2544_v62, %v1864_v46  ;;  %v1873_v45 = vshrl.u32 %v2545_v0, %v1864_v46  ;;  %v1866_v28 = vshll.u32 %v2542_v56, %v1863_v29 }
 0x24a   : > { %v1223_v23 = vsel %vm1216_vm5, %v1219_v42, %v1222_v36  ;;  %v2036_v24 = vmul.f32 %v2035_v6, %v2033_v4  ;;  %v1078_v54 = vadd.s32 536870912, %v1077_v1  ;;  %v1869_v26 = vshll.u32 %v2543_v60, %v1863_v29 }
 0x24b   : > { %v1224_v52 = vsel %vm1213_vm3, nan, %v1223_v23  ;;  %v1872_v27 = vshll.u32 %v2544_v62, %v1863_v29  ;;  %v1875_v15 = vshll.u32 %v2545_v0, %v1863_v29  ;;  %v1876_v5 = vshrl.u32 %v2546_v2, %v1864_v46 }
 0x24c   : > { %2064 = vst [vmem:[%s2978_s20 + $0x38] sm:$0xff] %v1224_v52  ;;  %v2037_v41 = vxor.u32 2147483648, %v2036_v24  ;;  %v3767_v40 = vshrl.u32 %v1078_v54, 30  ;;  %v1868_v48 = vor.u32 %v1867_v63, %v1866_v28  ;;  %v1871_v32 = vor.u32 %v1870_v20, %v1869_v26 }
 0x24d   : > { %v1878_v3 = vshll.u32 %v2546_v2, %v1863_v29  ;;  %v1879_v21 = vshrl.u32 %v2547_v9, %v1864_v46  ;;  %v1874_v62 = vor.u32 %v1873_v45, %v1872_v27  ;;  %v1877_v18 = vor.u32 %v1876_v5, %v1875_v15 }
 0x24e   : > { %v2038_v43 = vsel %vm1955_vm0, %v2037_v41, %v2036_v24  ;;  %v1080_v60 = vshll.u32 %v3767_v40, 30  ;;  %v2042_v0 = vsel %vm3746_vm9, 0, %v2040_v17  ;;  %vm1881_vm11 = vcmp.lt.s32.totalorder %v1862_v53, 1 }
 0x24f   : > { %v2041_v59 = vsel %vm3746_vm9, %v3530_v11, %v2038_v43  ;;  %v1880_v35 = vor.u32 %v1879_v21, %v1878_v3  ;;  %v1897_v2 = vshll.u32 %v1857_v34, 8  ;;  %v1865_v9 = vshrl.u32 %v2542_v56, %v1864_v46 }
 0x250   : > { %2466 = vcosq.f32 %v2041_v59  ;;  %v1081_v14 = vsub.s32 %v1077_v1, %v1080_v60  ;;  %vm1884_vm10 = vcmp.lt.s32.totalorder %v1862_v53, 4  ;;  %v1889_v61 = vsel %vm1881_vm11, %v1868_v48, %v1871_v32 }
 0x251   : > { %2468 = vsinq.f32 %v2041_v59  ;;  %vm1883_vm12 = vcmp.lt.s32.totalorder %v1862_v53, 3  ;;  %v1886_v7 = vsel %vm1884_vm10, %v1874_v62, 2102212464  ;;  %v1890_v16 = vsel %vm1884_vm10, %v1877_v18, 920167782 }
 0x252   : > { %v1083_v58 = vsub.s32 0, %v1081_v14  ;;  %vm1882_vm13 = vcmp.lt.s32.totalorder %v1862_v53, 2  ;;  %v1891_v12 = vsel %vm1883_vm12, %v1874_v62, %v1890_v16  ;;  %v1893_v25 = vsel %vm1881_vm11, %v1871_v32, %v1874_v62 }
 0x253   : > { %v1894_v50 = vsel %vm1884_vm10, %v1880_v35, 1326507024  ;;  %v1885_v8 = vsel %vm1881_vm11, %v1865_v9, %v1868_v48  ;;  %v1892_v29 = vsel %vm1882_vm13, %v1889_v61, %v1891_v12  ;;  %v1887_v57 = vsel %vm1883_vm12, %v1871_v32, %v1886_v7 }
 0x254   : > { %v2198_v51 = vmin.u32 %v1083_v58, %v1081_v14  ;;  %v1895_v39 = vsel %vm1883_vm12, %v1877_v18, %v1894_v50  ;;  %v3784_v37 = vmul.u32.u64.low %v1897_v2, %v1892_v29  ;;  %v3785_v56 = vmul.u32.u64.high %v1897_v2, %v1892_v29, %v3784_v37 }
 0x255   : > { %v1896_v19 = vsel %vm1882_vm13, %v1893_v25, %v1895_v39  ;;  %v2046_v38 = vadd.s32 3, %v2042_v0  ;;  %v1888_v17 = vsel %vm1882_vm13, %v1885_v8, %v1887_v57  ;;  %v1073_v6 = vadd.s32 %v3728_v33, %v3726_v13 }
 0x256   : > { %v1085_v31 = vclz %v2198_v51  ;;  %v3787_v47 = vmul.u32.u64.low %v1897_v2, %v1896_v19  ;;  %v3788_v46 = vmul.u32.u64.high %v1897_v2, %v1896_v19, %v3787_v47  ;;  %v1907_v49 = vadd.s32 1, %v3785_v56 }
 0x257   : > { %v2047_v34 = vand.u32 3, %v2046_v38  ;;  %v1904_v4 = vmul.u32 %v1897_v2, %v1888_v17  ;;  %vm2045_vm3 = vweird.f32 %v3530_v11  ;;  %vm1019_vm4 = vcmp.lt.s32.totalorder %v3640_v55, 0 }
 0x258   : > { %v2199_v30 = vadd.s32 4294967294, %v1085_v31  ;;  %vm1906_vm15 = vc.u32 %v3788_v46, %v3784_v37  ;;  %v1103_v0 = vsub.s32 4, %v3767_v40  ;;  %vm1018_vm5 = vcmp.le.f32.partialorder %v1017_v10, 0.7853982 }
 0x259   : > { %v1908_v63 = vsel %vm1906_vm15, %v1907_v49, %v3785_v56  ;;  %vm2052_vm0 = vcmp.eq.s32.totalorder %v2047_v34, 2  ;;  %vm2049_vm1 = vcmp.eq.s32.totalorder %v2047_v34, 0  ;;  %vm2048_vm2 = vcmp.lt.s32.totalorder %v2047_v34, 2 }
 0x25a   : > { %vm2200_vm14 = vcmp.lt.s32.totalorder %v2199_v30, 0  ;;  %v1909_v23 = vadd.s32 %v1908_v63, %v1904_v4  ;;  %v1104_v9 = vsel %vm1019_vm4, %v1103_v0, %v3767_v40  ;;  %v1905_v16 = vadd.s32 %v3784_v37, %v3788_v46 }
 0x25b   : > { %v1088_v36 = vsel %vm2200_vm14, 0, %v2199_v30  ;;  %v1106_v58 = vsel %vm1018_vm5, 0, %v1104_v9  ;;  %vm1109_vm11 = vweird.f32 %v3640_v55  ;;  %vm1851_vm10 = vcmp.lt.s32.totalorder %v3657_v44, 0 }
 0x25c   : > { %v1089_v1 = vsub.s32 32, %v1088_v36  ;;  %v1093_v42 = vsub.s32 4294967266, %v1088_v36  ;;  %v1090_v54 = vshll.u32 %v1081_v14, %v1088_v36  ;;  %v1910_v26 = vadd.s32 536870912, %v1909_v23 }
 0x25d   : > { %v2467_v20 = vpop.eup %2466  ;;  %v1110_v50 = vadd.s32 3, %v1106_v58  ;;  %vm1850_vm12 = vcmp.le.f32.partialorder %v1849_v22, 0.7853982 }
 0x25e   : > { %v2469_v24 = vpop.eup %2468  ;;  %v2053_v53 = vxor.u32 2147483648, %v2467_v20  ;;  %v1091_v45 = vshrl.u32 %v1073_v6, %v1089_v1  ;;  %v1094_v52 = vadd.s32 127, %v1093_v42  ;;  %v1911_v33 = vshrl.u32 %v1910_v26, 30 }
 0x25f   : > { %v2050_v28 = vxor.u32 2147483648, %v2469_v24  ;;  %v1111_v57 = vand.u32 3, %v1110_v50 }
 0x260   : > { %v2054_v27 = vsel %vm2052_vm0, %v2053_v53, %v2469_v24  ;;  %v1092_v41 = vor.u32 %v1091_v45, %v1090_v54  ;;  %v1095_v15 = vshll.u32 %v1094_v52, 23  ;;  %v1912_v3 = vshll.u32 %v1911_v33, 30 }
 0x261   : > { %v2051_v13 = vsel %vm2049_vm1, %v2467_v20, %v2050_v28  ;;  %vm1116_vm7 = vcmp.eq.s32.totalorder %v1111_v57, 2  ;;  %vm1113_vm8 = vcmp.eq.s32.totalorder %v1111_v57, 0  ;;  %vm1112_vm9 = vcmp.lt.s32.totalorder %v1111_v57, 2 }
 0x262   : > { %v2055_v5 = vsel %vm2048_vm2, %v2051_v13, %v2054_v27  ;;  %v1096_v48 = vor.u32 4788187, %v1095_v15  ;;  %v1099_v43 = vcvt.s32.f32 %v1092_v41  ;;  %v1913_v60 = vsub.s32 %v1909_v23, %v1912_v3 }
 0x263   : > { %v2056_v32 = vsel %vm2045_vm3, nan, %v2055_v5  ;;  %v1935_v36 = vsub.s32 4, %v1911_v33  ;;  %vm1941_vm0 = vweird.f32 %v3657_v44 }
 0x264   : > { %2072 = vst [vmem:[%s2978_s20 + $0x78] sm:$0xff] %v2056_v32  ;;  %v1097_v21 = vand.u32 2147483647, %v1096_v48  ;;  %v1915_v18 = vsub.s32 0, %v1913_v60 }
 0x265   : > { %v1936_v42 = vsel %vm1851_vm10, %v1935_v36, %v1911_v33 }
 0x266   : > { %v1100_v62 = vmul.f32 %v1099_v43, %v1097_v21  ;;  %v2230_v35 = vmin.u32 %v1915_v18, %v1913_v60  ;;  %v1938_v63 = vsel %vm1850_vm12, 0, %v1936_v42 }
 0x267   : > { %v1942_v20 = vadd.s32 3, %v1938_v63 }
 0x268   : > { %v1101_v59 = vxor.u32 2147483648, %v1100_v62  ;;  %v1917_v2 = vclz %v2230_v35 }
 0x26a   : > { %v1102_v11 = vsel %vm1019_vm4, %v1101_v59, %v1100_v62  ;;  %v2231_v61 = vadd.s32 4294967294, %v1917_v2 }
 0x26b   : > { %v1105_v14 = vsel %vm1018_vm5, %v3640_v55, %v1102_v11  ;;  %v1943_v55 = vand.u32 3, %v1942_v20 }
 0x26c   : > { %2470 = vcosq.f32 %v1105_v14  ;;  %vm2232_vm6 = vcmp.lt.s32.totalorder %v2231_v61, 0 }
 0x26d   : > { %2472 = vsinq.f32 %v1105_v14  ;;  %v1920_v7 = vsel %vm2232_vm6, 0, %v2231_v61  ;;  %vm1948_vm13 = vcmp.eq.s32.totalorder %v1943_v55, 2  ;;  %vm1945_vm14 = vcmp.eq.s32.totalorder %v1943_v55, 0 }
 0x26e   : > { %v1921_v12 = vsub.s32 32, %v1920_v7  ;;  %v1925_v25 = vsub.s32 4294967266, %v1920_v7  ;;  %v1922_v51 = vshll.u32 %v1913_v60, %v1920_v7  ;;  %vm1944_vm15 = vcmp.lt.s32.totalorder %v1943_v55, 2 }
 0x270   : > { %v1923_v8 = vshrl.u32 %v1905_v16, %v1921_v12  ;;  %v1926_v10 = vadd.s32 127, %v1925_v25 }
 0x272   : > { %v1924_v29 = vor.u32 %v1923_v8, %v1922_v51  ;;  %v1927_v39 = vshll.u32 %v1926_v10, 23 }
 0x274   : > { %v1928_v19 = vor.u32 4788187, %v1927_v39  ;;  %v1931_v40 = vcvt.s32.f32 %v1924_v29 }
 0x276   : > { %v1929_v31 = vand.u32 2147483647, %v1928_v19 }
 0x278   : > { %v1932_v17 = vmul.f32 %v1931_v40, %v1929_v31 }
 0x279   : > { %v2471_v56 = vpop.eup %2470 }
 0x27a   : > { %v2473_v38 = vpop.eup %2472  ;;  %v1117_v47 = vxor.u32 2147483648, %v2471_v56  ;;  %v1933_v49 = vxor.u32 2147483648, %v1932_v17 }
 0x27b   : > { %v1114_v30 = vxor.u32 2147483648, %v2473_v38 }
 0x27c   : > { %v1118_v37 = vsel %vm1116_vm7, %v1117_v47, %v2473_v38  ;;  %v1934_v6 = vsel %vm1851_vm10, %v1933_v49, %v1932_v17 }
 0x27d   : > { %v1115_v46 = vsel %vm1113_vm8, %v2471_v56, %v1114_v30  ;;  %v1937_v1 = vsel %vm1850_vm12, %v3657_v44, %v1934_v6 }
 0x27e   : > { %v1119_v34 = vsel %vm1112_vm9, %v1115_v46, %v1118_v37  ;;  %2474 = vcosq.f32 %v1937_v1 }
 0x27f   : > { %v1120_v4 = vsel %vm1109_vm11, nan, %v1119_v34  ;;  %2476 = vsinq.f32 %v1937_v1 }
 0x280   : > { %2063 = vst [vmem:[%s2978_s20 + $0x30] sm:$0xff] %v1120_v4 }
 0x28b   : > { %v2475_v23 = vpop.eup %2474 }
 0x28c   : > { %v2477_v24 = vpop.eup %2476  ;;  %v1949_v53 = vxor.u32 2147483648, %v2475_v23 }
 0x28d   : > { %v1946_v54 = vxor.u32 2147483648, %v2477_v24 }
 0x28e   : > { %v1950_v22 = vsel %vm1948_vm13, %v1949_v53, %v2477_v24 }
 0x28f   : > { %v1947_v45 = vsel %vm1945_vm14, %v2475_v23, %v1946_v54 }
 0x290   : > { %v1951_v52 = vsel %vm1944_vm15, %v1947_v45, %v1950_v22 }
 0x291   : > { %v1952_v28 = vsel %vm1941_vm0, nan, %v1951_v52 }
 0x292   : > { %2071 = vst [vmem:[%s2978_s20 + $0x70] sm:$0xff] %v1952_v28 }
 0x293   : > { %2493 = shalt.err (!%p2490_p3)
}
 0x294   : > { %s2494_s10 = scalar_lea.hbm %s3816_s5, 2048  ;;  %s2498_s19 = scalar_lea.hbm %s3867_s3, 4096 }
 0x295   : > { %p2495_p4 = scmp.ne.s32.totalorder %s3816_s5, %s2494_s10  ;;  %p2499_p9 = scmp.lt.s32.totalorder %s3816_s5, %s3867_s3 }
 0x296   : > { %p2500_p10 = scmp.lt.s32.totalorder %s2498_s19, %s2494_s10 }
 0x297   : > { %p2496_p7 = pnand %p2495_p4, %p2609_p5 }
 0x298   : > { %p2501_p11 = por %p2500_p10, %p2499_p9 }
 0x299   : > { %p2497_p8 = pneg %p2496_p7 }
 0x29b   : > { %p2502_p12 = pnand %p2501_p11, %p2497_p8 }
 0x29d   : > { %2505 = shalt.err (!%p2502_p12)
}
 0x29e   : > { %s2549_s25 = smov 128   ;;  %s2550_s26 = smov 8  }
 0x29f   : > { %2367 = dma.vmem_to_hbm [thread:$0]  (%p2609_p5), %s3818_s29, 2048, %s3816_s5, %s3824_s16, %s2549_s25, %s2549_s25, %s2550_s26  }
 0x2a0 PF: > { %p2373_p13 = scmp.ge.s32.totalorder %s2540_s15, 2  ;;  %s2102_s27 = sand.u32 1, %s2528_s12  }
 0x2a1   : > { %s2103_s28 = scalar_lea.sflag [#allocation3], %s2102_s27 }
 0x2a2   : > { %p2370_p0 = pnand %p2373_p13, %p2613_p6 }
 0x2a4   : > { %p2371_p1 = pneg %p2370_p0 }
 0x2a6   : > { %2523 = dma.done.wait (%p2371_p1), %s2103_s28, 2048  }
 0x2a7   : > { %2525 = vsyncadd (%p2371_p1), %s2103_s28, 4294965248  ;;  %p13_p2 = scmp.ge.s32.totalorder %s2596_s18, 4   ;;  %s3898_s12 = smov %s2532_s13 }
 0x2a8   : > { %s3899_s13 = smov %s2536_s14  ;;  %s3900_s14 = smov %s2607_s21 }
 0x2a9   : > { %s3901_s15 = smov %s2596_s18  ;;  %15 = sbr.rel (!%p13_p2) target bundleno = 3 (0x3), region = 67 }
 0x2ae   :  { %2108 = vsyncpa [#allocation3], 1 }
 0x2af   :  { %2110 = vsyncpa [#allocation3 + $0x1], 1 }

// kernel: tpu_custom_call.1
= control target key start
LH: loop header
LB: loop body
LE: loop exit
PB: predicated region body
PF: predicated region fallthrough
CT: control target
= control target key end

     0   :  { %8 = vsyncpa [#allocation3], 0  ;;  %s3864_s0 = inlined_call_operand.vmem [shape: f32[256,32], index: 0, kind: input, shape index: {}]   ;;  %s3865_s1 = inlined_call_operand.vmem [shape: f32[32,128], index: 1, kind: input, shape index: {}]   ;;  %s3866_s2 = inlined_call_operand.vmem [shape: f32[1,128], index: 2, kind: input, shape index: {}]   ;;  %s3867_s3 = inlined_call_operand.hbm [shape: f32[256,128], index: 3, kind: output, shape index: {}]  }
   0x1   :  { %10 = vsyncpa [#allocation3 + $0x1], 0  ;;  %s2571_s12 = smov 0   ;;  %s2573_s13 = smov 0  }
   0x2   :  { %s2575_s14 = smov 0   ;;  %s2577_s15 = smov 0  }
   0x3 LB: > { %s2592_s16 = sadd.s32 4294967295, %s2540_s15   ;;  %s2149_s17 = sadd.s32 4294967294, %s2540_s15   ;;  %s2540_s15 = sphi %s2577_s15, %s3901_s15   ;;  %s2536_s14 = sphi %s2575_s14, %s3900_s14   ;;  %s2532_s13 = sphi %s2573_s13, %s3899_s13   ;;  %s2528_s12 = sphi %s2571_s12, %s3898_s12  }
   0x4   : > { %s2596_s18 = sadd.s32 1, %s2540_s15   ;;  %s91_s19 = sadd.s32 1, %s2536_s14 }
   0x5   : > { %s88_s20 = ssub.s32 %s2540_s15, %s2596_s18  ;;  %p101_p0 = scmp.ne.s32.totalorder %s2536_s14, %s2532_s13 }
   0x6   : > { %p89_p1 = scmp.eq.s32.totalorder %s88_s20, 0  ;;  %p102_p2 = scmp.eq.s32.totalorder %s2592_s16, 1 }
   0x7   : > { %p107_p3 = scmp.ne.s32.totalorder %s2532_s13, %s2528_s12  ;;  %p108_p4 = scmp.eq.s32.totalorder %s2149_s17, 1 }
   0x8   : > { %s2607_s21 = scalar_select %p89_p1, %s2536_s14, %s91_s19  }
   0x9   : > { %p2609_p5 = por %p102_p2, %p101_p0  ;;  %p2613_p6 = por %p108_p4, %p107_p3 }
   0xa   : > { %p2152_p7 = scmp.ge.s32.totalorder %s2540_s15, 1  ;;  %p141_p8 = scmp.lt.s32.totalorder %s2540_s15, 3 }
   0xc   : > { %p142_p9 = pnand %p2152_p7, %p141_p8 }
   0xd   : > { %s2154_s28 = sshll.u32 (!%p142_p9), %s2592_s16, 4  ;;  %s162_s17 = sand.u32 (!%p142_p9), 1, %s2532_s13  }
   0xe   : > { %145 = sbr.rel (%p142_p9) target bundleno = 672 (0x2a0), region = 32  ;;  %p166_p10 = scmp.lt.s32.totalorder (!%p142_p9), %s2154_s28, 31 }
   0xf   : > { %s2153_s19 = sshll.u32 (!%p142_p9), %s162_s17, 7  ;;  %s2548_s7 = smov (!%p142_p9), [#allocation2]  }
  0x10   : > { %s2978_s20 = scalar_lea.vmem (!%p142_p9), [#allocation2], %s2153_s19  ;;  %s2484_s8 = sshll.u32 (!%p142_p9), %s2548_s7, 4  ;;  %s2485_s8 = int_to_ptr.vmem [resolvable:$false] %s2484_s8 }
  0x11   : > { %s2087_s29 = sshll.u32 (!%p142_p9), %s2978_s20, 4  ;;  %s3818_s29 = int_to_ptr.vmem [resolvable:$true] %s2087_s29 }
  0x12   : > { %p2487_p0 = scmp.lt.s32.totalorder (!%p142_p9), %s3818_s29, %s2485_s8 }
  0x13   : > { %v191_v0 = vld [vmem:[%s3865_s1 + $0x18] sm:$0xff]  ;;  %v190_v1 = vld [vmem:[%s3865_s1 + $0x10] sm:$0xff]  ;;  %v189_v2 = vld [vmem:[%s3865_s1 + $0x8] sm:$0xff]  ;;  %s3903_s28 = smov (!%p166_p10, %s2154_s28), 31  ;;  %vm199_vm0 = vcmask 261120  }
  0x14   : > { %2263 = vmatprep.subr.mxu0 %v191_v0  ;;  %2295 = vmatprep.subr.mxu1 %v191_v0  ;;  %v188_v3 = vld [vmem:[%s3865_s1] sm:$0xff]  ;;  %s2155_s6 = sshll.u32 %s3903_s28, 3  ;;  %v2542_v56 = vmov 683565275   ;;  %v2543_v60 = vmov 2475754826  }
  0x15   : > { %2264 = vmatpush3.msra.mxu0 %v191_v0  ;;  %2299 = vmatpush3.msra.mxu1 %v191_v0  ;;  %s2635_s9 = scalar_lea.vmem %s3864_s0, %s2155_s6  ;;  %v2672_v20 = vld [vmem:[%s3866_s2] ss:$0 sm:$0xff]  ;;  %v2544_v62 = vmov 2131351028   ;;  %v2545_v0 = vmov 2102212464  }
  0x16   : > { %2265 = vmatprep.subr.mxu0 %v190_v1  ;;  %2296 = vmatprep.subr.mxu1 %v190_v1  ;;  %v172_v4 = vld [vmem:[%s2635_s9] sm:$0xff]  ;;  %v173_v6 = vld [vmem:[%s2635_s9 + $0x8] sm:$0xff]  ;;  %v174_v8 = vld [vmem:[%s2635_s9 + $0x10] sm:$0xff]  ;;  %s2242_s28 = sshll.u32 %s2592_s16, 11  ;;  %s3824_s16 = scalar_lea.sflag [#allocation3], %s162_s17 }
  0x17   : > { %2266 = vmatpush3.msra.mxu0 %v190_v1  ;;  %2300 = vmatpush3.msra.mxu1 %v190_v1  ;;  %v180_v5 = vld [vmem:[%s2635_s9 + $0x40] sm:$0xff]  ;;  %v181_v7 = vld [vmem:[%s2635_s9 + $0x48] sm:$0xff]  ;;  %v182_v9 = vld [vmem:[%s2635_s9 + $0x50] sm:$0xff]  ;;  %s3816_s5 = scalar_lea.hbm %s3867_s3, %s2242_s28  ;;  %s2480_s6 = scalar_lea.vmem %s3818_s29, 2048 }
  0x18   : > { %2267 = vmatprep.subr.mxu0 %v189_v2  ;;  %2297 = vmatprep.subr.mxu1 %v189_v2  ;;  %v175_v10 = vld [vmem:[%s2635_s9 + $0x18] sm:$0xff]  ;;  %v176_v12 = vld [vmem:[%s2635_s9 + $0x20] sm:$0xff]  ;;  %v177_v14 = vld [vmem:[%s2635_s9 + $0x28] sm:$0xff]  ;;  %p2481_p11 = scmp.ne.s32.totalorder %s3818_s29, %s2480_s6 }
  0x19   : > { %2268 = vmatpush3.msra.mxu0 %v189_v2  ;;  %2301 = vmatpush3.msra.mxu1 %v189_v2  ;;  %v183_v11 = vld [vmem:[%s2635_s9 + $0x58] sm:$0xff]  ;;  %v184_v13 = vld [vmem:[%s2635_s9 + $0x60] sm:$0xff]  ;;  %v185_v15 = vld [vmem:[%s2635_s9 + $0x68] sm:$0xff]  ;;  %v2546_v2 = vmov 920167782  }
  0x1a   : > { %2269 = vmatprep.subr.mxu0 %v188_v3  ;;  %2298 = vmatprep.subr.mxu1 %v188_v3  ;;  %v178_v16 = vld [vmem:[%s2635_s9 + $0x30] sm:$0xff]  ;;  %v179_v18 = vld [vmem:[%s2635_s9 + $0x38] sm:$0xff]  ;;  %p2482_p12 = pnand %p2481_p11, %p2609_p5 }
  0x1b   : > { %2270 = vmatpush3.msra.mxu0 %v188_v3  ;;  %2302 = vmatpush3.msra.mxu1 %v188_v3  ;;  %v186_v17 = vld [vmem:[%s2635_s9 + $0x70] sm:$0xff]  ;;  %v187_v19 = vld [vmem:[%s2635_s9 + $0x78] sm:$0xff]  ;;  %s2486_s9 = scalar_lea.vmem %s2485_s8, 4096 }
  0x1c   : > { %2271 = vmatprep.mubr.msk.f32.mxu0 %vm199_vm0, %v172_v4  ;;  %2283 = vmatprep.mubr.msk.f32.mxu1 %vm199_vm0, %v180_v5  ;;  %p2483_p13 = pneg %p2482_p12  ;;  %p2488_p1 = scmp.lt.s32.totalorder %s2486_s9, %s2480_s6 }
  0x1d   : > { %2272 = vmatmul.mubr.msk.f32.vlgmr.msra.gmra.mxu0 %vm199_vm0, %v173_v6  ;;  %2284 = vmatmul.mubr.msk.f32.vlgmr.msra.gmra.mxu1 %vm199_vm0, %v181_v7 }
  0x1e   : > { %2274 = vmatprep.mubr.msk.f32.mxu0 %vm199_vm0, %v174_v8  ;;  %2286 = vmatprep.mubr.msk.f32.mxu1 %vm199_vm0, %v182_v9  ;;  %v2547_v9 = vmov 1326507024   ;;  %p2489_p2 = por %p2488_p1, %p2487_p0 }
  0x20   : > { %p2490_p3 = pnand %p2489_p2, %p2483_p13 }
  0x21   : > { %2275 = vmatmul.mubr.msk.f32.gmra.mxu0 %vm199_vm0, %v175_v10  ;;  %2287 = vmatmul.mubr.msk.f32.gmra.mxu1 %vm199_vm0, %v183_v11 }
  0x22   : > { %2277 = vmatprep.mubr.msk.f32.mxu0 %vm199_vm0, %v176_v12  ;;  %2289 = vmatprep.mubr.msk.f32.mxu1 %vm199_vm0, %v184_v13 }
  0x25   : > { %2278 = vmatmul.mubr.msk.f32.gmra.mxu0 %vm199_vm0, %v177_v14  ;;  %2290 = vmatmul.mubr.msk.f32.gmra.mxu1 %vm199_vm0, %v185_v15 }
  0x26   : > { %2280 = vmatprep.mubr.msk.f32.mxu0 %vm199_vm0, %v178_v16  ;;  %2292 = vmatprep.mubr.msk.f32.mxu1 %vm199_vm0, %v186_v17 }
  0x29   : > { %2281 = vmatmul.mubr.msk.f32.gmra.mxu0 %vm199_vm0, %v179_v18  ;;  %2293 = vmatmul.mubr.msk.f32.gmra.mxu1 %vm199_vm0, %v187_v19 }
  0xdd   : > { %v2273_v21 = vpop.f32.mrf.mxu0  ;;  %v2285_v22 = vpop.f32.mrf.mxu1 }
  0xde   : > { %v2675_v23 = vadd.f32 %v2273_v21, %v2672_v20  ;;  %v2678_v24 = vadd.f32 %v2285_v22, %v2672_v20 }
  0xdf   : > { %v314_v25 = vpop.f32.mrf.mxu0  ;;  %v354_v44 = vpop.f32.mrf.mxu1 }
  0xe0   : > { %v497_v26 = vand.u32 2147483647, %v2675_v23  ;;  %v500_v27 = vand.u32 2139095040, %v2675_v23  ;;  %v1329_v28 = vand.u32 2147483647, %v2678_v24  ;;  %v1332_v29 = vand.u32 2139095040, %v2678_v24 }
  0xe1   : > { %v2687_v32 = vadd.f32 %v2672_v20, %v314_v25  ;;  %v2694_v50 = vadd.f32 %v2672_v20, %v354_v44  ;;  %vm499_vm14 = vcmp.lt.s32.totalorder %v2675_v23, 0 }
  0xe2   : > { %v501_v30 = vshrl.u32 %v500_v27, 23  ;;  %v504_v31 = vand.u32 8388607, %v497_v26  ;;  %v1333_v33 = vshrl.u32 %v1332_v29, 23  ;;  %v1336_v34 = vand.u32 8388607, %v1329_v28 }
  0xe3   : > { %v396_v37 = vand.u32 2139095040, %v2687_v32  ;;  %v393_v42 = vand.u32 2147483647, %v2687_v32  ;;  %vm2799_vm15 = vcmp.le.f32.partialorder %v497_v26, 0.7853982 }
  0xe4   : > { %v2177_v35 = vadd.s32 4294967169, %v501_v30  ;;  %v2209_v36 = vadd.s32 4294967169, %v1333_v33  ;;  %v505_v38 = vor.u32 8388608, %v504_v31  ;;  %v1337_v40 = vor.u32 8388608, %v1336_v34 }
  0xe5   : > { %v397_v43 = vshrl.u32 %v396_v37, 23  ;;  %v2704_v54 = vand.u32 8388607, %v393_v42 }
  0xe6   : > { %v507_v39 = vadd.s32 1, %v2177_v35  ;;  %v1339_v41 = vadd.s32 1, %v2209_v36  ;;  %v2696_v51 = vshll.u32 %v505_v38, 8  ;;  %v2700_v53 = vshll.u32 %v1337_v40, 8 }
  0xe7   : > { %v2173_v46 = vadd.s32 4294967169, %v397_v43 }
  0xe8   : > { %vm508_vm1 = vcmp.gt.s32.totalorder %v507_v39, 0  ;;  %vm1340_vm2 = vcmp.gt.s32.totalorder %v1339_v41, 0 }
  0xe9   : > { %v509_v45 = vsel %vm508_vm1, %v507_v39, 0  ;;  %v1341_v49 = vsel %vm1340_vm2, %v1339_v41, 0  ;;  %v2707_v59 = vadd.s32 1, %v2173_v46 }
  0xea   : > { %v510_v47 = vshrl.u32 %v509_v45, 5  ;;  %v511_v48 = vand.u32 31, %v509_v45  ;;  %v2698_v52 = vshrl.u32 %v1341_v49, 5  ;;  %v1343_v58 = vand.u32 31, %v1341_v49 }
  0xeb   : > { %vm404_vm12 = vcmp.gt.s32.totalorder %v2707_v59, 0 }
  0xec   : > { %v512_v55 = vsub.s32 32, %v511_v48  ;;  %v514_v57 = vshll.u32 %v2542_v56, %v511_v48  ;;  %v517_v61 = vshll.u32 %v2543_v60, %v511_v48  ;;  %v520_v63 = vshll.u32 %v2544_v62, %v511_v48 }
  0xed   : > { %v523_v1 = vshll.u32 %v2545_v0, %v511_v48  ;;  %v526_v3 = vshll.u32 %v2546_v2, %v511_v48  ;;  %vm529_vm3 = vcmp.lt.s32.totalorder %v510_v47, 1  ;;  %vm530_vm4 = vcmp.lt.s32.totalorder %v510_v47, 2 }
  0xee   : > { %v515_v4 = vshrl.u32 %v2543_v60, %v512_v55  ;;  %v518_v5 = vshrl.u32 %v2544_v62, %v512_v55  ;;  %v521_v6 = vshrl.u32 %v2545_v0, %v512_v55  ;;  %v513_v7 = vshrl.u32 %v2542_v56, %v512_v55 }
  0xef   : > { %v524_v8 = vshrl.u32 %v2546_v2, %v512_v55  ;;  %v527_v10 = vshrl.u32 %v2547_v9, %v512_v55  ;;  %v1344_v14 = vsub.s32 32, %v1343_v58  ;;  %vm531_vm5 = vcmp.lt.s32.totalorder %v510_v47, 3 }
  0xf0   : > { %v516_v11 = vor.u32 %v515_v4, %v514_v57  ;;  %v519_v12 = vor.u32 %v518_v5, %v517_v61  ;;  %v522_v13 = vor.u32 %v521_v6, %v520_v63  ;;  %vm532_vm6 = vcmp.lt.s32.totalorder %v510_v47, 4 }
  0xf1   : > { %v525_v15 = vor.u32 %v524_v8, %v523_v1  ;;  %v528_v16 = vor.u32 %v527_v10, %v526_v3  ;;  %v1346_v29 = vshll.u32 %v2542_v56, %v1343_v58  ;;  %v1347_v33 = vshrl.u32 %v2543_v60, %v1344_v14 }
  0xf2   : > { %v533_v17 = vsel %vm529_vm3, %v513_v7, %v516_v11  ;;  %v534_v18 = vsel %vm532_vm6, %v522_v13, 2102212464  ;;  %v537_v19 = vsel %vm529_vm3, %v516_v11, %v519_v12  ;;  %v541_v21 = vsel %vm529_vm3, %v519_v12, %v522_v13 }
  0xf3   : > { %v535_v22 = vsel %vm531_vm5, %v519_v12, %v534_v18  ;;  %v538_v25 = vsel %vm532_vm6, %v525_v15, 920167782  ;;  %v542_v27 = vsel %vm532_vm6, %v528_v16, 1326507024  ;;  %v1349_v34 = vshll.u32 %v2543_v60, %v1343_v58 }
  0xf4   : > { %v539_v30 = vsel %vm531_vm5, %v522_v13, %v538_v25  ;;  %v543_v31 = vsel %vm531_vm5, %v525_v15, %v542_v27  ;;  %v536_v35 = vsel %vm530_vm4, %v533_v17, %v535_v22  ;;  %v1350_v38 = vshrl.u32 %v2544_v62, %v1344_v14 }
  0xf5   : > { %v540_v36 = vsel %vm530_vm4, %v537_v19, %v539_v30  ;;  %v544_v37 = vsel %vm530_vm4, %v541_v21, %v543_v31  ;;  %v1348_v44 = vor.u32 %v1347_v33, %v1346_v29  ;;  %v1352_v46 = vshll.u32 %v2544_v62, %v1343_v58 }
  0xf6   : > { %v2730_v39 = vmul.u32.u64.low %v2696_v51, %v544_v37  ;;  %v2731_v40 = vmul.u32.u64.high %v2696_v51, %v544_v37, %v2730_v39  ;;  %v2734_v41 = vmul.u32.u64.low %v2696_v51, %v540_v36  ;;  %v2735_v43 = vmul.u32.u64.high %v2696_v51, %v540_v36, %v2734_v41 }
  0xf7   : > { %v1351_v45 = vor.u32 %v1350_v38, %v1349_v34  ;;  %v1353_v48 = vshrl.u32 %v2545_v0, %v1344_v14  ;;  %v1345_v49 = vshrl.u32 %v2542_v56, %v1344_v14  ;;  %v1355_v47 = vshll.u32 %v2545_v0, %v1343_v58 }
  0xf8   : > { %v1356_v55 = vshrl.u32 %v2546_v2, %v1344_v14  ;;  %v1359_v57 = vshrl.u32 %v2547_v9, %v1344_v14  ;;  %v552_v61 = vmul.u32 %v2696_v51, %v536_v35  ;;  %v1358_v1 = vshll.u32 %v2546_v2, %v1343_v58 }
  0xf9   : > { %v1354_v63 = vor.u32 %v1353_v48, %v1352_v46  ;;  %vm1361_vm7 = vcmp.lt.s32.totalorder %v2698_v52, 1  ;;  %vm554_vm8 = vc.u32 %v2731_v40, %v2734_v41  ;;  %v555_v3 = vadd.s32 1, %v2735_v43 }
  0xfa   : > { %v1357_v4 = vor.u32 %v1356_v55, %v1355_v47  ;;  %vm1362_vm9 = vcmp.lt.s32.totalorder %v2698_v52, 2  ;;  %v1360_v5 = vor.u32 %v1359_v57, %v1358_v1  ;;  %vm1363_vm10 = vcmp.lt.s32.totalorder %v2698_v52, 3 }
  0xfb   : > { %vm1364_vm11 = vcmp.lt.s32.totalorder %v2698_v52, 4  ;;  %v1369_v6 = vsel %vm1361_vm7, %v1348_v44, %v1351_v45  ;;  %v556_v51 = vsel %vm554_vm8, %v555_v3, %v2735_v43  ;;  %v1373_v58 = vsel %vm1361_vm7, %v1351_v45, %v1354_v63 }
  0xfc   : > { %v1366_v7 = vsel %vm1364_vm11, %v1354_v63, 2102212464  ;;  %v1370_v8 = vsel %vm1364_vm11, %v1357_v4, 920167782  ;;  %v557_v10 = vadd.s32 %v556_v51, %v552_v61  ;;  %v1365_v11 = vsel %vm1361_vm7, %v1345_v49, %v1348_v44 }
  0xfd   : > { %v1371_v12 = vsel %vm1363_vm10, %v1354_v63, %v1370_v8  ;;  %v1374_v13 = vsel %vm1364_vm11, %v1360_v5, 1326507024  ;;  %v1367_v14 = vsel %vm1363_vm10, %v1351_v45, %v1366_v7  ;;  %v405_v27 = vsel %vm404_vm12, %v2707_v59, 0 }
  0xfe   : > { %v1372_v15 = vsel %vm1362_vm9, %v1369_v6, %v1371_v12  ;;  %v1375_v16 = vsel %vm1363_vm10, %v1357_v4, %v1374_v13  ;;  %v558_v17 = vadd.s32 536870912, %v557_v10  ;;  %v1368_v30 = vsel %vm1362_vm9, %v1365_v11, %v1367_v14 }
  0xff   : > { %v1376_v18 = vsel %vm1362_vm9, %v1373_v58, %v1375_v16  ;;  %v2758_v19 = vmul.u32.u64.low %v2700_v53, %v1372_v15  ;;  %v2759_v21 = vmul.u32.u64.high %v2700_v53, %v1372_v15, %v2758_v19  ;;  %v407_v31 = vand.u32 31, %v405_v27 }
 0x100   : > { %v2763_v22 = vmul.u32.u64.low %v2700_v53, %v1376_v18  ;;  %v2764_v25 = vmul.u32.u64.high %v2700_v53, %v1376_v18, %v2763_v22  ;;  %v559_v29 = vshrl.u32 %v558_v17, 30  ;;  %v1228_v33 = vand.u32 2139095040, %v2694_v50 }
 0x101   : > { %v1387_v35 = vadd.s32 1, %v2759_v21  ;;  %v401_v36 = vor.u32 8388608, %v2704_v54  ;;  %v1384_v37 = vmul.u32 %v2700_v53, %v1368_v30  ;;  %v408_v38 = vsub.s32 32, %v407_v31 }
 0x102   : > { %v560_v34 = vshll.u32 %v559_v29, 30  ;;  %vm1386_vm13 = vc.u32 %v2764_v25, %v2758_v19  ;;  %v1229_v52 = vshrl.u32 %v1228_v33, 23  ;;  %v553_v44 = vadd.s32 %v2734_v41, %v2731_v40 }
 0x103   : > { %v1388_v59 = vsel %vm1386_vm13, %v1387_v35, %v2759_v21  ;;  %v2781_v46 = vshll.u32 %v401_v36, 8  ;;  %v1225_v53 = vand.u32 2147483647, %v2694_v50  ;;  %v2784_v48 = vshrl.u32 %v405_v27, 5 }
 0x104   : > { %v2775_v39 = vsub.s32 %v557_v10, %v560_v34  ;;  %v1389_v43 = vadd.s32 %v1388_v59, %v1384_v37  ;;  %v411_v49 = vshrl.u32 %v2543_v60, %v408_v38  ;;  %v414_v47 = vshrl.u32 %v2544_v62, %v408_v38 }
 0x105   : > { %v417_v57 = vshrl.u32 %v2545_v0, %v408_v38  ;;  %v420_v61 = vshrl.u32 %v2546_v2, %v408_v38  ;;  %v2791_v40 = vadd.s32 4294967169, %v1229_v52  ;;  %v583_v41 = vsub.s32 4, %v559_v29 }
 0x106   : > { %v563_v45 = vsub.s32 0, %v2775_v39  ;;  %v1390_v54 = vadd.s32 536870912, %v1389_v43  ;;  %v410_v1 = vshll.u32 %v2542_v56, %v407_v31  ;;  %v413_v3 = vshll.u32 %v2543_v60, %v407_v31 }
 0x107   : > { %v416_v6 = vshll.u32 %v2544_v62, %v407_v31  ;;  %v419_v51 = vshll.u32 %v2545_v0, %v407_v31  ;;  %v423_v7 = vshrl.u32 %v2547_v9, %v408_v38  ;;  %v2809_v11 = vand.u32 8388607, %v1225_v53 }
 0x108   : > { %v2178_v55 = vmin.u32 %v563_v45, %v2775_v39  ;;  %v2793_v63 = vshrl.u32 %v1390_v54, 30  ;;  %v412_v58 = vor.u32 %v411_v49, %v410_v1  ;;  %v415_v10 = vor.u32 %v414_v47, %v413_v3 }
 0x109   : > { %v418_v26 = vor.u32 %v417_v57, %v416_v6  ;;  %v421_v13 = vor.u32 %v420_v61, %v419_v51  ;;  %v422_v14 = vshll.u32 %v2546_v2, %v407_v31  ;;  %v584_v15 = vsel %vm499_vm14, %v583_v41, %v559_v29 }
 0x10a   : > { %v565_v5 = vclz %v2178_v55  ;;  %v1392_v8 = vshll.u32 %v2793_v63, 30  ;;  %v409_v17 = vshrl.u32 %v2542_v56, %v408_v38  ;;  %vm425_vm0 = vcmp.lt.s32.totalorder %v2784_v48, 1 }
 0x10b   : > { %v424_v18 = vor.u32 %v423_v7, %v422_v14  ;;  %vm426_vm2 = vcmp.lt.s32.totalorder %v2784_v48, 2  ;;  %vm427_vm3 = vcmp.lt.s32.totalorder %v2784_v48, 3  ;;  %vm1331_vm4 = vcmp.lt.s32.totalorder %v2678_v24, 0 }
 0x10c   : > { %v2179_v12 = vadd.s32 4294967294, %v565_v5  ;;  %v2814_v16 = vsub.s32 %v1389_v43, %v1392_v8  ;;  %vm428_vm5 = vcmp.lt.s32.totalorder %v2784_v48, 4  ;;  %v433_v27 = vsel %vm425_vm0, %v412_v58, %v415_v10 }
 0x10d   : > { %v430_v31 = vsel %vm428_vm5, %v418_v26, 2102212464  ;;  %v434_v33 = vsel %vm428_vm5, %v421_v13, 920167782  ;;  %v437_v37 = vsel %vm425_vm0, %v415_v10, %v418_v26  ;;  %v438_v43 = vsel %vm428_vm5, %v424_v18, 1326507024 }
 0x10e   : > { %vm2180_vm1 = vcmp.lt.s32.totalorder %v2179_v12, 0  ;;  %v1395_v22 = vsub.s32 0, %v2814_v16  ;;  %v435_v36 = vsel %vm427_vm3, %v418_v26, %v434_v33  ;;  %v586_v45 = vsel %vm2799_vm15, 0, %v584_v15 }
 0x10f   : > { %v568_v21 = vsel %vm2180_vm1, 0, %v2179_v12  ;;  %v436_v52 = vsel %vm426_vm2, %v433_v27, %v435_v36  ;;  %vm2837_vm6 = vcmp.le.f32.partialorder %v1329_v28, 0.7853982  ;;  %v429_v49 = vsel %vm425_vm0, %v409_v17, %v412_v58 }
 0x110   : > { %v569_v29 = vsub.s32 32, %v568_v21  ;;  %v573_v30 = vsub.s32 4294967266, %v568_v21  ;;  %v570_v34 = vshll.u32 %v2775_v39, %v568_v21  ;;  %v2210_v35 = vmin.u32 %v1395_v22, %v2814_v16 }
 0x111   : > { %v1415_v57 = vsub.s32 4, %v2793_v63  ;;  %v439_v61 = vsel %vm427_vm3, %v421_v13, %v438_v43  ;;  %v2851_v1 = vmul.u32.u64.low %v2781_v46, %v436_v52  ;;  %v2852_v3 = vmul.u32.u64.high %v2781_v46, %v436_v52, %v2851_v1 }
 0x112   : > { %v571_v38 = vshrl.u32 %v553_v44, %v569_v29  ;;  %v574_v59 = vadd.s32 127, %v573_v30  ;;  %v1397_v54 = vclz %v2210_v35  ;;  %v431_v44 = vsel %vm427_vm3, %v415_v10, %v430_v31  ;;  %v2276_v29 = vpop.f32.mrf.mxu0 }
 0x113   : > { %v440_v28 = vsel %vm426_vm2, %v437_v37, %v439_v61  ;;  %v432_v6 = vsel %vm426_vm2, %v429_v49, %v431_v44  ;;  %v590_v8 = vadd.s32 3, %v586_v45  ;;  %v1385_v58 = vadd.s32 %v2758_v19, %v2764_v25 }
 0x114   : > { %v572_v47 = vor.u32 %v571_v38, %v570_v34  ;;  %v575_v55 = vshll.u32 %v574_v59, 23  ;;  %v2211_v41 = vadd.s32 4294967294, %v1397_v54  ;;  %v1235_v10 = vadd.s32 1, %v2791_v40 }
 0x115   : > { %v2858_v51 = vmul.u32.u64.low %v2781_v46, %v440_v28  ;;  %v2859_v7 = vmul.u32.u64.high %v2781_v46, %v440_v28, %v2858_v51  ;;  %v1416_v14 = vsel %vm1331_vm4, %v1415_v57, %v2793_v63  ;;  %v448_v17 = vmul.u32 %v2781_v46, %v432_v6 }
 0x116   : > { %v576_v5 = vor.u32 4788187, %v575_v55  ;;  %vm2212_vm7 = vcmp.lt.s32.totalorder %v2211_v41, 0  ;;  %v579_v26 = vcvt.s32.f32 %v572_v47  ;;  %v451_v18 = vadd.s32 1, %v2852_v3 }
 0x117   : > { %v1400_v13 = vsel %vm2212_vm7, 0, %v2211_v41  ;;  %vm450_vm8 = vc.u32 %v2859_v7, %v2851_v1  ;;  %vm1236_vm9 = vcmp.gt.s32.totalorder %v1235_v10, 0  ;;  %v1418_v30 = vsel %vm2837_vm6, 0, %v1416_v14 }
 0x118   : > { %v577_v12 = vand.u32 2147483647, %v576_v5  ;;  %v1401_v48 = vsub.s32 32, %v1400_v13  ;;  %v1405_v15 = vsub.s32 4294967266, %v1400_v13  ;;  %v1402_v22 = vshll.u32 %v2814_v16, %v1400_v13 }
 0x119   : > { %v452_v40 = vsel %vm450_vm8, %v451_v18, %v2852_v3  ;;  %v1237_v27 = vsel %vm1236_vm9, %v1235_v10, 0  ;;  %v2878_v37 = vadd.f32 %v2276_v29, %v2672_v20  ;;  %v2883_v59 = vand.u32 3, %v590_v8 }
 0x11a   : > { %v580_v21 = vmul.f32 %v579_v26, %v577_v12  ;;  %v1403_v19 = vshrl.u32 %v1385_v58, %v1401_v48  ;;  %v1406_v25 = vadd.s32 127, %v1405_v15  ;;  %v453_v46 = vadd.s32 %v452_v40, %v448_v17 }
 0x11b   : > { %v1239_v31 = vand.u32 31, %v1237_v27  ;;  %v2885_v43 = vadd.s32 3, %v1418_v30  ;;  %v1233_v54 = vor.u32 8388608, %v2809_v11  ;;  %vm395_vm10 = vcmp.lt.s32.totalorder %v2687_v32, 0 }
 0x11c   : > { %v581_v63 = vxor.u32 2147483648, %v580_v21  ;;  %v1404_v33 = vor.u32 %v1403_v19, %v1402_v22  ;;  %v1407_v34 = vshll.u32 %v1406_v25, 23  ;;  %v454_v35 = vadd.s32 536870912, %v453_v46 }
 0x11d   : > { %v1240_v36 = vsub.s32 32, %v1239_v31  ;;  %v2891_v57 = vshrl.u32 %v1237_v27, 5  ;;  %v1242_v61 = vshll.u32 %v2542_v56, %v1239_v31  ;;  %v1245_v3 = vshll.u32 %v2543_v60, %v1239_v31 }
 0x11e   : > { %v582_v16 = vsel %vm499_vm14, %v581_v63, %v580_v21  ;;  %v1408_v52 = vor.u32 4788187, %v1407_v34  ;;  %v455_v45 = vshrl.u32 %v454_v35, 30  ;;  %v1411_v47 = vcvt.s32.f32 %v1404_v33 }
 0x11f   : > { %v585_v38 = vsel %vm2799_vm15, %v2675_v23, %v582_v16  ;;  %v1243_v49 = vshrl.u32 %v2543_v60, %v1240_v36  ;;  %v1246_v55 = vshrl.u32 %v2544_v62, %v1240_v36  ;;  %v1249_v41 = vshrl.u32 %v2545_v0, %v1240_v36 }
 0x120   : > { %2414 = vcosq.f32 %v585_v38  ;;  %v1409_v44 = vand.u32 2147483647, %v1408_v52  ;;  %v456_v4 = vshll.u32 %v455_v45, 30  ;;  %v1251_v11 = vshll.u32 %v2545_v0, %v1239_v31 }
 0x121   : > { %2416 = vsinq.f32 %v585_v38  ;;  %v1252_v5 = vshrl.u32 %v2546_v2, %v1240_v36  ;;  %v1244_v51 = vor.u32 %v1243_v49, %v1242_v61  ;;  %v1248_v8 = vshll.u32 %v2544_v62, %v1239_v31 }
 0x122   : > { %v1412_v28 = vmul.f32 %v1411_v47, %v1409_v44  ;;  %v2898_v6 = vsub.s32 %v453_v46, %v456_v4  ;;  %v708_v58 = vand.u32 2139095040, %v2878_v37  ;;  %v1247_v12 = vor.u32 %v1246_v55, %v1245_v3 }
 0x123   : > { %v1253_v26 = vor.u32 %v1252_v5, %v1251_v11  ;;  %v1255_v13 = vshrl.u32 %v2547_v9, %v1240_v36  ;;  %v449_v14 = vadd.s32 %v2851_v1, %v2859_v7  ;;  %v1250_v15 = vor.u32 %v1249_v41, %v1248_v8 }
 0x124   : > { %v1413_v10 = vxor.u32 2147483648, %v1412_v28  ;;  %v459_v48 = vsub.s32 0, %v2898_v6  ;;  %v1254_v17 = vshll.u32 %v2546_v2, %v1239_v31  ;;  %vm596_vm11 = vcmp.eq.s32.totalorder %v2883_v59, 2 }
 0x125   : > { %v479_v21 = vsub.s32 4, %v455_v45  ;;  %vm1257_vm12 = vcmp.lt.s32.totalorder %v2891_v57, 1  ;;  %v2911_v22 = vshll.u32 %v1233_v54, 8  ;;  %vm593_vm13 = vcmp.eq.s32.totalorder %v2883_v59, 0 }
 0x126   : > { %v1414_v18 = vsel %vm1331_vm4, %v1413_v10, %v1412_v28  ;;  %v2174_v7 = vmin.u32 %v459_v48, %v2898_v6  ;;  %v1256_v19 = vor.u32 %v1255_v13, %v1254_v17  ;;  %vm1260_vm14 = vcmp.lt.s32.totalorder %v2891_v57, 4 }
 0x127   : > { %v1417_v1 = vsel %vm2837_vm6, %v2678_v24, %v1414_v18  ;;  %vm592_vm15 = vcmp.lt.s32.totalorder %v2883_v59, 2  ;;  %v1241_v25 = vshrl.u32 %v2542_v56, %v1240_v36  ;;  %v1265_v40 = vsel %vm1257_vm12, %v1244_v51, %v1247_v12 }
 0x128   : > { %2418 = vcosq.f32 %v1417_v1  ;;  %v1266_v27 = vsel %vm1260_vm14, %v1253_v26, 920167782  ;;  %vm589_vm0 = vweird.f32 %v2675_v23  ;;  %vm2928_vm1 = vcmp.le.f32.partialorder %v393_v42, 0.7853982 }
 0x129   : > { %2420 = vsinq.f32 %v1417_v1  ;;  %v461_v29 = vclz %v2174_v7  ;;  %vm1259_vm2 = vcmp.lt.s32.totalorder %v2891_v57, 3  ;;  %v1262_v63 = vsel %vm1260_vm14, %v1250_v15, 2102212464 }
 0x12a   : > { %v480_v30 = vsel %vm395_vm10, %v479_v21, %v455_v45  ;;  %vm1258_vm3 = vcmp.lt.s32.totalorder %v2891_v57, 2  ;;  %v1267_v46 = vsel %vm1259_vm2, %v1250_v15, %v1266_v27  ;;  %v1269_v42 = vsel %vm1257_vm12, %v1247_v12, %v1250_v15 }
 0x12b   : > { %v2175_v31 = vadd.s32 4294967294, %v461_v29  ;;  %v1261_v33 = vsel %vm1257_vm12, %v1241_v25, %v1244_v51  ;;  %v1268_v34 = vsel %vm1258_vm3, %v1265_v40, %v1267_v46  ;;  %v1270_v16 = vsel %vm1260_vm14, %v1256_v19, 1326507024 }
 0x12c   : > { %v1263_v36 = vsel %vm1259_vm2, %v1247_v12, %v1262_v63  ;;  %v1271_v38 = vsel %vm1259_vm2, %v1253_v26, %v1270_v16  ;;  %v2948_v52 = vmul.u32.u64.low %v2911_v22, %v1268_v34  ;;  %v2949_v45 = vmul.u32.u64.high %v2911_v22, %v1268_v34, %v2948_v52 }
 0x12d   : > { %v2415_v35 = vpop.eup %2414  ;;  %vm2176_vm4 = vcmp.lt.s32.totalorder %v2175_v31, 0  ;;  %v1272_v44 = vsel %vm1258_vm3, %v1269_v42, %v1271_v38  ;;  %v709_v47 = vshrl.u32 %v708_v58, 23  ;;  %v1264_v5 = vsel %vm1258_vm3, %v1261_v33, %v1263_v36 }
 0x12e   : > { %v2417_v54 = vpop.eup %2416  ;;  %v597_v49 = vxor.u32 2147483648, %v2415_v35  ;;  %v464_v4 = vsel %vm2176_vm4, 0, %v2175_v31  ;;  %v2957_v61 = vmul.u32.u64.low %v2911_v22, %v1272_v44  ;;  %v2958_v41 = vmul.u32.u64.high %v2911_v22, %v1272_v44, %v2957_v61 }
 0x12f   : > { %v594_v55 = vxor.u32 2147483648, %v2417_v54  ;;  %v465_v3 = vsub.s32 32, %v464_v4  ;;  %v469_v11 = vsub.s32 4294967266, %v464_v4  ;;  %v1423_v8 = vand.u32 3, %v2885_v43  ;;  %v2288_v43 = vpop.f32.mrf.mxu1 }
 0x130   : > { %v598_v28 = vsel %vm596_vm11, %v597_v49, %v2417_v54  ;;  %v1283_v58 = vadd.s32 1, %v2949_v45  ;;  %v2185_v10 = vadd.s32 4294967169, %v709_v47  ;;  %v466_v26 = vshll.u32 %v2898_v6, %v464_v4 }
 0x131   : > { %v595_v51 = vsel %vm593_vm13, %v2415_v35, %v594_v55  ;;  %v467_v13 = vshrl.u32 %v449_v14, %v465_v3  ;;  %v470_v48 = vadd.s32 127, %v469_v11  ;;  %v482_v57 = vsel %vm2928_vm1, 0, %v480_v30 }
 0x132   : > { %v599_v12 = vsel %vm592_vm15, %v595_v51, %v598_v28  ;;  %v1280_v17 = vmul.u32 %v2911_v22, %v1264_v5  ;;  %vm1282_vm5 = vc.u32 %v2958_v41, %v2948_v52  ;;  %v715_v18 = vadd.s32 1, %v2185_v10 }
 0x133   : > { %v600_v15 = vsel %vm589_vm0, nan, %v599_v12  ;;  %v468_v59 = vor.u32 %v467_v13, %v466_v26  ;;  %v471_v6 = vshll.u32 %v470_v48, 23  ;;  %v1284_v14 = vsel %vm1282_vm5, %v1283_v58, %v2949_v45 }
 0x134   : > { %2058 = vst [vmem:[%s2978_s20 + $0x8] sm:$0xff] %v600_v15  ;;  %v1285_v23 = vadd.s32 %v1284_v14, %v1280_v17  ;;  %v705_v21 = vand.u32 2147483647, %v2878_v37  ;;  %vm1428_vm6 = vcmp.eq.s32.totalorder %v1423_v8, 2  ;;  %vm716_vm7 = vcmp.gt.s32.totalorder %v715_v18, 0 }
 0x135   : > { %v2419_v1 = vpop.eup %2418  ;;  %v472_v7 = vor.u32 4788187, %v471_v6  ;;  %v2984_v22 = vadd.f32 %v2288_v43, %v2672_v20  ;;  %v486_v40 = vadd.s32 3, %v482_v57  ;;  %v717_v29 = vsel %vm716_vm7, %v715_v18, 0 }
 0x136   : > { %v2421_v19 = vpop.eup %2420  ;;  %v1429_v25 = vxor.u32 2147483648, %v2419_v1  ;;  %v1286_v27 = vadd.s32 536870912, %v1285_v23  ;;  %v475_v46 = vcvt.s32.f32 %v468_v59  ;;  %v719_v42 = vand.u32 31, %v717_v29 }
 0x137   : > { %v1426_v63 = vxor.u32 2147483648, %v2421_v19  ;;  %v473_v30 = vand.u32 2147483647, %v472_v7  ;;  %vm1425_vm8 = vcmp.eq.s32.totalorder %v1423_v8, 0  ;;  %v712_v34 = vand.u32 8388607, %v705_v21 }
 0x138   : > { %v1430_v31 = vsel %vm1428_vm6, %v1429_v25, %v2421_v19  ;;  %v2986_v33 = vshrl.u32 %v1286_v27, 30  ;;  %vm1424_vm9 = vcmp.lt.s32.totalorder %v1423_v8, 2  ;;  %v720_v36 = vsub.s32 32, %v719_v42 }
 0x139   : > { %v1427_v16 = vsel %vm1425_vm8, %v2419_v1, %v1426_v63  ;;  %v476_v35 = vmul.f32 %v475_v46, %v473_v30  ;;  %vm1421_vm11 = vweird.f32 %v2678_v24  ;;  %v2992_v44 = vand.u32 3, %v486_v40 }
 0x13a   : > { %v1431_v38 = vsel %vm1424_vm9, %v1427_v16, %v1430_v31  ;;  %v1288_v45 = vshll.u32 %v2986_v33, 30  ;;  %v723_v47 = vshrl.u32 %v2543_v60, %v720_v36  ;;  %v713_v4 = vor.u32 8388608, %v712_v34 }
 0x13b   : > { %v1432_v54 = vsel %vm1421_vm11, nan, %v1431_v38  ;;  %v477_v49 = vxor.u32 2147483648, %v476_v35  ;;  %v726_v61 = vshrl.u32 %v2544_v62, %v720_v36  ;;  %v1540_v28 = vand.u32 2139095040, %v2984_v22 }
 0x13c   : > { %2066 = vst [vmem:[%s2978_s20 + $0x48] sm:$0xff] %v1432_v54  ;;  %v2996_v55 = vsub.s32 %v1285_v23, %v1288_v45  ;;  %v718_v3 = vshrl.u32 %v717_v29, 5  ;;  %v722_v11 = vshll.u32 %v2542_v56, %v719_v42  ;;  %v729_v5 = vshrl.u32 %v2545_v0, %v720_v36 }
 0x13d   : > { %v478_v24 = vsel %vm395_vm10, %v477_v49, %v476_v35  ;;  %v725_v58 = vshll.u32 %v2543_v60, %v719_v42  ;;  %v728_v10 = vshll.u32 %v2544_v62, %v719_v42  ;;  %v731_v26 = vshll.u32 %v2545_v0, %v719_v42 }
 0x13e   : > { %v481_v51 = vsel %vm2928_vm1, %v2687_v32, %v478_v24  ;;  %v1291_v8 = vsub.s32 0, %v2996_v55  ;;  %v724_v12 = vor.u32 %v723_v47, %v722_v11  ;;  %v732_v13 = vshrl.u32 %v2546_v2, %v720_v36 }
 0x13f   : > { %2422 = vcosq.f32 %v481_v51  ;;  %v727_v15 = vor.u32 %v726_v61, %v725_v58  ;;  %v730_v57 = vor.u32 %v729_v5, %v728_v10  ;;  %v734_v39 = vshll.u32 %v2546_v2, %v719_v42 }
 0x140   : > { %2424 = vsinq.f32 %v481_v51  ;;  %v2206_v48 = vmin.u32 %v1291_v8, %v2996_v55  ;;  %v733_v17 = vor.u32 %v732_v13, %v731_v26  ;;  %v735_v43 = vshrl.u32 %v2547_v9, %v720_v36 }
 0x141   : > { %v753_v59 = vshll.u32 %v713_v4, 8  ;;  %v721_v14 = vshrl.u32 %v2542_v56, %v720_v36  ;;  %vm737_vm10 = vcmp.lt.s32.totalorder %v718_v3, 1  ;;  %v1541_v18 = vshrl.u32 %v1540_v28, 23 }
 0x142   : > { %v1293_v6 = vclz %v2206_v48  ;;  %vm1227_vm12 = vcmp.lt.s32.totalorder %v2694_v50, 0  ;;  %v736_v23 = vor.u32 %v735_v43, %v734_v39  ;;  %vm738_vm13 = vcmp.lt.s32.totalorder %v718_v3, 2 }
 0x143   : > { %vm739_vm14 = vcmp.lt.s32.totalorder %v718_v3, 3  ;;  %vm740_vm15 = vcmp.lt.s32.totalorder %v718_v3, 4  ;;  %v745_v19 = vsel %vm737_vm10, %v724_v12, %v727_v15  ;;  %v741_v40 = vsel %vm737_vm10, %v721_v14, %v724_v12 }
 0x144   : > { %v2207_v1 = vadd.s32 4294967294, %v1293_v6  ;;  %v742_v7 = vsel %vm740_vm15, %v730_v57, 2102212464  ;;  %v746_v25 = vsel %vm740_vm15, %v733_v17, 920167782  ;;  %v749_v29 = vsel %vm737_vm10, %v727_v15, %v730_v57 }
 0x145   : > { %v747_v27 = vsel %vm739_vm14, %v730_v57, %v746_v25  ;;  %v750_v63 = vsel %vm740_vm15, %v736_v23, 1326507024  ;;  %vm3019_vm0 = vcmp.le.f32.partialorder %v1225_v53, 0.7853982  ;;  %v743_v46 = vsel %vm739_vm14, %v727_v15, %v742_v7 }
 0x146   : > { %vm2208_vm1 = vcmp.lt.s32.totalorder %v2207_v1, 0  ;;  %v748_v42 = vsel %vm738_vm13, %v745_v19, %v747_v27  ;;  %v751_v31 = vsel %vm739_vm14, %v733_v17, %v750_v63  ;;  %v1281_v38 = vadd.s32 %v2948_v52, %v2958_v41 }
 0x147   : > { %v1296_v34 = vsel %vm2208_vm1, 0, %v2207_v1  ;;  %v752_v16 = vsel %vm738_vm13, %v749_v29, %v751_v31  ;;  %v3025_v35 = vmul.u32.u64.low %v753_v59, %v748_v42  ;;  %v3026_v36 = vmul.u32.u64.high %v753_v59, %v748_v42, %v3025_v35 }
 0x148   : > { %v1297_v45 = vsub.s32 32, %v1296_v34  ;;  %v1301_v53 = vsub.s32 4294967266, %v1296_v34  ;;  %v1311_v54 = vsub.s32 4, %v2986_v33  ;;  %v1537_v4 = vand.u32 2147483647, %v2984_v22 }
 0x149   : > { %v3032_v49 = vmul.u32.u64.low %v753_v59, %v752_v16  ;;  %v3033_v47 = vmul.u32.u64.high %v753_v59, %v752_v16, %v3032_v49  ;;  %v2217_v61 = vadd.s32 4294967169, %v1541_v18  ;;  %v1298_v28 = vshll.u32 %v2996_v55, %v1296_v34  ;;  %v324_v18 = vpop.f32.mrf.mxu0 }
 0x14a   : > { %v1299_v24 = vshrl.u32 %v1281_v38, %v1297_v45  ;;  %v1302_v11 = vadd.s32 127, %v1301_v53  ;;  %v744_v5 = vsel %vm738_vm13, %v741_v40, %v743_v46  ;;  %vm488_vm2 = vcmp.lt.s32.totalorder %v2992_v44, 2 }
 0x14b   : > { %vm489_vm3 = vcmp.eq.s32.totalorder %v2992_v44, 0  ;;  %v763_v52 = vadd.s32 1, %v3026_v36  ;;  %v1547_v41 = vadd.s32 1, %v2217_v61  ;;  %vm492_vm4 = vcmp.eq.s32.totalorder %v2992_v44, 2 }
 0x14c   : > { %v2423_v51 = vpop.eup %2422  ;;  %v1300_v8 = vor.u32 %v1299_v24, %v1298_v28  ;;  %v1303_v58 = vshll.u32 %v1302_v11, 23  ;;  %v1312_v55 = vsel %vm1227_vm12, %v1311_v54, %v2986_v33  ;;  %v760_v3 = vmul.u32 %v753_v59, %v744_v5 }
 0x14d   : > { %v2425_v10 = vpop.eup %2424  ;;  %v493_v12 = vxor.u32 2147483648, %v2423_v51  ;;  %vm762_vm5 = vc.u32 %v3033_v47, %v3025_v35  ;;  %vm1548_vm6 = vcmp.gt.s32.totalorder %v1547_v41, 0  ;;  %v1544_v15 = vand.u32 8388607, %v1537_v4 }
 0x14e   : > { %v490_v26 = vxor.u32 2147483648, %v2425_v10  ;;  %v1304_v13 = vor.u32 4788187, %v1303_v58  ;;  %v764_v48 = vsel %vm762_vm5, %v763_v52, %v3026_v36  ;;  %v1314_v17 = vsel %vm3019_vm0, 0, %v1312_v55 }
 0x14f   : > { %v494_v57 = vsel %vm492_vm4, %v493_v12, %v2425_v10  ;;  %v765_v33 = vadd.s32 %v764_v48, %v760_v3  ;;  %v1549_v39 = vsel %vm1548_vm6, %v1547_v41, 0  ;;  %v1307_v6 = vcvt.s32.f32 %v1300_v8 }
 0x150   : > { %v491_v43 = vsel %vm489_vm3, %v2423_v51, %v490_v26  ;;  %v1305_v59 = vand.u32 2147483647, %v1304_v13  ;;  %v1551_v14 = vand.u32 31, %v1549_v39  ;;  %vm485_vm7 = vweird.f32 %v2687_v32 }
 0x151   : > { %v495_v23 = vsel %vm488_vm2, %v491_v43, %v494_v57  ;;  %v766_v1 = vadd.s32 536870912, %v765_v33  ;;  %v1318_v25 = vadd.s32 3, %v1314_v17  ;;  %v1545_v29 = vor.u32 8388608, %v1544_v15 }
 0x152   : > { %v496_v7 = vsel %vm485_vm7, nan, %v495_v23  ;;  %v1308_v19 = vmul.f32 %v1307_v6, %v1305_v59  ;;  %v1552_v40 = vsub.s32 32, %v1551_v14  ;;  %v1554_v63 = vshll.u32 %v2542_v56, %v1551_v14 }
 0x153   : > { %2057 = vst [vmem:[%s2978_s20] sm:$0xff] %v496_v7  ;;  %v3058_v27 = vshrl.u32 %v766_v1, 30  ;;  %v3062_v46 = vadd.f32 %v2672_v20, %v324_v18  ;;  %v1557_v44 = vshll.u32 %v2543_v60, %v1551_v14  ;;  %v1560_v16 = vshll.u32 %v2544_v62, %v1551_v14 }
 0x154   : > { %v1309_v42 = vxor.u32 2147483648, %v1308_v19  ;;  %v1555_v32 = vshrl.u32 %v2543_v60, %v1552_v40  ;;  %v1558_v31 = vshrl.u32 %v2544_v62, %v1552_v40  ;;  %v1561_v36 = vshrl.u32 %v2545_v0, %v1552_v40 }
 0x155   : > { %v768_v34 = vshll.u32 %v3058_v27, 30  ;;  %v1564_v38 = vshrl.u32 %v2546_v2, %v1552_v40  ;;  %v1550_v20 = vshrl.u32 %v1549_v39, 5  ;;  %v1563_v54 = vshll.u32 %v2545_v0, %v1551_v14 }
 0x156   : > { %v1310_v45 = vsel %vm1227_vm12, %v1309_v42, %v1308_v19  ;;  %v1556_v53 = vor.u32 %v1555_v32, %v1554_v63  ;;  %v1559_v28 = vor.u32 %v1558_v31, %v1557_v44  ;;  %v1562_v24 = vor.u32 %v1561_v36, %v1560_v16 }
 0x157   : > { %v1313_v49 = vsel %vm3019_vm0, %v2694_v50, %v1310_v45  ;;  %v3077_v61 = vsub.s32 %v765_v33, %v768_v34  ;;  %v1565_v11 = vor.u32 %v1564_v38, %v1563_v54  ;;  %v1566_v5 = vshll.u32 %v2546_v2, %v1551_v14 }
 0x158   : > { %2426 = vcosq.f32 %v1313_v49  ;;  %v1567_v52 = vshrl.u32 %v2547_v9, %v1552_v40  ;;  %v3081_v41 = vand.u32 3, %v1318_v25  ;;  %vm707_vm8 = vcmp.lt.s32.totalorder %v2878_v37, 0 }
 0x159   : > { %2428 = vsinq.f32 %v1313_v49  ;;  %v771_v51 = vsub.s32 0, %v3077_v61  ;;  %vm1572_vm9 = vcmp.lt.s32.totalorder %v1550_v20, 4  ;;  %v1585_v30 = vshll.u32 %v1545_v29, 8 }
 0x15a   : > { %v1568_v8 = vor.u32 %v1567_v52, %v1566_v5  ;;  %v604_v58 = vand.u32 2139095040, %v3062_v46  ;;  %v1553_v10 = vshrl.u32 %v2542_v56, %v1552_v40  ;;  %vm1569_vm11 = vcmp.lt.s32.totalorder %v1550_v20, 1 }
 0x15b   : > { %v2186_v55 = vmin.u32 %v771_v51, %v3077_v61  ;;  %v1574_v12 = vsel %vm1572_vm9, %v1562_v24, 2102212464  ;;  %vm1570_vm10 = vcmp.lt.s32.totalorder %v1550_v20, 2  ;;  %v1577_v3 = vsel %vm1569_vm11, %v1556_v53, %v1559_v28 }
 0x15c   : > { %v1578_v26 = vsel %vm1572_vm9, %v1565_v11, 920167782  ;;  %v601_v13 = vand.u32 2147483647, %v3062_v46  ;;  %vm1571_vm12 = vcmp.lt.s32.totalorder %v1550_v20, 3  ;;  %v1573_v15 = vsel %vm1569_vm11, %v1553_v10, %v1556_v53 }
 0x15d   : > { %v773_v48 = vclz %v2186_v55  ;;  %v1581_v57 = vsel %vm1569_vm11, %v1559_v28, %v1562_v24  ;;  %v1575_v17 = vsel %vm1571_vm12, %v1559_v28, %v1574_v12  ;;  %v1579_v33 = vsel %vm1571_vm12, %v1562_v24, %v1578_v26 }
 0x15e   : > { %v1582_v39 = vsel %vm1572_vm9, %v1568_v8, 1326507024  ;;  %v605_v43 = vshrl.u32 %v604_v58, 23  ;;  %v791_v6 = vsub.s32 4, %v3058_v27  ;;  %v1580_v14 = vsel %vm1570_vm10, %v1577_v3, %v1579_v33 }
 0x15f   : > { %v2187_v59 = vadd.s32 4294967294, %v773_v48  ;;  %v1583_v18 = vsel %vm1571_vm12, %v1565_v11, %v1582_v39  ;;  %v3095_v1 = vmul.u32.u64.low %v1585_v30, %v1580_v14  ;;  %v3096_v7 = vmul.u32.u64.high %v1585_v30, %v1580_v14, %v3095_v1 }
 0x160   : > { %v1584_v23 = vsel %vm1570_vm10, %v1581_v57, %v1583_v18  ;;  %v2181_v19 = vadd.s32 4294967169, %v605_v43  ;;  %v1576_v25 = vsel %vm1570_vm10, %v1573_v15, %v1575_v17  ;;  %vm1317_vm14 = vweird.f32 %v2694_v50 }
 0x161   : > { %vm2188_vm13 = vcmp.lt.s32.totalorder %v2187_v59, 0  ;;  %v3100_v40 = vmul.u32.u64.low %v1585_v30, %v1584_v23  ;;  %v3101_v29 = vmul.u32.u64.high %v1585_v30, %v1584_v23, %v3100_v40  ;;  %vm1324_vm15 = vcmp.eq.s32.totalorder %v3081_v41, 2 }
 0x162   : > { %vm3107_vm0 = vcmp.le.f32.partialorder %v705_v21, 0.7853982  ;;  %v776_v42 = vsel %vm2188_vm13, 0, %v2187_v59  ;;  %v611_v32 = vadd.s32 1, %v2181_v19  ;;  %v761_v44 = vadd.s32 %v3025_v35, %v3033_v47  ;;  %v364_v35 = vpop.f32.mrf.mxu1 }
 0x163   : > { %v777_v31 = vsub.s32 32, %v776_v42  ;;  %v781_v34 = vsub.s32 4294967266, %v776_v42  ;;  %v792_v16 = vsel %vm707_vm8, %v791_v6, %v3058_v27  ;;  %v1592_v36 = vmul.u32 %v1585_v30, %v1576_v25  ;;  %v3131_v30 = vld [vmem:[%s3866_s2] ss:$0 sm:$0xff] }
 0x164   : > { %v1595_v38 = vadd.s32 1, %v3096_v7  ;;  %v608_v21 = vand.u32 8388607, %v601_v13  ;;  %vm612_vm1 = vcmp.gt.s32.totalorder %v611_v32, 0  ;;  %v778_v20 = vshll.u32 %v3077_v61, %v776_v42 }
 0x165   : > { %v2427_v45 = vpop.eup %2426  ;;  %v779_v53 = vshrl.u32 %v761_v44, %v777_v31  ;;  %v782_v54 = vadd.s32 127, %v781_v34  ;;  %vm1594_vm2 = vc.u32 %v3101_v29, %v3095_v1  ;;  %v794_v27 = vsel %vm3107_vm0, 0, %v792_v16 }
 0x166   : > { %v2429_v47 = vpop.eup %2428  ;;  %v1325_v49 = vxor.u32 2147483648, %v2427_v45  ;;  %v1596_v28 = vsel %vm1594_vm2, %v1595_v38, %v3096_v7  ;;  %v613_v24 = vsel %vm612_vm1, %v611_v32, 0  ;;  %vm1321_vm3 = vcmp.eq.s32.totalorder %v3081_v41, 0 }
 0x167   : > { %v1322_v11 = vxor.u32 2147483648, %v2429_v47  ;;  %v780_v5 = vor.u32 %v779_v53, %v778_v20  ;;  %v783_v52 = vshll.u32 %v782_v54, 23  ;;  %v1597_v51 = vadd.s32 %v1596_v28, %v1592_v36 }
 0x168   : > { %v1326_v61 = vsel %vm1324_vm15, %v1325_v49, %v2429_v47  ;;  %v615_v8 = vand.u32 31, %v613_v24  ;;  %v3134_v58 = vadd.f32 %v3131_v30, %v364_v35  ;;  %vm1320_vm4 = vcmp.lt.s32.totalorder %v3081_v41, 2 }
 0x169   : > { %v1323_v55 = vsel %vm1321_vm3, %v2427_v45, %v1322_v11  ;;  %v784_v10 = vor.u32 4788187, %v783_v52  ;;  %v1598_v12 = vadd.s32 536870912, %v1597_v51  ;;  %v3137_v26 = vadd.s32 3, %v794_v27 }
 0x16a   : > { %v1327_v3 = vsel %vm1320_vm4, %v1323_v55, %v1326_v61  ;;  %v609_v48 = vor.u32 8388608, %v608_v21  ;;  %v616_v15 = vsub.s32 32, %v615_v8  ;;  %v787_v33 = vcvt.s32.f32 %v780_v5 }
 0x16b   : > { %v1328_v57 = vsel %vm1317_vm14, nan, %v1327_v3  ;;  %v785_v17 = vand.u32 2147483647, %v784_v10  ;;  %v3141_v39 = vshrl.u32 %v1598_v12, 30  ;;  %v1436_v6 = vand.u32 2139095040, %v3134_v58 }
 0x16c   : > { %2065 = vst [vmem:[%s2978_s20 + $0x40] sm:$0xff] %v1328_v57  ;;  %v619_v43 = vshrl.u32 %v2543_v60, %v616_v15  ;;  %v622_v41 = vshrl.u32 %v2544_v62, %v616_v15  ;;  %v625_v59 = vshrl.u32 %v2545_v0, %v616_v15  ;;  %v618_v23 = vshll.u32 %v2542_v56, %v615_v8 }
 0x16d   : > { %v788_v14 = vmul.f32 %v787_v33, %v785_v17  ;;  %v1600_v18 = vshll.u32 %v3141_v39, 30  ;;  %v621_v50 = vshll.u32 %v2543_v60, %v615_v8  ;;  %v614_v7 = vshrl.u32 %v613_v24, 5 }
 0x16e   : > { %v624_v19 = vshll.u32 %v2544_v62, %v615_v8  ;;  %v627_v25 = vshll.u32 %v2545_v0, %v615_v8  ;;  %v628_v40 = vshrl.u32 %v2546_v2, %v616_v15  ;;  %v620_v44 = vor.u32 %v619_v43, %v618_v23 }
 0x16f   : > { %v789_v42 = vxor.u32 2147483648, %v788_v14  ;;  %v3154_v32 = vsub.s32 %v1597_v51, %v1600_v18  ;;  %v623_v31 = vor.u32 %v622_v41, %v621_v50  ;;  %v630_v36 = vshll.u32 %v2546_v2, %v615_v8 }
 0x170   : > { %v626_v34 = vor.u32 %v625_v59, %v624_v19  ;;  %v629_v16 = vor.u32 %v628_v40, %v627_v25  ;;  %v631_v38 = vshrl.u32 %v2547_v9, %v616_v15  ;;  %v649_v20 = vshll.u32 %v609_v48, 8 }
 0x171   : > { %v790_v21 = vsel %vm707_vm8, %v789_v42, %v788_v14  ;;  %v1603_v45 = vsub.s32 0, %v3154_v32  ;;  %v1433_v53 = vand.u32 2147483647, %v3134_v58  ;;  %v617_v35 = vshrl.u32 %v2542_v56, %v616_v15 }
 0x172   : > { %v793_v54 = vsel %vm3107_vm0, %v2878_v37, %v790_v21  ;;  %v632_v47 = vor.u32 %v631_v38, %v630_v36  ;;  %v1437_v49 = vshrl.u32 %v1436_v6, 23  ;;  %vm633_vm5 = vcmp.lt.s32.totalorder %v614_v7, 1 }
 0x173   : > { %2430 = vcosq.f32 %v793_v54  ;;  %v2218_v27 = vmin.u32 %v1603_v45, %v3154_v32  ;;  %vm636_vm6 = vcmp.lt.s32.totalorder %v614_v7, 4  ;;  %v641_v24 = vsel %vm633_vm5, %v620_v44, %v623_v31 }
 0x174   : > { %2432 = vsinq.f32 %v793_v54  ;;  %v638_v28 = vsel %vm636_vm6, %v626_v34, 2102212464  ;;  %v642_v11 = vsel %vm636_vm6, %v629_v16, 920167782  ;;  %vm634_vm7 = vcmp.lt.s32.totalorder %v614_v7, 2 }
 0x175   : > { %v1605_v5 = vclz %v2218_v27  ;;  %vm635_vm8 = vcmp.lt.s32.totalorder %v614_v7, 3  ;;  %v637_v52 = vsel %vm633_vm5, %v617_v35, %v620_v44  ;;  %v645_v61 = vsel %vm633_vm5, %v623_v31, %v626_v34  ;;  %v2279_v35 = vpop.f32.mrf.mxu0 }
 0x176   : > { %v639_v51 = vsel %vm635_vm8, %v623_v31, %v638_v28  ;;  %v643_v63 = vsel %vm635_vm8, %v626_v34, %v642_v11  ;;  %v646_v8 = vsel %vm636_vm6, %v632_v47, 1326507024  ;;  %v1623_v10 = vsub.s32 4, %v3141_v39 }
 0x177   : > { %v2219_v55 = vadd.s32 4294967294, %v1605_v5  ;;  %v644_v12 = vsel %vm634_vm7, %v641_v24, %v643_v63  ;;  %v647_v3 = vsel %vm635_vm8, %v629_v16, %v646_v8  ;;  %v640_v48 = vsel %vm634_vm7, %v637_v52, %v639_v51 }
 0x178   : > { %v648_v15 = vsel %vm634_vm7, %v645_v61, %v647_v3  ;;  %v3168_v57 = vmul.u32.u64.low %v649_v20, %v644_v12  ;;  %v3169_v17 = vmul.u32.u64.high %v649_v20, %v644_v12, %v3168_v57  ;;  %v2213_v41 = vadd.s32 4294967169, %v1437_v49 }
 0x179   : > { %vm2220_vm9 = vcmp.lt.s32.totalorder %v2219_v55, 0  ;;  %v3171_v33 = vmul.u32.u64.low %v649_v20, %v648_v15  ;;  %v3172_v43 = vmul.u32.u64.high %v649_v20, %v648_v15, %v3171_v33  ;;  %vm3176_vm11 = vcmp.le.f32.partialorder %v1537_v4, 0.7853982 }
 0x17a   : > { %vm1539_vm10 = vcmp.lt.s32.totalorder %v2984_v22, 0  ;;  %v1593_v6 = vadd.s32 %v3095_v1, %v3101_v29  ;;  %v1608_v14 = vsel %vm2220_vm9, 0, %v2219_v55  ;;  %v1443_v7 = vadd.s32 1, %v2213_v41 }
 0x17b   : > { %v1609_v18 = vsub.s32 32, %v1608_v14  ;;  %v1613_v23 = vsub.s32 4294967266, %v1608_v14  ;;  %v1624_v50 = vsel %vm1539_vm10, %v1623_v10, %v3141_v39  ;;  %v799_v19 = vand.u32 3, %v3137_v26 }
 0x17c   : > { %v656_v25 = vmul.u32 %v649_v20, %v640_v48  ;;  %v659_v4 = vadd.s32 1, %v3169_v17  ;;  %v1440_v40 = vand.u32 8388607, %v1433_v53  ;;  %v1610_v42 = vshll.u32 %v3154_v32, %v1608_v14 }
 0x17d   : > { %v1611_v44 = vshrl.u32 %v1593_v6, %v1609_v18  ;;  %v1614_v1 = vadd.s32 127, %v1613_v23  ;;  %vm658_vm12 = vc.u32 %v3172_v43, %v3168_v57  ;;  %v1626_v29 = vsel %vm3176_vm11, 0, %v1624_v50 }
 0x17e   : > { %v660_v39 = vsel %vm658_vm12, %v659_v4, %v3169_v17  ;;  %vm1444_vm13 = vcmp.gt.s32.totalorder %v1443_v7, 0  ;;  %vm797_vm14 = vweird.f32 %v2878_v37  ;;  %vm800_vm15 = vcmp.lt.s32.totalorder %v799_v19, 2 }
 0x17f   : > { %v1612_v31 = vor.u32 %v1611_v44, %v1610_v42  ;;  %v1615_v26 = vshll.u32 %v1614_v1, 23  ;;  %v661_v34 = vadd.s32 %v660_v39, %v656_v25  ;;  %v1445_v16 = vsel %vm1444_vm13, %v1443_v7, 0 }
 0x180   : > { %v2431_v36 = vpop.eup %2430  ;;  %vm801_vm0 = vcmp.eq.s32.totalorder %v799_v19, 0  ;;  %v1447_v32 = vand.u32 31, %v1445_v16  ;;  %v1441_v54 = vor.u32 8388608, %v1440_v40  ;;  %vm804_vm1 = vcmp.eq.s32.totalorder %v799_v19, 2 }
 0x181   : > { %v2433_v38 = vpop.eup %2432  ;;  %v805_v21 = vxor.u32 2147483648, %v2431_v36  ;;  %v1616_v45 = vor.u32 4788187, %v1615_v26  ;;  %v662_v20 = vadd.s32 536870912, %v661_v34  ;;  %v3196_v49 = vadd.s32 3, %v1626_v29 }
 0x182   : > { %v802_v47 = vxor.u32 2147483648, %v2433_v38  ;;  %v1448_v27 = vsub.s32 32, %v1447_v32  ;;  %v1619_v11 = vcvt.s32.f32 %v1612_v31  ;;  %v3200_v51 = vadd.s32 %v3168_v57, %v3172_v43 }
 0x183   : > { %v806_v28 = vsel %vm804_vm1, %v805_v21, %v2433_v38  ;;  %v1617_v24 = vand.u32 2147483647, %v1616_v45  ;;  %v663_v5 = vshrl.u32 %v662_v20, 30  ;;  %v3204_v61 = vadd.f32 %v3131_v30, %v2279_v35 }
 0x184   : > { %v803_v52 = vsel %vm801_vm0, %v2431_v36, %v802_v47  ;;  %v1451_v63 = vshrl.u32 %v2543_v60, %v1448_v27  ;;  %v3207_v12 = vshll.u32 %v1441_v54, 8  ;;  %v1450_v48 = vshll.u32 %v2542_v56, %v1447_v32 }
 0x185   : > { %v807_v8 = vsel %vm800_vm15, %v803_v52, %v806_v28  ;;  %v1620_v55 = vmul.f32 %v1619_v11, %v1617_v24  ;;  %v664_v10 = vshll.u32 %v663_v5, 30  ;;  %v1454_v15 = vshrl.u32 %v2544_v62, %v1448_v27 }
 0x186   : > { %v808_v3 = vsel %vm797_vm14, nan, %v807_v8  ;;  %v1457_v57 = vshrl.u32 %v2545_v0, %v1448_v27  ;;  %v1446_v43 = vshrl.u32 %v1445_v16, 5  ;;  %v1453_v41 = vshll.u32 %v2543_v60, %v1447_v32 }
 0x187   : > { %2060 = vst [vmem:[%s2978_s20 + $0x18] sm:$0xff] %v808_v3  ;;  %v1621_v17 = vxor.u32 2147483648, %v1620_v55  ;;  %v3215_v33 = vsub.s32 %v661_v34, %v664_v10  ;;  %v1452_v6 = vor.u32 %v1451_v63, %v1450_v48  ;;  %v1456_v14 = vshll.u32 %v2544_v62, %v1447_v32 }
 0x188   : > { %v1459_v18 = vshll.u32 %v2545_v0, %v1447_v32  ;;  %v1460_v37 = vshrl.u32 %v2546_v2, %v1448_v27  ;;  %vm603_vm2 = vcmp.lt.s32.totalorder %v3062_v46, 0  ;;  %v1462_v7 = vshll.u32 %v2546_v2, %v1447_v32 }
 0x189   : > { %v1622_v23 = vsel %vm1539_vm10, %v1621_v17, %v1620_v55  ;;  %v667_v50 = vsub.s32 0, %v3215_v33  ;;  %v1463_v19 = vshrl.u32 %v2547_v9, %v1448_v27  ;;  %v1455_v4 = vor.u32 %v1454_v15, %v1453_v41 }
 0x18a   : > { %v1625_v25 = vsel %vm3176_vm11, %v2984_v22, %v1622_v23  ;;  %v1458_v40 = vor.u32 %v1457_v57, %v1456_v14  ;;  %v1461_v42 = vor.u32 %v1460_v37, %v1459_v18  ;;  %v916_v29 = vand.u32 2139095040, %v3204_v61 }
 0x18b   : > { %2434 = vcosq.f32 %v1625_v25  ;;  %v2182_v44 = vmin.u32 %v667_v50, %v3215_v33  ;;  %v1464_v1 = vor.u32 %v1463_v19, %v1462_v7  ;;  %v687_v39 = vsub.s32 4, %v663_v5 }
 0x18c   : > { %2436 = vsinq.f32 %v1625_v25  ;;  %v1449_v31 = vshrl.u32 %v2542_v56, %v1448_v27  ;;  %vm1465_vm3 = vcmp.lt.s32.totalorder %v1446_v43, 1  ;;  %vm1466_vm4 = vcmp.lt.s32.totalorder %v1446_v43, 2 }
 0x18d   : > { %v669_v26 = vclz %v2182_v44  ;;  %vm1467_vm5 = vcmp.lt.s32.totalorder %v1446_v43, 3  ;;  %vm1468_vm6 = vcmp.lt.s32.totalorder %v1446_v43, 4  ;;  %v1473_v34 = vsel %vm1465_vm3, %v1452_v6, %v1455_v4 }
 0x18e   : > { %v1470_v59 = vsel %vm1468_vm6, %v1458_v40, 2102212464  ;;  %v1474_v16 = vsel %vm1468_vm6, %v1461_v42, 920167782  ;;  %v1477_v36 = vsel %vm1465_vm3, %v1455_v4, %v1458_v40  ;;  %v1469_v38 = vsel %vm1465_vm3, %v1449_v31, %v1452_v6  ;;  %v2291_v31 = vpop.f32.mrf.mxu1 }
 0x18f   : > { %v2183_v32 = vadd.s32 4294967294, %v669_v26  ;;  %v1475_v21 = vsel %vm1467_vm5, %v1458_v40, %v1474_v16  ;;  %v1478_v45 = vsel %vm1468_vm6, %v1464_v1, 1326507024  ;;  %v1471_v20 = vsel %vm1467_vm5, %v1455_v4, %v1470_v59 }
 0x190   : > { %v1476_v54 = vsel %vm1466_vm4, %v1473_v34, %v1475_v21  ;;  %v1479_v35 = vsel %vm1467_vm5, %v1461_v42, %v1478_v45  ;;  %v917_v47 = vshrl.u32 %v916_v29, 23  ;;  %v688_v52 = vsel %vm603_vm2, %v687_v39, %v663_v5 }
 0x191   : > { %vm2184_vm7 = vcmp.lt.s32.totalorder %v2183_v32, 0  ;;  %v1480_v27 = vsel %vm1466_vm4, %v1477_v36, %v1479_v35  ;;  %v3236_v28 = vmul.u32.u64.low %v3207_v12, %v1476_v54  ;;  %v3237_v24 = vmul.u32.u64.high %v3207_v12, %v1476_v54, %v3236_v28 }
 0x192   : > { %v672_v11 = vsel %vm2184_vm7, 0, %v2183_v32  ;;  %v3243_v63 = vmul.u32.u64.low %v3207_v12, %v1480_v27  ;;  %v3244_v8 = vmul.u32.u64.high %v3207_v12, %v1480_v27, %v3243_v63  ;;  %v1472_v3 = vsel %vm1466_vm4, %v1469_v38, %v1471_v20 }
 0x193   : > { %v673_v55 = vsub.s32 32, %v672_v11  ;;  %v677_v10 = vsub.s32 4294967266, %v672_v11  ;;  %v2193_v48 = vadd.s32 4294967169, %v917_v47  ;;  %vm3249_vm8 = vcmp.le.f32.partialorder %v601_v13, 0.7853982 }
 0x194   : > { %v674_v57 = vshll.u32 %v3215_v33, %v672_v11  ;;  %v913_v17 = vand.u32 2147483647, %v3204_v61  ;;  %v1491_v6 = vadd.s32 1, %v3237_v24  ;;  %v1631_v43 = vand.u32 3, %v3196_v49 }
 0x195   : > { %v675_v5 = vshrl.u32 %v3200_v51, %v673_v55  ;;  %v678_v41 = vadd.s32 127, %v677_v10  ;;  %v923_v14 = vadd.s32 1, %v2193_v48  ;;  %v690_v18 = vsel %vm3249_vm8, 0, %v688_v52 }
 0x196   : > { %v1488_v13 = vmul.u32 %v3207_v12, %v1472_v3  ;;  %vm1490_vm9 = vc.u32 %v3244_v8, %v3236_v28  ;;  %vm1629_vm10 = vweird.f32 %v2984_v22  ;;  %v694_v4 = vadd.s32 3, %v690_v18 }
 0x197   : > { %v676_v37 = vor.u32 %v675_v5, %v674_v57  ;;  %v679_v33 = vshll.u32 %v678_v41, 23  ;;  %v1492_v23 = vsel %vm1490_vm9, %v1491_v6, %v3237_v24  ;;  %vm924_vm11 = vcmp.gt.s32.totalorder %v923_v14, 0 }
 0x198   : > { %v2435_v51 = vpop.eup %2434  ;;  %v1493_v50 = vadd.s32 %v1492_v23, %v1488_v13  ;;  %v925_v7 = vsel %vm924_vm11, %v923_v14, 0  ;;  %v920_v12 = vand.u32 8388607, %v913_v17  ;;  %vm1636_vm12 = vcmp.eq.s32.totalorder %v1631_v43, 2 }
 0x199   : > { %v2437_v19 = vpop.eup %2436  ;;  %v1637_v49 = vxor.u32 2147483648, %v2435_v51  ;;  %v680_v25 = vor.u32 4788187, %v679_v33  ;;  %v927_v44 = vand.u32 31, %v925_v7  ;;  %vm1633_vm13 = vcmp.eq.s32.totalorder %v1631_v43, 0 }
 0x19a   : > { %v1634_v40 = vxor.u32 2147483648, %v2437_v19  ;;  %v1494_v42 = vadd.s32 536870912, %v1493_v50  ;;  %v683_v39 = vcvt.s32.f32 %v676_v37  ;;  %vm1632_vm14 = vcmp.lt.s32.totalorder %v1631_v43, 2 }
 0x19b   : > { %v1638_v1 = vsel %vm1636_vm12, %v1637_v49, %v2437_v19  ;;  %v681_v29 = vand.u32 2147483647, %v680_v25  ;;  %v928_v34 = vsub.s32 32, %v927_v44  ;;  %v3269_v32 = vand.u32 3, %v694_v4 }
 0x19c   : > { %v1635_v26 = vsel %vm1633_vm13, %v2435_v51, %v1634_v40  ;;  %v3267_v59 = vshrl.u32 %v1494_v42, 30  ;;  %v921_v38 = vor.u32 8388608, %v920_v12  ;;  %v930_v20 = vshll.u32 %v2542_v56, %v927_v44 }
 0x19d   : > { %v1639_v16 = vsel %vm1632_vm14, %v1635_v26, %v1638_v1  ;;  %v684_v36 = vmul.f32 %v683_v39, %v681_v29  ;;  %v3276_v54 = vadd.f32 %v3131_v30, %v2291_v31  ;;  %v931_v47 = vshrl.u32 %v2543_v60, %v928_v34 }
 0x19e   : > { %v1640_v21 = vsel %vm1629_vm10, nan, %v1639_v16  ;;  %v1496_v45 = vshll.u32 %v3267_v59, 30  ;;  %v934_v27 = vshrl.u32 %v2544_v62, %v928_v34  ;;  %v937_v24 = vshrl.u32 %v2545_v0, %v928_v34 }
 0x19f   : > { %2068 = vst [vmem:[%s2978_s20 + $0x58] sm:$0xff] %v1640_v21  ;;  %v685_v35 = vxor.u32 2147483648, %v684_v36  ;;  %v933_v22 = vshll.u32 %v2543_v60, %v927_v44  ;;  %v936_v52 = vshll.u32 %v2544_v62, %v927_v44  ;;  %v940_v63 = vshrl.u32 %v2546_v2, %v928_v34 }
 0x1a0   : > { %v3282_v11 = vsub.s32 %v1493_v50, %v1496_v45  ;;  %v926_v10 = vshrl.u32 %v925_v7, 5  ;;  %v932_v3 = vor.u32 %v931_v47, %v930_v20  ;;  %v939_v48 = vshll.u32 %v2545_v0, %v927_v44 }
 0x1a1   : > { %v686_v55 = vsel %vm603_vm2, %v685_v35, %v684_v36  ;;  %v935_v41 = vor.u32 %v934_v27, %v933_v22  ;;  %v938_v6 = vor.u32 %v937_v24, %v936_v52  ;;  %v942_v43 = vshll.u32 %v2546_v2, %v927_v44 }
 0x1a2   : > { %v689_v57 = vsel %vm3249_vm8, %v3062_v46, %v686_v55  ;;  %v1499_v5 = vsub.s32 0, %v3282_v11  ;;  %v941_v14 = vor.u32 %v940_v63, %v939_v48  ;;  %v943_v18 = vshrl.u32 %v2547_v9, %v928_v34 }
 0x1a3   : > { %2438 = vcosq.f32 %v689_v57  ;;  %v961_v37 = vshll.u32 %v921_v38, 8  ;;  %v1748_v33 = vand.u32 2139095040, %v3276_v54  ;;  %v929_v23 = vshrl.u32 %v2542_v56, %v928_v34 }
 0x1a4   : > { %2440 = vsinq.f32 %v689_v57  ;;  %v2214_v13 = vmin.u32 %v1499_v5, %v3282_v11  ;;  %v944_v15 = vor.u32 %v943_v18, %v942_v43  ;;  %vm945_vm15 = vcmp.lt.s32.totalorder %v926_v10, 1 }
 0x1a5   : > { %vm946_vm0 = vcmp.lt.s32.totalorder %v926_v10, 2  ;;  %vm947_vm1 = vcmp.lt.s32.totalorder %v926_v10, 3  ;;  %vm948_vm2 = vcmp.lt.s32.totalorder %v926_v10, 4  ;;  %v953_v50 = vsel %vm945_vm15, %v932_v3, %v935_v41 }
 0x1a6   : > { %v1501_v51 = vclz %v2214_v13  ;;  %v950_v7 = vsel %vm948_vm2, %v938_v6, 2102212464  ;;  %v954_v19 = vsel %vm948_vm2, %v941_v14, 920167782  ;;  %v957_v49 = vsel %vm945_vm15, %v935_v41, %v938_v6 }
 0x1a7   : > { %v958_v25 = vsel %vm948_vm2, %v944_v15, 1326507024  ;;  %v1519_v12 = vsub.s32 4, %v3267_v59  ;;  %v955_v40 = vsel %vm947_vm1, %v938_v6, %v954_v19  ;;  %v949_v44 = vsel %vm945_vm15, %v929_v23, %v932_v3 }
 0x1a8   : > { %v2215_v4 = vadd.s32 4294967294, %v1501_v51  ;;  %v959_v42 = vsel %vm947_vm1, %v941_v14, %v958_v25  ;;  %v956_v1 = vsel %vm946_vm0, %v953_v50, %v955_v40  ;;  %v1749_v39 = vshrl.u32 %v1748_v33, 23 }
 0x1a9   : > { %v960_v29 = vsel %vm946_vm0, %v957_v49, %v959_v42  ;;  %v951_v31 = vsel %vm947_vm1, %v935_v41, %v950_v7  ;;  %v3308_v36 = vmul.u32.u64.low %v961_v37, %v956_v1  ;;  %v3309_v38 = vmul.u32.u64.high %v961_v37, %v956_v1, %v3308_v36 }
 0x1aa   : > { %vm2216_vm3 = vcmp.lt.s32.totalorder %v2215_v4, 0  ;;  %v3305_v26 = vmul.u32.u64.low %v961_v37, %v960_v29  ;;  %v3306_v34 = vmul.u32.u64.high %v961_v37, %v960_v29, %v3305_v26  ;;  %v2225_v21 = vadd.s32 4294967169, %v1749_v39 }
 0x1ab   : > { %v1504_v16 = vsel %vm2216_vm3, 0, %v2215_v4  ;;  %vm3314_vm4 = vcmp.le.f32.partialorder %v1433_v53, 0.7853982  ;;  %v1489_v20 = vadd.s32 %v3236_v28, %v3244_v8  ;;  %vm693_vm5 = vweird.f32 %v3062_v46 }
 0x1ac   : > { %v1505_v35 = vsub.s32 32, %v1504_v16  ;;  %v1509_v47 = vsub.s32 4294967266, %v1504_v16  ;;  %vm696_vm6 = vcmp.lt.s32.totalorder %v3269_v32, 2  ;;  %vm1435_vm7 = vcmp.lt.s32.totalorder %v3134_v58, 0 }
 0x1ad   : > { %v952_v27 = vsel %vm946_vm0, %v949_v44, %v951_v31  ;;  %v1755_v24 = vadd.s32 1, %v2225_v21  ;;  %v1506_v22 = vshll.u32 %v3282_v11, %v1504_v16  ;;  %vm970_vm8 = vc.u32 %v3306_v34, %v3308_v36  ;;  %v334_v11 = vpop.f32.mrf.mxu0 }
 0x1ae   : > { %v1507_v53 = vshrl.u32 %v1489_v20, %v1505_v35  ;;  %v1510_v52 = vadd.s32 127, %v1509_v47  ;;  %vm697_vm9 = vcmp.eq.s32.totalorder %v3269_v32, 0  ;;  %v1520_v28 = vsel %vm1435_vm7, %v1519_v12, %v3267_v59 }
 0x1af   : > { %v971_v8 = vadd.s32 1, %v3309_v38  ;;  %vm1756_vm11 = vcmp.gt.s32.totalorder %v1755_v24, 0  ;;  %v968_v3 = vmul.u32 %v961_v37, %v952_v27  ;;  %v1745_v6 = vand.u32 2147483647, %v3276_v54 }
 0x1b0   : > { %v2439_v63 = vpop.eup %2438  ;;  %v1508_v55 = vor.u32 %v1507_v53, %v1506_v22  ;;  %v1511_v10 = vshll.u32 %v1510_v52, 23  ;;  %v1757_v48 = vsel %vm1756_vm11, %v1755_v24, 0  ;;  %vm700_vm10 = vcmp.eq.s32.totalorder %v3269_v32, 2 }
 0x1b1   : > { %v2441_v57 = vpop.eup %2440  ;;  %v701_v5 = vxor.u32 2147483648, %v2439_v63  ;;  %v972_v41 = vsel %vm970_vm8, %v971_v8, %v3309_v38  ;;  %v1759_v14 = vand.u32 31, %v1757_v48  ;;  %v1522_v33 = vsel %vm3314_vm4, 0, %v1520_v28 }
 0x1b2   : > { %v698_v43 = vxor.u32 2147483648, %v2441_v57  ;;  %v1512_v59 = vor.u32 4788187, %v1511_v10  ;;  %v973_v18 = vadd.s32 %v972_v41, %v968_v3  ;;  %v3338_v23 = vadd.f32 %v3131_v30, %v334_v11 }
 0x1b3   : > { %v702_v13 = vsel %vm700_vm10, %v701_v5, %v2441_v57  ;;  %v1760_v37 = vsub.s32 32, %v1759_v14  ;;  %v1515_v50 = vcvt.s32.f32 %v1508_v55  ;;  %v1752_v49 = vand.u32 8388607, %v1745_v6 }
 0x1b4   : > { %v699_v15 = vsel %vm697_vm9, %v2439_v63, %v698_v43  ;;  %v1513_v51 = vand.u32 2147483647, %v1512_v59  ;;  %v974_v7 = vadd.s32 536870912, %v973_v18  ;;  %v1758_v1 = vshrl.u32 %v1757_v48, 5 }
 0x1b5   : > { %v703_v19 = vsel %vm696_vm6, %v699_v15, %v702_v13  ;;  %v1763_v25 = vshrl.u32 %v2543_v60, %v1760_v37  ;;  %v1766_v4 = vshrl.u32 %v2544_v62, %v1760_v37  ;;  %v1769_v44 = vshrl.u32 %v2545_v0, %v1760_v37 }
 0x1b6   : > { %v704_v12 = vsel %vm693_vm5, nan, %v703_v19  ;;  %v1516_v40 = vmul.f32 %v1515_v50, %v1513_v51  ;;  %v975_v42 = vshrl.u32 %v974_v7, 30  ;;  %v1762_v29 = vshll.u32 %v2542_v56, %v1759_v14 }
 0x1b7   : > { %2059 = vst [vmem:[%s2978_s20 + $0x10] sm:$0xff] %v704_v12  ;;  %v1768_v32 = vshll.u32 %v2544_v62, %v1759_v14  ;;  %v1772_v39 = vshrl.u32 %v2546_v2, %v1760_v37  ;;  %v1765_v16 = vshll.u32 %v2543_v60, %v1759_v14  ;;  %v1771_v38 = vshll.u32 %v2545_v0, %v1759_v14 }
 0x1b8   : > { %v1517_v31 = vxor.u32 2147483648, %v1516_v40  ;;  %v976_v26 = vshll.u32 %v975_v42, 30  ;;  %v1764_v46 = vor.u32 %v1763_v25, %v1762_v29  ;;  %v1774_v20 = vshll.u32 %v2546_v2, %v1759_v14 }
 0x1b9   : > { %v1770_v21 = vor.u32 %v1769_v44, %v1768_v32  ;;  %v1775_v35 = vshrl.u32 %v2547_v9, %v1760_v37  ;;  %v1767_v24 = vor.u32 %v1766_v4, %v1765_v16  ;;  %v1773_v22 = vor.u32 %v1772_v39, %v1771_v38 }
 0x1ba   : > { %v1518_v47 = vsel %vm1435_vm7, %v1517_v31, %v1516_v40  ;;  %v3361_v27 = vsub.s32 %v973_v18, %v976_v26  ;;  %v1526_v52 = vadd.s32 3, %v1522_v33  ;;  %v1753_v28 = vor.u32 8388608, %v1752_v49 }
 0x1bb   : > { %v1521_v53 = vsel %vm3314_vm4, %v3134_v58, %v1518_v47  ;;  %v1776_v8 = vor.u32 %v1775_v35, %v1774_v20  ;;  %vm1780_vm12 = vcmp.lt.s32.totalorder %v1758_v1, 4  ;;  %v812_v55 = vand.u32 2139095040, %v3338_v23 }
 0x1bc   : > { %2442 = vcosq.f32 %v1521_v53  ;;  %v979_v63 = vsub.s32 0, %v3361_v27  ;;  %v1761_v10 = vshrl.u32 %v2542_v56, %v1760_v37  ;;  %vm1777_vm13 = vcmp.lt.s32.totalorder %v1758_v1, 1 }
 0x1bd   : > { %2444 = vsinq.f32 %v1521_v53  ;;  %v1782_v3 = vsel %vm1780_vm12, %v1770_v21, 2102212464  ;;  %vm1779_vm14 = vcmp.lt.s32.totalorder %v1758_v1, 3  ;;  %v1785_v11 = vsel %vm1777_vm13, %v1764_v46, %v1767_v24 }
 0x1be   : > { %v2194_v48 = vmin.u32 %v979_v63, %v3361_v27  ;;  %v1786_v45 = vsel %vm1780_vm12, %v1773_v22, 920167782  ;;  %v999_v57 = vsub.s32 4, %v975_v42  ;;  %v1789_v41 = vsel %vm1777_vm13, %v1767_v24, %v1770_v21 }
 0x1bf   : > { %v1787_v5 = vsel %vm1779_vm14, %v1770_v21, %v1786_v45  ;;  %v1790_v14 = vsel %vm1780_vm12, %v1776_v8, 1326507024  ;;  %vm1778_vm15 = vcmp.lt.s32.totalorder %v1758_v1, 2  ;;  %v1781_v59 = vsel %vm1777_vm13, %v1761_v10, %v1764_v46 }
 0x1c0   : > { %v981_v43 = vclz %v2194_v48  ;;  %v1783_v18 = vsel %vm1779_vm14, %v1767_v24, %v1782_v3  ;;  %v1788_v13 = vsel %vm1778_vm15, %v1785_v11, %v1787_v5  ;;  %v1791_v33 = vsel %vm1779_vm14, %v1773_v22, %v1790_v14  ;;  %v374_v14 = vpop.f32.mrf.mxu1 }
 0x1c1   : > { %v1793_v15 = vshll.u32 %v1753_v28, 8  ;;  %v813_v51 = vshrl.u32 %v812_v55, 23  ;;  %vm915_vm0 = vcmp.lt.s32.totalorder %v3204_v61, 0  ;;  %v1792_v50 = vsel %vm1778_vm15, %v1789_v41, %v1791_v33 }
 0x1c2   : > { %v2195_v37 = vadd.s32 4294967294, %v981_v43  ;;  %v1000_v4 = vsel %vm915_vm0, %v999_v57, %v975_v42  ;;  %v1784_v12 = vsel %vm1778_vm15, %v1781_v59, %v1783_v18  ;;  %v1527_v44 = vand.u32 3, %v1526_v52 }
 0x1c3   : > { %v3371_v7 = vmul.u32.u64.low %v1793_v15, %v1792_v50  ;;  %v3372_v19 = vmul.u32.u64.high %v1793_v15, %v1792_v50, %v3371_v7  ;;  %v3374_v49 = vmul.u32.u64.low %v1793_v15, %v1788_v13  ;;  %v3375_v25 = vmul.u32.u64.high %v1793_v15, %v1788_v13, %v3374_v49 }
 0x1c4   : > { %vm2196_vm1 = vcmp.lt.s32.totalorder %v2195_v37, 0  ;;  %v2189_v40 = vadd.s32 4294967169, %v813_v51  ;;  %vm3382_vm2 = vcmp.le.f32.partialorder %v913_v17, 0.7853982  ;;  %v809_v32 = vand.u32 2147483647, %v3338_v23 }
 0x1c5   : > { %v984_v29 = vsel %vm2196_vm1, 0, %v2195_v37  ;;  %v969_v39 = vadd.s32 %v3308_v36, %v3306_v34  ;;  %v1002_v42 = vsel %vm3382_vm2, 0, %v1000_v4  ;;  %v1800_v38 = vmul.u32 %v1793_v15, %v1784_v12 }
 0x1c6   : > { %v985_v31 = vsub.s32 32, %v984_v29  ;;  %v989_v26 = vsub.s32 4294967266, %v984_v29  ;;  %v819_v16 = vadd.s32 1, %v2189_v40  ;;  %vm1802_vm3 = vc.u32 %v3372_v19, %v3374_v49 }
 0x1c7   : > { %v1803_v17 = vadd.s32 1, %v3375_v25  ;;  %v986_v46 = vshll.u32 %v3361_v27, %v984_v29  ;;  %vm1532_vm5 = vcmp.eq.s32.totalorder %v1527_v44, 2  ;;  %v1006_v8 = vadd.s32 3, %v1002_v42 }
 0x1c8   : > { %v987_v21 = vshrl.u32 %v969_v39, %v985_v31  ;;  %v990_v20 = vadd.s32 127, %v989_v26  ;;  %vm820_vm4 = vcmp.gt.s32.totalorder %v819_v16, 0  ;;  %v816_v63 = vand.u32 8388607, %v809_v32 }
 0x1c9   : > { %v2443_v35 = vpop.eup %2442  ;;  %v1804_v34 = vsel %vm1802_vm3, %v1803_v17, %v3375_v25  ;;  %v821_v36 = vsel %vm820_vm4, %v819_v16, 0  ;;  %vm1529_vm6 = vcmp.eq.s32.totalorder %v1527_v44, 0  ;;  %vm1525_vm7 = vweird.f32 %v3134_v58 }
 0x1ca   : > { %v2445_v47 = vpop.eup %2444  ;;  %v1533_v24 = vxor.u32 2147483648, %v2443_v35  ;;  %v988_v22 = vor.u32 %v987_v21, %v986_v46  ;;  %v991_v53 = vshll.u32 %v990_v20, 23  ;;  %v1805_v52 = vadd.s32 %v1804_v34, %v1800_v38 }
 0x1cb   : > { %v1530_v28 = vxor.u32 2147483648, %v2445_v47  ;;  %v823_v55 = vand.u32 31, %v821_v36  ;;  %vm1528_vm8 = vcmp.lt.s32.totalorder %v1527_v44, 2  ;;  %v3401_v59 = vand.u32 3, %v1006_v8 }
 0x1cc   : > { %v1534_v27 = vsel %vm1532_vm5, %v1533_v24, %v2445_v47  ;;  %v992_v10 = vor.u32 4788187, %v991_v53  ;;  %v1806_v3 = vadd.s32 536870912, %v1805_v52  ;;  %v995_v5 = vcvt.s32.f32 %v988_v22 }
 0x1cd   : > { %v1531_v48 = vsel %vm1529_vm6, %v2443_v35, %v1530_v28  ;;  %v824_v11 = vsub.s32 32, %v823_v55  ;;  %v817_v18 = vor.u32 8388608, %v816_v63  ;;  %v822_v51 = vshrl.u32 %v821_v36, 5 }
 0x1ce   : > { %v1535_v45 = vsel %vm1528_vm8, %v1531_v48, %v1534_v27  ;;  %v993_v57 = vand.u32 2147483647, %v992_v10  ;;  %v3399_v41 = vshrl.u32 %v1806_v3, 30  ;;  %v3410_v7 = vadd.f32 %v3131_v30, %v374_v14 }
 0x1cf   : > { %v1536_v43 = vsel %vm1525_vm7, nan, %v1535_v45  ;;  %v827_v15 = vshrl.u32 %v2543_v60, %v824_v11  ;;  %v830_v58 = vshrl.u32 %v2544_v62, %v824_v11  ;;  %v833_v37 = vshrl.u32 %v2545_v0, %v824_v11 }
 0x1d0   : > { %2067 = vst [vmem:[%s2978_s20 + $0x50] sm:$0xff] %v1536_v43  ;;  %v996_v13 = vmul.f32 %v995_v5, %v993_v57  ;;  %v1808_v33 = vshll.u32 %v3399_v41, 30  ;;  %v836_v50 = vshrl.u32 %v2546_v2, %v824_v11  ;;  %v826_v12 = vshll.u32 %v2542_v56, %v823_v55 }
 0x1d1   : > { %v829_v40 = vshll.u32 %v2543_v60, %v823_v55  ;;  %v832_v44 = vshll.u32 %v2544_v62, %v823_v55  ;;  %v835_v29 = vshll.u32 %v2545_v0, %v823_v55  ;;  %v838_v39 = vshll.u32 %v2546_v2, %v823_v55 }
 0x1d2   : > { %v997_v25 = vxor.u32 2147483648, %v996_v13  ;;  %v3412_v4 = vsub.s32 %v1805_v52, %v1808_v33  ;;  %v839_v31 = vshrl.u32 %v2547_v9, %v824_v11  ;;  %v828_v16 = vor.u32 %v827_v15, %v826_v12 }
 0x1d3   : > { %v831_v42 = vor.u32 %v830_v58, %v829_v40  ;;  %vm1747_vm9 = vcmp.lt.s32.totalorder %v3276_v54, 0  ;;  %v834_v17 = vor.u32 %v833_v37, %v832_v44  ;;  %v837_v46 = vor.u32 %v836_v50, %v835_v29 }
 0x1d4   : > { %v998_v26 = vsel %vm915_vm0, %v997_v25, %v996_v13  ;;  %v1811_v30 = vsub.s32 0, %v3412_v4  ;;  %v840_v21 = vor.u32 %v839_v31, %v838_v39  ;;  %v857_v35 = vshll.u32 %v817_v18, 8 }
 0x1d5   : > { %v1001_v38 = vsel %vm3382_vm2, %v3204_v61, %v998_v26  ;;  %v1644_v34 = vand.u32 2139095040, %v3410_v7  ;;  %v1831_v36 = vsub.s32 4, %v3399_v41  ;;  %v825_v47 = vshrl.u32 %v2542_v56, %v824_v11 }
 0x1d6   : > { %2446 = vcosq.f32 %v1001_v38  ;;  %v2226_v20 = vmin.u32 %v1811_v30, %v3412_v4  ;;  %vm841_vm11 = vcmp.lt.s32.totalorder %v822_v51, 1  ;;  %vm843_vm10 = vcmp.lt.s32.totalorder %v822_v51, 3 }
 0x1d7   : > { %2448 = vsinq.f32 %v1001_v38  ;;  %vm844_vm12 = vcmp.lt.s32.totalorder %v822_v51, 4  ;;  %v849_v1 = vsel %vm841_vm11, %v828_v16, %v831_v42  ;;  %v853_v52 = vsel %vm841_vm11, %v831_v42, %v834_v17 }
 0x1d8   : > { %v1813_v24 = vclz %v2226_v20  ;;  %v846_v22 = vsel %vm844_vm12, %v834_v17, 2102212464  ;;  %v850_v53 = vsel %vm844_vm12, %v837_v46, 920167782  ;;  %v854_v28 = vsel %vm844_vm12, %v840_v21, 1326507024 }
 0x1d9   : > { %vm842_vm13 = vcmp.lt.s32.totalorder %v822_v51, 2  ;;  %v851_v63 = vsel %vm843_vm10, %v834_v17, %v850_v53  ;;  %v855_v55 = vsel %vm843_vm10, %v837_v46, %v854_v28  ;;  %v845_v27 = vsel %vm841_vm11, %v825_v47, %v828_v16  ;;  %v2282_v51 = vpop.f32.mrf.mxu0  ;;  %v3470_v46 = vld [vmem:[%s3866_s2] ss:$0 sm:$0xff] }
 0x1da   : > { %v2227_v8 = vadd.s32 4294967294, %v1813_v24  ;;  %v852_v10 = vsel %vm842_vm13, %v849_v1, %v851_v63  ;;  %v856_v3 = vsel %vm842_vm13, %v853_v52, %v855_v55  ;;  %v1645_v48 = vshrl.u32 %v1644_v34, 23 }
 0x1db   : > { %v847_v11 = vsel %vm843_vm10, %v831_v42, %v846_v22  ;;  %v3436_v45 = vmul.u32.u64.low %v857_v35, %v856_v3  ;;  %v3437_v57 = vmul.u32.u64.high %v857_v35, %v856_v3, %v3436_v45  ;;  %v1801_v13 = vadd.s32 %v3374_v49, %v3372_v19 }
 0x1dc   : > { %vm2228_vm14 = vcmp.lt.s32.totalorder %v2227_v8, 0  ;;  %v3439_v14 = vmul.u32.u64.low %v857_v35, %v852_v10  ;;  %v3440_v43 = vmul.u32.u64.high %v857_v35, %v852_v10, %v3439_v14  ;;  %v2221_v18 = vadd.s32 4294967169, %v1645_v48 }
 0x1dd   : > { %v1816_v5 = vsel %vm2228_vm14, 0, %v2227_v8  ;;  %v1832_v58 = vsel %vm1747_vm9, %v1831_v36, %v3399_v41  ;;  %vm1008_vm15 = vcmp.lt.s32.totalorder %v3401_v59, 2  ;;  %vm3451_vm0 = vcmp.le.f32.partialorder %v1745_v6, 0.7853982 }
 0x1de   : > { %v1817_v33 = vsub.s32 32, %v1816_v5  ;;  %v1821_v15 = vsub.s32 4294967266, %v1816_v5  ;;  %v848_v50 = vsel %vm842_vm13, %v845_v27, %v847_v11  ;;  %v1651_v25 = vadd.s32 1, %v2221_v18 }
 0x1df   : > { %vm1005_vm1 = vweird.f32 %v3204_v61  ;;  %v1818_v19 = vshll.u32 %v3412_v4, %v1816_v5  ;;  %vm866_vm2 = vc.u32 %v3437_v57, %v3439_v14  ;;  %v1834_v41 = vsel %vm3451_vm0, 0, %v1832_v58 }
 0x1e0   : > { %v1819_v49 = vshrl.u32 %v1801_v13, %v1817_v33  ;;  %v1822_v12 = vadd.s32 127, %v1821_v15  ;;  %v867_v6 = vadd.s32 1, %v3440_v43  ;;  %v1641_v40 = vand.u32 2147483647, %v3410_v7 }
 0x1e1   : > { %vm1652_vm3 = vcmp.gt.s32.totalorder %v1651_v25, 0  ;;  %v864_v39 = vmul.u32 %v857_v35, %v848_v50  ;;  %vm1009_vm4 = vcmp.eq.s32.totalorder %v3401_v59, 0  ;;  %vm1012_vm5 = vcmp.eq.s32.totalorder %v3401_v59, 2 }
 0x1e2   : > { %v1820_v44 = vor.u32 %v1819_v49, %v1818_v19  ;;  %v1823_v29 = vshll.u32 %v1822_v12, 23  ;;  %v1653_v31 = vsel %vm1652_vm3, %v1651_v25, 0  ;;  %v868_v4 = vsel %vm866_vm2, %v867_v6, %v3440_v43 }
 0x1e3   : > { %v2447_v26 = vpop.eup %2446  ;;  %v1655_v30 = vand.u32 31, %v1653_v31  ;;  %v869_v17 = vadd.s32 %v868_v4, %v864_v39  ;;  %v3473_v21 = vadd.f32 %v3470_v46, %v2282_v51  ;;  %v3475_v35 = vadd.s32 3, %v1834_v41 }
 0x1e4   : > { %v2449_v16 = vpop.eup %2448  ;;  %v1013_v42 = vxor.u32 2147483648, %v2447_v26  ;;  %v1824_v38 = vor.u32 4788187, %v1823_v29  ;;  %v1648_v34 = vand.u32 8388607, %v1641_v40  ;;  %v1827_v1 = vcvt.s32.f32 %v1820_v44 }
 0x1e5   : > { %v1010_v20 = vxor.u32 2147483648, %v2449_v16  ;;  %v1656_v36 = vsub.s32 32, %v1655_v30  ;;  %v870_v22 = vadd.s32 536870912, %v869_v17  ;;  %v1658_v52 = vshll.u32 %v2542_v56, %v1655_v30 }
 0x1e6   : > { %v1014_v47 = vsel %vm1012_vm5, %v1013_v42, %v2449_v16  ;;  %v1825_v24 = vand.u32 2147483647, %v1824_v38  ;;  %v1649_v48 = vor.u32 8388608, %v1648_v34  ;;  %v1654_v11 = vshrl.u32 %v1653_v31, 5 }
 0x1e7   : > { %v1011_v53 = vsel %vm1009_vm4, %v2447_v26, %v1010_v20  ;;  %v1659_v28 = vshrl.u32 %v2543_v60, %v1656_v36  ;;  %v1662_v8 = vshrl.u32 %v2544_v62, %v1656_v36  ;;  %v3486_v27 = vshrl.u32 %v870_v22, 30 }
 0x1e8   : > { %v1015_v63 = vsel %vm1008_vm15, %v1011_v53, %v1014_v47  ;;  %v1828_v55 = vmul.f32 %v1827_v1, %v1825_v24  ;;  %v1665_v10 = vshrl.u32 %v2545_v0, %v1656_v36  ;;  %v1661_v45 = vshll.u32 %v2543_v60, %v1655_v30  ;;  %v2294_v1 = vpop.f32.mrf.mxu1 }
 0x1e9   : > { %v1016_v3 = vsel %vm1005_vm1, nan, %v1015_v63  ;;  %v872_v43 = vshll.u32 %v3486_v27, 30  ;;  %v1660_v18 = vor.u32 %v1659_v28, %v1658_v52  ;;  %v1664_v59 = vshll.u32 %v2544_v62, %v1655_v30 }
 0x1ea   : > { %2062 = vst [vmem:[%s2978_s20 + $0x28] sm:$0xff] %v1016_v3  ;;  %v1829_v5 = vxor.u32 2147483648, %v1828_v55  ;;  %v1667_v13 = vshll.u32 %v2545_v0, %v1655_v30  ;;  %v1668_v33 = vshrl.u32 %v2546_v2, %v1656_v36  ;;  %v1670_v15 = vshll.u32 %v2546_v2, %v1655_v30 }
 0x1eb   : > { %v1671_v61 = vshrl.u32 %v2547_v9, %v1656_v36  ;;  %v3501_v50 = vsub.s32 %v869_v17, %v872_v43  ;;  %v1663_v25 = vor.u32 %v1662_v8, %v1661_v45  ;;  %v1666_v19 = vor.u32 %v1665_v10, %v1664_v59 }
 0x1ec   : > { %v1830_v58 = vsel %vm1747_vm9, %v1829_v5, %v1828_v55  ;;  %v1669_v12 = vor.u32 %v1668_v33, %v1667_v13  ;;  %v1121_v6 = vand.u32 2147483647, %v3473_v21  ;;  %v1657_v44 = vshrl.u32 %v2542_v56, %v1656_v36 }
 0x1ed   : > { %v1833_v49 = vsel %vm3451_vm0, %v3276_v54, %v1830_v58  ;;  %v1672_v41 = vor.u32 %v1671_v61, %v1670_v15  ;;  %v875_v51 = vsub.s32 0, %v3501_v50  ;;  %v1124_v29 = vand.u32 2139095040, %v3473_v21 }
 0x1ee   : > { %2450 = vcosq.f32 %v1833_v49  ;;  %vm811_vm6 = vcmp.lt.s32.totalorder %v3338_v23, 0  ;;  %vm1673_vm7 = vcmp.lt.s32.totalorder %v1654_v11, 1  ;;  %vm1675_vm8 = vcmp.lt.s32.totalorder %v1654_v11, 3 }
 0x1ef   : > { %2452 = vsinq.f32 %v1833_v49  ;;  %vm1676_vm9 = vcmp.lt.s32.totalorder %v1654_v11, 4  ;;  %v2190_v37 = vmin.u32 %v875_v51, %v3501_v50  ;;  %v1681_v31 = vsel %vm1673_vm7, %v1660_v18, %v1663_v25 }
 0x1f0   : > { %v1678_v39 = vsel %vm1676_vm9, %v1666_v19, 2102212464  ;;  %v1682_v26 = vsel %vm1676_vm9, %v1669_v12, 920167782  ;;  %v1685_v30 = vsel %vm1673_vm7, %v1663_v25, %v1666_v19  ;;  %v1686_v16 = vsel %vm1676_vm9, %v1672_v41, 1326507024 }
 0x1f1   : > { %v1683_v4 = vsel %vm1675_vm8, %v1666_v19, %v1682_v26  ;;  %v1689_v42 = vshll.u32 %v1649_v48, 8  ;;  %v877_v38 = vclz %v2190_v37  ;;  %v895_v17 = vsub.s32 4, %v3486_v27 }
 0x1f2   : > { %vm1674_vm11 = vcmp.lt.s32.totalorder %v1654_v11, 2  ;;  %v1677_v20 = vsel %vm1673_vm7, %v1657_v44, %v1660_v18  ;;  %v1679_v34 = vsel %vm1675_vm8, %v1663_v25, %v1678_v39  ;;  %v1687_v47 = vsel %vm1675_vm8, %v1669_v12, %v1686_v16 }
 0x1f3   : > { %v1684_v36 = vsel %vm1674_vm11, %v1681_v31, %v1683_v4  ;;  %v1125_v24 = vshrl.u32 %v1124_v29, 23  ;;  %v2191_v22 = vadd.s32 4294967294, %v877_v38  ;;  %v1688_v53 = vsel %vm1674_vm11, %v1685_v30, %v1687_v47 }
 0x1f4   : > { %v3516_v52 = vmul.u32.u64.low %v1689_v42, %v1684_v36  ;;  %v3517_v28 = vmul.u32.u64.high %v1689_v42, %v1684_v36, %v3516_v52  ;;  %vm3521_vm10 = vcmp.le.f32.partialorder %v809_v32, 0.7853982  ;;  %v1839_v3 = vand.u32 3, %v3475_v35 }
 0x1f5   : > { %v3525_v63 = vmul.u32.u64.low %v1689_v42, %v1688_v53  ;;  %v3526_v55 = vmul.u32.u64.high %v1689_v42, %v1688_v53, %v3525_v63  ;;  %v2201_v10 = vadd.s32 4294967169, %v1125_v24  ;;  %vm2192_vm12 = vcmp.lt.s32.totalorder %v2191_v22, 0 }
 0x1f6   : > { %v1680_v48 = vsel %vm1674_vm11, %v1677_v20, %v1679_v34  ;;  %v3530_v11 = vadd.f32 %v3470_v46, %v2294_v1  ;;  %v865_v45 = vadd.s32 %v3439_v14, %v3437_v57  ;;  %v880_v5 = vsel %vm2192_vm12, 0, %v2191_v22 }
 0x1f7   : > { %v3536_v32 = vand.u32 8388607, %v1121_v6  ;;  %v1131_v43 = vadd.s32 1, %v2201_v10  ;;  %vm1837_vm13 = vweird.f32 %v3276_v54  ;;  %v881_v18 = vsub.s32 32, %v880_v5 }
 0x1f8   : > { %v885_v59 = vsub.s32 4294967266, %v880_v5  ;;  %v896_v35 = vsel %vm811_vm6, %v895_v17, %v3486_v27  ;;  %v1699_v13 = vadd.s32 1, %v3517_v28  ;;  %v882_v33 = vshll.u32 %v3501_v50, %v880_v5 }
 0x1f9   : > { %v1696_v15 = vmul.u32 %v1689_v42, %v1680_v48  ;;  %vm1698_vm14 = vc.u32 %v3526_v55, %v3516_v52  ;;  %vm1132_vm15 = vcmp.gt.s32.totalorder %v1131_v43, 0  ;;  %v883_v57 = vshrl.u32 %v865_v45, %v881_v18 }
 0x1fa   : > { %v886_v14 = vadd.s32 127, %v885_v59  ;;  %v1700_v61 = vsel %vm1698_vm14, %v1699_v13, %v3517_v28  ;;  %v1133_v58 = vsel %vm1132_vm15, %v1131_v43, 0  ;;  %vm1840_vm0 = vcmp.lt.s32.totalorder %v1839_v3, 2 }
 0x1fb   : > { %v2451_v25 = vpop.eup %2450  ;;  %v898_v19 = vsel %vm3521_vm10, 0, %v896_v35  ;;  %v1701_v49 = vadd.s32 %v1700_v61, %v1696_v15  ;;  %v1135_v27 = vand.u32 31, %v1133_v58  ;;  %vm1841_vm1 = vcmp.eq.s32.totalorder %v1839_v3, 0 }
 0x1fc   : > { %v2453_v12 = vpop.eup %2452  ;;  %v1845_v41 = vxor.u32 2147483648, %v2451_v25  ;;  %v884_v50 = vor.u32 %v883_v57, %v882_v33  ;;  %v887_v51 = vshll.u32 %v886_v14, 23  ;;  %vm1844_vm2 = vcmp.eq.s32.totalorder %v1839_v3, 2 }
 0x1fd   : > { %v1842_v44 = vxor.u32 2147483648, %v2453_v12  ;;  %v1702_v29 = vadd.s32 536870912, %v1701_v49  ;;  %v1136_v37 = vsub.s32 32, %v1135_v27  ;;  %v3548_v26 = vadd.s32 3, %v898_v19 }
 0x1fe   : > { %v1846_v39 = vsel %vm1844_vm2, %v1845_v41, %v2453_v12  ;;  %v888_v31 = vor.u32 4788187, %v887_v51  ;;  %v1129_v4 = vor.u32 8388608, %v3536_v32  ;;  %v1953_v42 = vand.u32 2147483647, %v3530_v11 }
 0x1ff   : > { %v1843_v30 = vsel %vm1841_vm1, %v2451_v25, %v1842_v44  ;;  %v1703_v16 = vshrl.u32 %v1702_v29, 30  ;;  %v1956_v38 = vand.u32 2139095040, %v3530_v11  ;;  %v891_v34 = vcvt.s32.f32 %v884_v50 }
 0x200   : > { %v1847_v17 = vsel %vm1840_vm0, %v1843_v30, %v1846_v39  ;;  %v889_v20 = vand.u32 2147483647, %v888_v31  ;;  %v1139_v36 = vshrl.u32 %v2543_v60, %v1136_v37  ;;  %v3558_v24 = vadd.s32 %v3516_v52, %v3526_v55 }
 0x201   : > { %v1848_v47 = vsel %vm1837_vm13, nan, %v1847_v17  ;;  %v1704_v1 = vshll.u32 %v1703_v16, 30  ;;  %v1142_v22 = vshrl.u32 %v2544_v62, %v1136_v37  ;;  %v1134_v28 = vshrl.u32 %v1133_v58, 5 }
 0x202   : > { %2070 = vst [vmem:[%s2978_s20 + $0x68] sm:$0xff] %v1848_v47  ;;  %v892_v53 = vmul.f32 %v891_v34, %v889_v20  ;;  %v1138_v63 = vshll.u32 %v2542_v56, %v1135_v27  ;;  %v1145_v10 = vshrl.u32 %v2545_v0, %v1136_v37  ;;  %v1141_v48 = vshll.u32 %v2543_v60, %v1135_v27 }
 0x203   : > { %v3564_v3 = vsub.s32 %v1701_v49, %v1704_v1  ;;  %v1144_v54 = vshll.u32 %v2544_v62, %v1135_v27  ;;  %v1148_v45 = vshrl.u32 %v2546_v2, %v1136_v37  ;;  %v1147_v5 = vshll.u32 %v2545_v0, %v1135_v27 }
 0x204   : > { %v893_v52 = vxor.u32 2147483648, %v892_v53  ;;  %v1140_v55 = vor.u32 %v1139_v36, %v1138_v63  ;;  %v1151_v32 = vshrl.u32 %v2547_v9, %v1136_v37  ;;  %vm1643_vm3 = vcmp.lt.s32.totalorder %v3410_v7, 0 }
 0x205   : > { %v1707_v43 = vsub.s32 0, %v3564_v3  ;;  %v1143_v18 = vor.u32 %v1142_v22, %v1141_v48  ;;  %v1146_v59 = vor.u32 %v1145_v10, %v1144_v54  ;;  %v1150_v35 = vshll.u32 %v2546_v2, %v1135_v27 }
 0x206   : > { %v894_v13 = vsel %vm811_vm6, %v893_v52, %v892_v53  ;;  %v1149_v33 = vor.u32 %v1148_v45, %v1147_v5  ;;  %v1169_v15 = vshll.u32 %v1129_v4, 8  ;;  %v1957_v57 = vshrl.u32 %v1956_v38, 23 }
 0x207   : > { %v897_v14 = vsel %vm3521_vm10, %v3338_v23, %v894_v13  ;;  %v2222_v61 = vmin.u32 %v1707_v43, %v3564_v3  ;;  %v1137_v58 = vshrl.u32 %v2542_v56, %v1136_v37  ;;  %v1152_v25 = vor.u32 %v1151_v32, %v1150_v35 }
 0x208   : > { %2454 = vcosq.f32 %v897_v14  ;;  %v1727_v19 = vsub.s32 4, %v1703_v16  ;;  %vm1153_vm4 = vcmp.lt.s32.totalorder %v1134_v28, 1  ;;  %vm1156_vm5 = vcmp.lt.s32.totalorder %v1134_v28, 4 }
 0x209   : > { %2456 = vsinq.f32 %v897_v14  ;;  %v1709_v49 = vclz %v2222_v61  ;;  %v1158_v27 = vsel %vm1156_vm5, %v1146_v59, 2102212464  ;;  %v1161_v12 = vsel %vm1153_vm4, %v1140_v55, %v1143_v18 }
 0x20a   : > { %vm1154_vm6 = vcmp.lt.s32.totalorder %v1134_v28, 2  ;;  %vm1155_vm7 = vcmp.lt.s32.totalorder %v1134_v28, 3  ;;  %v1162_v41 = vsel %vm1156_vm5, %v1149_v33, 920167782  ;;  %v1165_v50 = vsel %vm1153_vm4, %v1143_v18, %v1146_v59 }
 0x20b   : > { %v2223_v51 = vadd.s32 4294967294, %v1709_v49  ;;  %v1157_v8 = vsel %vm1153_vm4, %v1137_v58, %v1140_v55  ;;  %v1163_v44 = vsel %vm1155_vm7, %v1146_v59, %v1162_v41  ;;  %v1166_v29 = vsel %vm1156_vm5, %v1152_v25, 1326507024 }
 0x20c   : > { %v1159_v39 = vsel %vm1155_vm7, %v1143_v18, %v1158_v27  ;;  %v1164_v37 = vsel %vm1154_vm6, %v1161_v12, %v1163_v44  ;;  %v1167_v31 = vsel %vm1155_vm7, %v1149_v33, %v1166_v29  ;;  %v2233_v4 = vadd.s32 4294967169, %v1957_v57 }
 0x20d   : > { %vm2224_vm8 = vcmp.lt.s32.totalorder %v2223_v51, 0  ;;  %v1168_v30 = vsel %vm1154_vm6, %v1165_v50, %v1167_v31  ;;  %v3583_v38 = vmul.u32.u64.low %v1169_v15, %v1164_v37  ;;  %v3584_v17 = vmul.u32.u64.high %v1169_v15, %v1164_v37, %v3583_v38 }
 0x20e   : > { %v1712_v20 = vsel %vm2224_vm8, 0, %v2223_v51  ;;  %v1728_v34 = vsel %vm1643_vm3, %v1727_v19, %v1703_v16  ;;  %v3589_v36 = vmul.u32.u64.low %v1169_v15, %v1168_v30  ;;  %v3590_v47 = vmul.u32.u64.high %v1169_v15, %v1168_v30, %v3589_v36 }
 0x20f   : > { %v1713_v1 = vsub.s32 32, %v1712_v20  ;;  %v1717_v22 = vsub.s32 4294967266, %v1712_v20  ;;  %v1160_v53 = vsel %vm1154_vm6, %v1157_v8, %v1159_v39  ;;  %v1963_v63 = vadd.s32 1, %v2233_v4 }
 0x210   : > { %v903_v10 = vand.u32 3, %v3548_v26  ;;  %vm3596_vm9 = vcmp.le.f32.partialorder %v1641_v40, 0.7853982  ;;  %v1714_v54 = vshll.u32 %v3564_v3, %v1712_v20  ;;  %v1179_v52 = vadd.s32 1, %v3584_v17 }
 0x211   : > { %v1715_v16 = vshrl.u32 %v3558_v24, %v1713_v1  ;;  %v1718_v45 = vadd.s32 127, %v1717_v22  ;;  %vm1964_vm11 = vcmp.gt.s32.totalorder %v1963_v63, 0  ;;  %v1730_v28 = vsel %vm3596_vm9, 0, %v1728_v34  ;;  %v344_v22 = vpop.f32.mrf.mxu0 }
 0x212   : > { %v1176_v55 = vmul.u32 %v1169_v15, %v1160_v53  ;;  %vm1178_vm10 = vc.u32 %v3590_v47, %v3583_v38  ;;  %v1965_v26 = vsel %vm1964_vm11, %v1963_v63, 0  ;;  %v1960_v3 = vand.u32 8388607, %v1953_v42 }
 0x213   : > { %v1716_v40 = vor.u32 %v1715_v16, %v1714_v54  ;;  %v1719_v5 = vshll.u32 %v1718_v45, 23  ;;  %v1180_v32 = vsel %vm1178_vm10, %v1179_v52, %v3584_v17  ;;  %vm901_vm12 = vweird.f32 %v3338_v23 }
 0x214   : > { %v1181_v24 = vadd.s32 %v1180_v32, %v1176_v55  ;;  %v1967_v43 = vand.u32 31, %v1965_v26  ;;  %vm904_vm13 = vcmp.lt.s32.totalorder %v903_v10, 2  ;;  %vm905_vm14 = vcmp.eq.s32.totalorder %v903_v10, 0 }
 0x215   : > { %v2455_v18 = vpop.eup %2454  ;;  %vm908_vm15 = vcmp.eq.s32.totalorder %v903_v10, 2  ;;  %v1720_v59 = vor.u32 4788187, %v1719_v5  ;;  %v1734_v33 = vadd.s32 3, %v1730_v28  ;;  %v1723_v58 = vcvt.s32.f32 %v1716_v40 }
 0x216   : > { %v2457_v35 = vpop.eup %2456  ;;  %v909_v13 = vxor.u32 2147483648, %v2455_v18  ;;  %v1182_v15 = vadd.s32 536870912, %v1181_v24  ;;  %v1968_v57 = vsub.s32 32, %v1967_v43  ;;  %v1961_v25 = vor.u32 8388608, %v1960_v3 }
 0x217   : > { %v906_v14 = vxor.u32 2147483648, %v2457_v35  ;;  %v1721_v61 = vand.u32 2147483647, %v1720_v59  ;;  %v1970_v27 = vshll.u32 %v2542_v56, %v1967_v43  ;;  %v1966_v39 = vshrl.u32 %v1965_v26, 5 }
 0x218   : > { %v910_v19 = vsel %vm908_vm15, %v909_v13, %v2457_v35  ;;  %v3611_v49 = vshrl.u32 %v1182_v15, 30  ;;  %v1971_v12 = vshrl.u32 %v2543_v60, %v1968_v57  ;;  %v1974_v51 = vshrl.u32 %v2544_v62, %v1968_v57 }
 0x219   : > { %v907_v41 = vsel %vm905_vm14, %v2455_v18, %v906_v14  ;;  %v1724_v50 = vmul.f32 %v1723_v58, %v1721_v61  ;;  %v1977_v8 = vshrl.u32 %v2545_v0, %v1968_v57  ;;  %v1973_v37 = vshll.u32 %v2543_v60, %v1967_v43  ;;  %v384_v58 = vpop.f32.mrf.mxu1 }
 0x21a   : > { %v911_v44 = vsel %vm904_vm13, %v907_v41, %v910_v19  ;;  %v1184_v29 = vshll.u32 %v3611_v49, 30  ;;  %v1972_v30 = vor.u32 %v1971_v12, %v1970_v27  ;;  %v1976_v17 = vshll.u32 %v2544_v62, %v1967_v43 }
 0x21b   : > { %v912_v31 = vsel %vm901_vm12, nan, %v911_v44  ;;  %v1725_v4 = vxor.u32 2147483648, %v1724_v50  ;;  %v1975_v34 = vor.u32 %v1974_v51, %v1973_v37  ;;  %v1979_v36 = vshll.u32 %v2545_v0, %v1967_v43 }
 0x21c   : > { %2061 = vst [vmem:[%s2978_s20 + $0x20] sm:$0xff] %v912_v31  ;;  %v3625_v20 = vsub.s32 %v1181_v24, %v1184_v29  ;;  %v1980_v1 = vshrl.u32 %v2546_v2, %v1968_v57  ;;  %v1978_v63 = vor.u32 %v1977_v8, %v1976_v17  ;;  %v1982_v23 = vshll.u32 %v2546_v2, %v1967_v43 }
 0x21d   : > { %v1726_v53 = vsel %vm1643_vm3, %v1725_v4, %v1724_v50  ;;  %v1983_v10 = vshrl.u32 %v2547_v9, %v1968_v57  ;;  %v3636_v16 = vand.u32 3, %v1734_v33  ;;  %vm1985_vm0 = vcmp.lt.s32.totalorder %v1966_v39, 1 }
 0x21e   : > { %v1729_v54 = vsel %vm3596_vm9, %v3410_v7, %v1726_v53  ;;  %v1187_v45 = vsub.s32 0, %v3625_v20  ;;  %v1981_v52 = vor.u32 %v1980_v1, %v1979_v36  ;;  %v3640_v55 = vadd.f32 %v3470_v46, %v344_v22 }
 0x21f   : > { %2458 = vcosq.f32 %v1729_v54  ;;  %v1984_v28 = vor.u32 %v1983_v10, %v1982_v23  ;;  %v1969_v40 = vshrl.u32 %v2542_v56, %v1968_v57  ;;  %vm1988_vm1 = vcmp.lt.s32.totalorder %v1966_v39, 4 }
 0x220   : > { %2460 = vsinq.f32 %v1729_v54  ;;  %v2202_v26 = vmin.u32 %v1187_v45, %v3625_v20  ;;  %v1990_v5 = vsel %vm1988_vm1, %v1978_v63, 2102212464  ;;  %v1993_v48 = vsel %vm1985_vm0, %v1972_v30, %v1975_v34 }
 0x221   : > { %v1994_v32 = vsel %vm1988_vm1, %v1981_v52, 920167782  ;;  %v2001_v3 = vshll.u32 %v1961_v25, 8  ;;  %vm1987_vm2 = vcmp.lt.s32.totalorder %v1966_v39, 3  ;;  %v1989_v43 = vsel %vm1985_vm0, %v1969_v40, %v1972_v30 }
 0x222   : > { %v1189_v24 = vclz %v2202_v26  ;;  %v1997_v18 = vsel %vm1985_vm0, %v1975_v34, %v1978_v63  ;;  %vm1986_vm3 = vcmp.lt.s32.totalorder %v1966_v39, 2  ;;  %v1991_v59 = vsel %vm1987_vm2, %v1975_v34, %v1990_v5 }
 0x223   : > { %v1995_v35 = vsel %vm1987_vm2, %v1978_v63, %v1994_v32  ;;  %v1998_v13 = vsel %vm1988_vm1, %v1984_v28, 1326507024  ;;  %v1207_v15 = vsub.s32 4, %v3611_v49  ;;  %v1992_v57 = vsel %vm1986_vm3, %v1989_v43, %v1991_v59 }
 0x224   : > { %v2203_v33 = vadd.s32 4294967294, %v1189_v24  ;;  %v1996_v14 = vsel %vm1986_vm3, %v1993_v48, %v1995_v35  ;;  %v1999_v61 = vsel %vm1987_vm2, %v1981_v52, %v1998_v13  ;;  %v1020_v50 = vand.u32 2139095040, %v3640_v55 }
 0x225   : > { %v2000_v19 = vsel %vm1986_vm3, %v1997_v18, %v1999_v61  ;;  %v3645_v27 = vmul.u32.u64.low %v2001_v3, %v1996_v14  ;;  %v3646_v12 = vmul.u32.u64.high %v2001_v3, %v1996_v14, %v3645_v27  ;;  %vm1123_vm5 = vcmp.lt.s32.totalorder %v3473_v21, 0 }
 0x226   : > { %vm2204_vm4 = vcmp.lt.s32.totalorder %v2203_v33, 0  ;;  %v3649_v25 = vmul.u32.u64.low %v2001_v3, %v2000_v19  ;;  %v3650_v41 = vmul.u32.u64.high %v2001_v3, %v2000_v19, %v3649_v25  ;;  %v1177_v51 = vadd.s32 %v3583_v38, %v3590_v47 }
 0x227   : > { %v1192_v8 = vsel %vm2204_vm4, 0, %v2203_v33  ;;  %v3657_v44 = vadd.f32 %v3470_v46, %v384_v58  ;;  %v1208_v37 = vsel %vm1123_vm5, %v1207_v15, %v3611_v49  ;;  %v1021_v31 = vshrl.u32 %v1020_v50, 23 }
 0x228   : > { %v1193_v29 = vsub.s32 32, %v1192_v8  ;;  %v1197_v39 = vsub.s32 4294967266, %v1192_v8  ;;  %vm1736_vm6 = vcmp.lt.s32.totalorder %v3636_v16, 2  ;;  %vm3665_vm7 = vcmp.le.f32.partialorder %v1121_v6, 0.7853982 }
 0x229   : > { %v2008_v38 = vmul.u32 %v2001_v3, %v1992_v57  ;;  %v2011_v47 = vadd.s32 1, %v3646_v12  ;;  %v1194_v46 = vshll.u32 %v3625_v20, %v1192_v8  ;;  %vm2010_vm8 = vc.u32 %v3650_v41, %v3645_v27 }
 0x22a   : > { %v1195_v30 = vshrl.u32 %v1177_v51, %v1193_v29  ;;  %v1198_v17 = vadd.s32 127, %v1197_v39  ;;  %v1210_v49 = vsel %vm3665_vm7, 0, %v1208_v37  ;;  %v2197_v36 = vadd.s32 4294967169, %v1021_v31 }
 0x22b   : > { %v2012_v34 = vsel %vm2010_vm8, %v2011_v47, %v3646_v12  ;;  %v1852_v6 = vand.u32 2139095040, %v3657_v44  ;;  %vm1737_vm9 = vcmp.eq.s32.totalorder %v3636_v16, 0  ;;  %vm1740_vm11 = vcmp.eq.s32.totalorder %v3636_v16, 2 }
 0x22c   : > { %v2459_v1 = vpop.eup %2458  ;;  %v1196_v22 = vor.u32 %v1195_v30, %v1194_v46  ;;  %v1199_v53 = vshll.u32 %v1198_v17, 23  ;;  %v2013_v63 = vadd.s32 %v2012_v34, %v2008_v38  ;;  %v1017_v10 = vand.u32 2147483647, %v3640_v55 }
 0x22d   : > { %v2461_v20 = vpop.eup %2460  ;;  %v1741_v23 = vxor.u32 2147483648, %v2459_v1  ;;  %v1027_v54 = vadd.s32 1, %v2197_v36  ;;  %v1214_v28 = vadd.s32 3, %v1210_v49  ;;  %v1853_v48 = vshrl.u32 %v1852_v6, 23 }
 0x22e   : > { %v1738_v45 = vxor.u32 2147483648, %v2461_v20  ;;  %v1200_v52 = vor.u32 4788187, %v1199_v53  ;;  %v2014_v26 = vadd.s32 536870912, %v2013_v63  ;;  %v1203_v5 = vcvt.s32.f32 %v1196_v22 }
 0x22f   : > { %v1742_v40 = vsel %vm1740_vm11, %v1741_v23, %v2461_v20  ;;  %vm1028_vm10 = vcmp.gt.s32.totalorder %v1027_v54, 0  ;;  %vm1733_vm12 = vweird.f32 %v3410_v7  ;;  %v3689_v15 = vand.u32 3, %v1214_v28 }
 0x230   : > { %v1739_v32 = vsel %vm1737_vm9, %v2459_v1, %v1738_v45  ;;  %v1201_v3 = vand.u32 2147483647, %v1200_v52  ;;  %v3682_v24 = vshrl.u32 %v2014_v26, 30  ;;  %v1029_v43 = vsel %vm1028_vm10, %v1027_v54, 0 }
 0x231   : > { %v1743_v18 = vsel %vm1736_vm6, %v1739_v32, %v1742_v40  ;;  %v1031_v59 = vand.u32 31, %v1029_v43  ;;  %v1024_v14 = vand.u32 8388607, %v1017_v10  ;;  %v1030_v19 = vshrl.u32 %v1029_v43, 5 }
 0x232   : > { %v1744_v35 = vsel %vm1733_vm12, nan, %v1743_v18  ;;  %v1204_v13 = vmul.f32 %v1203_v5, %v1201_v3  ;;  %v2016_v33 = vshll.u32 %v3682_v24, 30  ;;  %v2229_v7 = vadd.s32 4294967169, %v1853_v48 }
 0x233   : > { %2069 = vst [vmem:[%s2978_s20 + $0x60] sm:$0xff] %v1744_v35  ;;  %v1032_v61 = vsub.s32 32, %v1031_v59  ;;  %v1034_v16 = vshll.u32 %v2542_v56, %v1031_v59  ;;  %v1037_v25 = vshll.u32 %v2543_v60, %v1031_v59  ;;  %v1040_v29 = vshll.u32 %v2544_v62, %v1031_v59 }
 0x234   : > { %v1205_v58 = vxor.u32 2147483648, %v1204_v13  ;;  %v3693_v57 = vsub.s32 %v2013_v63, %v2016_v33  ;;  %v1043_v38 = vshll.u32 %v2545_v0, %v1031_v59  ;;  %v1046_v34 = vshll.u32 %v2546_v2, %v1031_v59 }
 0x235   : > { %v1035_v12 = vshrl.u32 %v2543_v60, %v1032_v61  ;;  %v1038_v50 = vshrl.u32 %v2544_v62, %v1032_v61  ;;  %v1041_v39 = vshrl.u32 %v2545_v0, %v1032_v61  ;;  %v1044_v47 = vshrl.u32 %v2546_v2, %v1032_v61 }
 0x236   : > { %v1206_v51 = vsel %vm1123_vm5, %v1205_v58, %v1204_v13  ;;  %v2019_v8 = vsub.s32 0, %v3693_v57  ;;  %v1047_v36 = vshrl.u32 %v2547_v9, %v1032_v61  ;;  %v2009_v4 = vadd.s32 %v3645_v27, %v3650_v41 }
 0x237   : > { %v1209_v37 = vsel %vm3665_vm7, %v3473_v21, %v1206_v51  ;;  %v1036_v31 = vor.u32 %v1035_v12, %v1034_v16  ;;  %v1039_v30 = vor.u32 %v1038_v50, %v1037_v25  ;;  %v1042_v17 = vor.u32 %v1041_v39, %v1040_v29 }
 0x238   : > { %2462 = vcosq.f32 %v1209_v37  ;;  %v2234_v46 = vmin.u32 %v2019_v8, %v3693_v57  ;;  %v1045_v49 = vor.u32 %v1044_v47, %v1043_v38  ;;  %v1025_v1 = vor.u32 8388608, %v1024_v14 }
 0x239   : > { %2464 = vsinq.f32 %v1209_v37  ;;  %v1849_v22 = vand.u32 2147483647, %v3657_v44  ;;  %v1033_v53 = vshrl.u32 %v2542_v56, %v1032_v61  ;;  %v1048_v63 = vor.u32 %v1047_v36, %v1046_v34 }
 0x23a   : > { %v2021_v6 = vclz %v2234_v46  ;;  %vm1049_vm13 = vcmp.lt.s32.totalorder %v1030_v19, 1  ;;  %v1859_v20 = vadd.s32 1, %v2229_v7  ;;  %vm1051_vm14 = vcmp.lt.s32.totalorder %v1030_v19, 3 }
 0x23b   : > { %vm1052_vm15 = vcmp.lt.s32.totalorder %v1030_v19, 4  ;;  %v1057_v54 = vsel %vm1049_vm13, %v1036_v31, %v1039_v30  ;;  %v1061_v28 = vsel %vm1049_vm13, %v1039_v30, %v1042_v17  ;;  %vm1955_vm0 = vcmp.lt.s32.totalorder %v3530_v11, 0 }
 0x23c   : > { %v2235_v23 = vadd.s32 4294967294, %v2021_v6  ;;  %v1054_v45 = vsel %vm1052_vm15, %v1042_v17, 2102212464  ;;  %v1058_v52 = vsel %vm1052_vm15, %v1045_v49, 920167782  ;;  %vm1050_vm2 = vcmp.lt.s32.totalorder %v1030_v19, 2 }
 0x23d   : > { %v1062_v26 = vsel %vm1052_vm15, %v1048_v63, 1326507024  ;;  %v1059_v27 = vsel %vm1051_vm14, %v1042_v17, %v1058_v52  ;;  %v1065_v32 = vshll.u32 %v1025_v1, 8  ;;  %v1053_v18 = vsel %vm1049_vm13, %v1033_v53, %v1036_v31 }
 0x23e   : > { %vm2236_vm1 = vcmp.lt.s32.totalorder %v2235_v23, 0  ;;  %v1063_v41 = vsel %vm1051_vm14, %v1045_v49, %v1062_v26  ;;  %v1060_v5 = vsel %vm1050_vm2, %v1057_v54, %v1059_v27  ;;  %v1055_v59 = vsel %vm1051_vm14, %v1039_v30, %v1054_v45 }
 0x23f   : > { %v2024_v40 = vsel %vm2236_vm1, 0, %v2235_v23  ;;  %v1064_v48 = vsel %vm1050_vm2, %v1061_v28, %v1063_v41  ;;  %v3728_v33 = vmul.u32.u64.low %v1065_v32, %v1060_v5  ;;  %v3729_v14 = vmul.u32.u64.high %v1065_v32, %v1060_v5, %v3728_v33 }
 0x240   : > { %v2025_v3 = vsub.s32 32, %v2024_v40  ;;  %v2029_v43 = vsub.s32 4294967266, %v2024_v40  ;;  %v3725_v35 = vmul.u32.u64.low %v1065_v32, %v1064_v48  ;;  %v3726_v13 = vmul.u32.u64.high %v1065_v32, %v1064_v48, %v3725_v35 }
 0x241   : > { %vm1213_vm3 = vweird.f32 %v3473_v21  ;;  %v2026_v61 = vshll.u32 %v3693_v57, %v2024_v40  ;;  %vm1860_vm4 = vcmp.gt.s32.totalorder %v1859_v20, 0  ;;  %v2039_v16 = vsub.s32 4, %v3682_v24 }
 0x242   : > { %v2027_v58 = vshrl.u32 %v2009_v4, %v2025_v3  ;;  %v2030_v7 = vadd.s32 127, %v2029_v43  ;;  %v1056_v12 = vsel %vm1050_vm2, %v1053_v18, %v1055_v59  ;;  %v1856_v25 = vand.u32 8388607, %v1849_v22 }
 0x243   : > { %v1861_v50 = vsel %vm1860_vm4, %v1859_v20, 0  ;;  %vm1216_vm5 = vcmp.lt.s32.totalorder %v3689_v15, 2  ;;  %vm1217_vm6 = vcmp.eq.s32.totalorder %v3689_v15, 0  ;;  %vm1220_vm7 = vcmp.eq.s32.totalorder %v3689_v15, 2 }
 0x244   : > { %v2028_v51 = vor.u32 %v2027_v58, %v2026_v61  ;;  %v2031_v8 = vshll.u32 %v2030_v7, 23  ;;  %v1863_v29 = vand.u32 31, %v1861_v50  ;;  %vm1074_vm8 = vc.u32 %v3726_v13, %v3728_v33 }
 0x245   : > { %v2463_v39 = vpop.eup %2462  ;;  %v1075_v57 = vadd.s32 1, %v3729_v14  ;;  %vm3746_vm9 = vcmp.le.f32.partialorder %v1953_v42, 0.7853982  ;;  %v1072_v47 = vmul.u32 %v1065_v32, %v1056_v12  ;;  %v2040_v17 = vsel %vm1955_vm0, %v2039_v16, %v3682_v24 }
 0x246   : > { %v2465_v19 = vpop.eup %2464  ;;  %v1221_v37 = vxor.u32 2147483648, %v2463_v39  ;;  %v2032_v38 = vor.u32 4788187, %v2031_v8  ;;  %v1864_v46 = vsub.s32 32, %v1863_v29  ;;  %v1857_v34 = vor.u32 8388608, %v1856_v25 }
 0x247   : > { %v1218_v30 = vxor.u32 2147483648, %v2465_v19  ;;  %v1076_v49 = vsel %vm1074_vm8, %v1075_v57, %v3729_v14  ;;  %v2035_v6 = vcvt.s32.f32 %v2028_v51  ;;  %v1862_v53 = vshrl.u32 %v1861_v50, 5 }
 0x248   : > { %v1222_v36 = vsel %vm1220_vm7, %v1221_v37, %v2465_v19  ;;  %v2033_v4 = vand.u32 2147483647, %v2032_v38  ;;  %v1077_v1 = vadd.s32 %v1076_v49, %v1072_v47  ;;  %v1867_v63 = vshrl.u32 %v2543_v60, %v1864_v46 }
 0x249   : > { %v1219_v42 = vsel %vm1217_vm6, %v2463_v39, %v1218_v30  ;;  %v1870_v20 = vshrl.u32 %v2544_v62, %v1864_v46  ;;  %v1873_v45 = vshrl.u32 %v2545_v0, %v1864_v46  ;;  %v1866_v28 = vshll.u32 %v2542_v56, %v1863_v29 }
 0x24a   : > { %v1223_v23 = vsel %vm1216_vm5, %v1219_v42, %v1222_v36  ;;  %v2036_v24 = vmul.f32 %v2035_v6, %v2033_v4  ;;  %v1078_v54 = vadd.s32 536870912, %v1077_v1  ;;  %v1869_v26 = vshll.u32 %v2543_v60, %v1863_v29 }
 0x24b   : > { %v1224_v52 = vsel %vm1213_vm3, nan, %v1223_v23  ;;  %v1872_v27 = vshll.u32 %v2544_v62, %v1863_v29  ;;  %v1875_v15 = vshll.u32 %v2545_v0, %v1863_v29  ;;  %v1876_v5 = vshrl.u32 %v2546_v2, %v1864_v46 }
 0x24c   : > { %2064 = vst [vmem:[%s2978_s20 + $0x38] sm:$0xff] %v1224_v52  ;;  %v2037_v41 = vxor.u32 2147483648, %v2036_v24  ;;  %v3767_v40 = vshrl.u32 %v1078_v54, 30  ;;  %v1868_v48 = vor.u32 %v1867_v63, %v1866_v28  ;;  %v1871_v32 = vor.u32 %v1870_v20, %v1869_v26 }
 0x24d   : > { %v1878_v3 = vshll.u32 %v2546_v2, %v1863_v29  ;;  %v1879_v21 = vshrl.u32 %v2547_v9, %v1864_v46  ;;  %v1874_v62 = vor.u32 %v1873_v45, %v1872_v27  ;;  %v1877_v18 = vor.u32 %v1876_v5, %v1875_v15 }
 0x24e   : > { %v2038_v43 = vsel %vm1955_vm0, %v2037_v41, %v2036_v24  ;;  %v1080_v60 = vshll.u32 %v3767_v40, 30  ;;  %v2042_v0 = vsel %vm3746_vm9, 0, %v2040_v17  ;;  %vm1881_vm11 = vcmp.lt.s32.totalorder %v1862_v53, 1 }
 0x24f   : > { %v2041_v59 = vsel %vm3746_vm9, %v3530_v11, %v2038_v43  ;;  %v1880_v35 = vor.u32 %v1879_v21, %v1878_v3  ;;  %v1897_v2 = vshll.u32 %v1857_v34, 8  ;;  %v1865_v9 = vshrl.u32 %v2542_v56, %v1864_v46 }
 0x250   : > { %2466 = vcosq.f32 %v2041_v59  ;;  %v1081_v14 = vsub.s32 %v1077_v1, %v1080_v60  ;;  %vm1884_vm10 = vcmp.lt.s32.totalorder %v1862_v53, 4  ;;  %v1889_v61 = vsel %vm1881_vm11, %v1868_v48, %v1871_v32 }
 0x251   : > { %2468 = vsinq.f32 %v2041_v59  ;;  %vm1883_vm12 = vcmp.lt.s32.totalorder %v1862_v53, 3  ;;  %v1886_v7 = vsel %vm1884_vm10, %v1874_v62, 2102212464  ;;  %v1890_v16 = vsel %vm1884_vm10, %v1877_v18, 920167782 }
 0x252   : > { %v1083_v58 = vsub.s32 0, %v1081_v14  ;;  %vm1882_vm13 = vcmp.lt.s32.totalorder %v1862_v53, 2  ;;  %v1891_v12 = vsel %vm1883_vm12, %v1874_v62, %v1890_v16  ;;  %v1893_v25 = vsel %vm1881_vm11, %v1871_v32, %v1874_v62 }
 0x253   : > { %v1894_v50 = vsel %vm1884_vm10, %v1880_v35, 1326507024  ;;  %v1885_v8 = vsel %vm1881_vm11, %v1865_v9, %v1868_v48  ;;  %v1892_v29 = vsel %vm1882_vm13, %v1889_v61, %v1891_v12  ;;  %v1887_v57 = vsel %vm1883_vm12, %v1871_v32, %v1886_v7 }
 0x254   : > { %v2198_v51 = vmin.u32 %v1083_v58, %v1081_v14  ;;  %v1895_v39 = vsel %vm1883_vm12, %v1877_v18, %v1894_v50  ;;  %v3784_v37 = vmul.u32.u64.low %v1897_v2, %v1892_v29  ;;  %v3785_v56 = vmul.u32.u64.high %v1897_v2, %v1892_v29, %v3784_v37 }
 0x255   : > { %v1896_v19 = vsel %vm1882_vm13, %v1893_v25, %v1895_v39  ;;  %v2046_v38 = vadd.s32 3, %v2042_v0  ;;  %v1888_v17 = vsel %vm1882_vm13, %v1885_v8, %v1887_v57  ;;  %v1073_v6 = vadd.s32 %v3728_v33, %v3726_v13 }
 0x256   : > { %v1085_v31 = vclz %v2198_v51  ;;  %v3787_v47 = vmul.u32.u64.low %v1897_v2, %v1896_v19  ;;  %v3788_v46 = vmul.u32.u64.high %v1897_v2, %v1896_v19, %v3787_v47  ;;  %v1907_v49 = vadd.s32 1, %v3785_v56 }
 0x257   : > { %v2047_v34 = vand.u32 3, %v2046_v38  ;;  %v1904_v4 = vmul.u32 %v1897_v2, %v1888_v17  ;;  %vm2045_vm3 = vweird.f32 %v3530_v11  ;;  %vm1019_vm4 = vcmp.lt.s32.totalorder %v3640_v55, 0 }
 0x258   : > { %v2199_v30 = vadd.s32 4294967294, %v1085_v31  ;;  %vm1906_vm15 = vc.u32 %v3788_v46, %v3784_v37  ;;  %v1103_v0 = vsub.s32 4, %v3767_v40  ;;  %vm1018_vm5 = vcmp.le.f32.partialorder %v1017_v10, 0.7853982 }
 0x259   : > { %v1908_v63 = vsel %vm1906_vm15, %v1907_v49, %v3785_v56  ;;  %vm2052_vm0 = vcmp.eq.s32.totalorder %v2047_v34, 2  ;;  %vm2049_vm1 = vcmp.eq.s32.totalorder %v2047_v34, 0  ;;  %vm2048_vm2 = vcmp.lt.s32.totalorder %v2047_v34, 2 }
 0x25a   : > { %vm2200_vm14 = vcmp.lt.s32.totalorder %v2199_v30, 0  ;;  %v1909_v23 = vadd.s32 %v1908_v63, %v1904_v4  ;;  %v1104_v9 = vsel %vm1019_vm4, %v1103_v0, %v3767_v40  ;;  %v1905_v16 = vadd.s32 %v3784_v37, %v3788_v46 }
 0x25b   : > { %v1088_v36 = vsel %vm2200_vm14, 0, %v2199_v30  ;;  %v1106_v58 = vsel %vm1018_vm5, 0, %v1104_v9  ;;  %vm1109_vm11 = vweird.f32 %v3640_v55  ;;  %vm1851_vm10 = vcmp.lt.s32.totalorder %v3657_v44, 0 }
 0x25c   : > { %v1089_v1 = vsub.s32 32, %v1088_v36  ;;  %v1093_v42 = vsub.s32 4294967266, %v1088_v36  ;;  %v1090_v54 = vshll.u32 %v1081_v14, %v1088_v36  ;;  %v1910_v26 = vadd.s32 536870912, %v1909_v23 }
 0x25d   : > { %v2467_v20 = vpop.eup %2466  ;;  %v1110_v50 = vadd.s32 3, %v1106_v58  ;;  %vm1850_vm12 = vcmp.le.f32.partialorder %v1849_v22, 0.7853982 }
 0x25e   : > { %v2469_v24 = vpop.eup %2468  ;;  %v2053_v53 = vxor.u32 2147483648, %v2467_v20  ;;  %v1091_v45 = vshrl.u32 %v1073_v6, %v1089_v1  ;;  %v1094_v52 = vadd.s32 127, %v1093_v42  ;;  %v1911_v33 = vshrl.u32 %v1910_v26, 30 }
 0x25f   : > { %v2050_v28 = vxor.u32 2147483648, %v2469_v24  ;;  %v1111_v57 = vand.u32 3, %v1110_v50 }
 0x260   : > { %v2054_v27 = vsel %vm2052_vm0, %v2053_v53, %v2469_v24  ;;  %v1092_v41 = vor.u32 %v1091_v45, %v1090_v54  ;;  %v1095_v15 = vshll.u32 %v1094_v52, 23  ;;  %v1912_v3 = vshll.u32 %v1911_v33, 30 }
 0x261   : > { %v2051_v13 = vsel %vm2049_vm1, %v2467_v20, %v2050_v28  ;;  %vm1116_vm7 = vcmp.eq.s32.totalorder %v1111_v57, 2  ;;  %vm1113_vm8 = vcmp.eq.s32.totalorder %v1111_v57, 0  ;;  %vm1112_vm9 = vcmp.lt.s32.totalorder %v1111_v57, 2 }
 0x262   : > { %v2055_v5 = vsel %vm2048_vm2, %v2051_v13, %v2054_v27  ;;  %v1096_v48 = vor.u32 4788187, %v1095_v15  ;;  %v1099_v43 = vcvt.s32.f32 %v1092_v41  ;;  %v1913_v60 = vsub.s32 %v1909_v23, %v1912_v3 }
 0x263   : > { %v2056_v32 = vsel %vm2045_vm3, nan, %v2055_v5  ;;  %v1935_v36 = vsub.s32 4, %v1911_v33  ;;  %vm1941_vm0 = vweird.f32 %v3657_v44 }
 0x264   : > { %2072 = vst [vmem:[%s2978_s20 + $0x78] sm:$0xff] %v2056_v32  ;;  %v1097_v21 = vand.u32 2147483647, %v1096_v48  ;;  %v1915_v18 = vsub.s32 0, %v1913_v60 }
 0x265   : > { %v1936_v42 = vsel %vm1851_vm10, %v1935_v36, %v1911_v33 }
 0x266   : > { %v1100_v62 = vmul.f32 %v1099_v43, %v1097_v21  ;;  %v2230_v35 = vmin.u32 %v1915_v18, %v1913_v60  ;;  %v1938_v63 = vsel %vm1850_vm12, 0, %v1936_v42 }
 0x267   : > { %v1942_v20 = vadd.s32 3, %v1938_v63 }
 0x268   : > { %v1101_v59 = vxor.u32 2147483648, %v1100_v62  ;;  %v1917_v2 = vclz %v2230_v35 }
 0x26a   : > { %v1102_v11 = vsel %vm1019_vm4, %v1101_v59, %v1100_v62  ;;  %v2231_v61 = vadd.s32 4294967294, %v1917_v2 }
 0x26b   : > { %v1105_v14 = vsel %vm1018_vm5, %v3640_v55, %v1102_v11  ;;  %v1943_v55 = vand.u32 3, %v1942_v20 }
 0x26c   : > { %2470 = vcosq.f32 %v1105_v14  ;;  %vm2232_vm6 = vcmp.lt.s32.totalorder %v2231_v61, 0 }
 0x26d   : > { %2472 = vsinq.f32 %v1105_v14  ;;  %v1920_v7 = vsel %vm2232_vm6, 0, %v2231_v61  ;;  %vm1948_vm13 = vcmp.eq.s32.totalorder %v1943_v55, 2  ;;  %vm1945_vm14 = vcmp.eq.s32.totalorder %v1943_v55, 0 }
 0x26e   : > { %v1921_v12 = vsub.s32 32, %v1920_v7  ;;  %v1925_v25 = vsub.s32 4294967266, %v1920_v7  ;;  %v1922_v51 = vshll.u32 %v1913_v60, %v1920_v7  ;;  %vm1944_vm15 = vcmp.lt.s32.totalorder %v1943_v55, 2 }
 0x270   : > { %v1923_v8 = vshrl.u32 %v1905_v16, %v1921_v12  ;;  %v1926_v10 = vadd.s32 127, %v1925_v25 }
 0x272   : > { %v1924_v29 = vor.u32 %v1923_v8, %v1922_v51  ;;  %v1927_v39 = vshll.u32 %v1926_v10, 23 }
 0x274   : > { %v1928_v19 = vor.u32 4788187, %v1927_v39  ;;  %v1931_v40 = vcvt.s32.f32 %v1924_v29 }
 0x276   : > { %v1929_v31 = vand.u32 2147483647, %v1928_v19 }
 0x278   : > { %v1932_v17 = vmul.f32 %v1931_v40, %v1929_v31 }
 0x279   : > { %v2471_v56 = vpop.eup %2470 }
 0x27a   : > { %v2473_v38 = vpop.eup %2472  ;;  %v1117_v47 = vxor.u32 2147483648, %v2471_v56  ;;  %v1933_v49 = vxor.u32 2147483648, %v1932_v17 }
 0x27b   : > { %v1114_v30 = vxor.u32 2147483648, %v2473_v38 }
 0x27c   : > { %v1118_v37 = vsel %vm1116_vm7, %v1117_v47, %v2473_v38  ;;  %v1934_v6 = vsel %vm1851_vm10, %v1933_v49, %v1932_v17 }
 0x27d   : > { %v1115_v46 = vsel %vm1113_vm8, %v2471_v56, %v1114_v30  ;;  %v1937_v1 = vsel %vm1850_vm12, %v3657_v44, %v1934_v6 }
 0x27e   : > { %v1119_v34 = vsel %vm1112_vm9, %v1115_v46, %v1118_v37  ;;  %2474 = vcosq.f32 %v1937_v1 }
 0x27f   : > { %v1120_v4 = vsel %vm1109_vm11, nan, %v1119_v34  ;;  %2476 = vsinq.f32 %v1937_v1 }
 0x280   : > { %2063 = vst [vmem:[%s2978_s20 + $0x30] sm:$0xff] %v1120_v4 }
 0x28b   : > { %v2475_v23 = vpop.eup %2474 }
 0x28c   : > { %v2477_v24 = vpop.eup %2476  ;;  %v1949_v53 = vxor.u32 2147483648, %v2475_v23 }
 0x28d   : > { %v1946_v54 = vxor.u32 2147483648, %v2477_v24 }
 0x28e   : > { %v1950_v22 = vsel %vm1948_vm13, %v1949_v53, %v2477_v24 }
 0x28f   : > { %v1947_v45 = vsel %vm1945_vm14, %v2475_v23, %v1946_v54 }
 0x290   : > { %v1951_v52 = vsel %vm1944_vm15, %v1947_v45, %v1950_v22 }
 0x291   : > { %v1952_v28 = vsel %vm1941_vm0, nan, %v1951_v52 }
 0x292   : > { %2071 = vst [vmem:[%s2978_s20 + $0x70] sm:$0xff] %v1952_v28 }
 0x293   : > { %2493 = shalt.err (!%p2490_p3)
}
 0x294   : > { %s2494_s10 = scalar_lea.hbm %s3816_s5, 2048  ;;  %s2498_s19 = scalar_lea.hbm %s3867_s3, 4096 }
 0x295   : > { %p2495_p4 = scmp.ne.s32.totalorder %s3816_s5, %s2494_s10  ;;  %p2499_p9 = scmp.lt.s32.totalorder %s3816_s5, %s3867_s3 }
 0x296   : > { %p2500_p10 = scmp.lt.s32.totalorder %s2498_s19, %s2494_s10 }
 0x297   : > { %p2496_p7 = pnand %p2495_p4, %p2609_p5 }
 0x298   : > { %p2501_p11 = por %p2500_p10, %p2499_p9 }
 0x299   : > { %p2497_p8 = pneg %p2496_p7 }
 0x29b   : > { %p2502_p12 = pnand %p2501_p11, %p2497_p8 }
 0x29d   : > { %2505 = shalt.err (!%p2502_p12)
}
 0x29e   : > { %s2549_s25 = smov 128   ;;  %s2550_s26 = smov 8  }
 0x29f   : > { %2367 = dma.vmem_to_hbm [thread:$0]  (%p2609_p5), %s3818_s29, 2048, %s3816_s5, %s3824_s16, %s2549_s25, %s2549_s25, %s2550_s26  }
 0x2a0 PF: > { %p2373_p13 = scmp.ge.s32.totalorder %s2540_s15, 2  ;;  %s2102_s27 = sand.u32 1, %s2528_s12  }
 0x2a1   : > { %s2103_s28 = scalar_lea.sflag [#allocation3], %s2102_s27 }
 0x2a2   : > { %p2370_p0 = pnand %p2373_p13, %p2613_p6 }
 0x2a4   : > { %p2371_p1 = pneg %p2370_p0 }
 0x2a6   : > { %2523 = dma.done.wait (%p2371_p1), %s2103_s28, 2048  }
 0x2a7   : > { %2525 = vsyncadd (%p2371_p1), %s2103_s28, 4294965248  ;;  %p13_p2 = scmp.ge.s32.totalorder %s2596_s18, 4   ;;  %s3898_s12 = smov %s2532_s13 }
 0x2a8   : > { %s3899_s13 = smov %s2536_s14  ;;  %s3900_s14 = smov %s2607_s21 }
 0x2a9   : > { %s3901_s15 = smov %s2596_s18  ;;  %15 = sbr.rel (!%p13_p2) target bundleno = 3 (0x3), region = 67 }
 0x2ae   :  { %2108 = vsyncpa [#allocation3], 1 }
 0x2af   :  { %2110 = vsyncpa [#allocation3 + $0x1], 1 }

</bundles_post_ra>
